<compile_context>
chip_gen: v7x
topology: tpu7x:2x2x1
jax: 0.10.0
libtpu: 0.0.40
codegen_flags: <defaults>
</compile_context>

<pallas_src>
import jax
import jax.numpy as jnp
from jax.experimental import pallas as pl
from jax.experimental.pallas import tpu as pltpu


def _elu1(x):
    # ELU(x) + 1 with alpha = 1 (PyTorch nn.ELU default): x>0 -> x+1, else exp(x).
    return jnp.where(x > 0, x + 1.0, jnp.exp(x))


def interaction_pruning_kernel(ind_ref, feat_ref, w_qkv_ref, m_gate_ref, out_ref):
    tb, f, d = feat_ref.shape

    # Fuse (batch-tile, feature) into the MXU M dimension.  These reshapes only
    # collapse/split leading dims (last dim unchanged) -> layout-trivial.
    feat2 = feat_ref[...].reshape(tb * f, d)
    ind2 = ind_ref[...].reshape(tb * f, d)

    # One wide projection matmul: [TB*F, D] @ [D, 3D]  ->  (Q | K | V) columns.
    qkv = jnp.dot(feat2, w_qkv_ref[...], preferred_element_type=jnp.float32)
    q = _elu1(qkv[:, 0 * d:1 * d]).reshape(tb, f, d)
    k = _elu1(qkv[:, 1 * d:2 * d]).reshape(tb, f, d)
    v = qkv[:, 2 * d:3 * d].reshape(tb, f, d)

    # Gate path (fused): (ind Wqi)(ind Wki)^T == (ind (Wqi Wki^T)) ind^T.
    gi = jnp.dot(ind2, m_gate_ref[...],
                 preferred_element_type=jnp.float32).reshape(tb, f, d)
    gate_raw = jnp.einsum('bid,bjd->bij', gi, ind_ref[...],
                          preferred_element_type=jnp.float32)         # [tb, F, F]

    # Attention path: contracted einsums (no explicit .T -> no XLU transpose).
    score = jnp.einsum('bid,bjd->bij', q, k,
                       preferred_element_type=jnp.float32)            # [tb, F, F]
    score = score - jnp.max(score, axis=-1, keepdims=True)
    e = jnp.exp(score)
    probs = e / jnp.sum(e, axis=-1, keepdims=True)   # exact softmax normalization

    # tanh(x) > 0  <=>  x > 0 ; binary gate applied as a select.
    score_hat = jnp.where(gate_raw > 0.0, probs, 0.0)

    out = jnp.einsum('bij,bjd->bid', score_hat, v,
                     preferred_element_type=jnp.float32)              # [tb, F, D]
    out_ref[...] = out.astype(out_ref.dtype)


def _choose_batch_tile(batch, feature_numb, m_target=256, m_cap=1024):
    """Pick the batch tile TB.

    Priority 1: make the fused MXU M dimension TB*F reach `m_target` rows
    (256 = full v6e/v7x MXU height, 2x the 128-row v5e MXU).
    Priority 2: once that is met and B can afford it, keep >= 2 grid steps so
    both v7x TensorCores get work, growing toward `m_cap` rows to amortize the
    ~0.35 us per-step overhead.  A starved MXU is never traded for an extra step.
    """
    if batch <= 0:
        return 1
    tb_target = max(1, pl.cdiv(m_target, feature_numb))
    if batch <= tb_target:
        return batch                      # small batch: one full-batch step
    tb_cap = max(tb_target, m_cap // feature_numb)
    tb = min(tb_cap, pl.cdiv(batch, 2))   # >= 2 steps when affordable
    return max(tb_target, tb)


def interaction_pruning_elu(feature, indicator, params, tb=None):
    """feature, indicator: [B, F, D] float32.
    params: 5 x [D, D] weights (Wq_ind, Wk_ind, Wq, Wk, Wv)."""
    B, F, D = feature.shape
    wqi, wki, wq, wk, wv = params

    # Wrapper-side exact parameter fusion.
    w_qkv = jnp.concatenate([wq, wk, wv], axis=1)            # [D, 3D]
    m_gate = jnp.dot(wqi, wki.T)                             # [D, D]

    if tb is None:
        tb = _choose_batch_tile(B, F)

    grid_b = pl.cdiv(B, tb)
    Bp = grid_b * tb
    if Bp != B:
        pad = Bp - B
        # Zero padding is harmless: padded rows get gate == 0 -> zero outputs,
        # and they are sliced off below (no NaNs: softmax of equal scores is finite).
        feature = jnp.pad(feature, ((0, pad), (0, 0), (0, 0)))
        indicator = jnp.pad(indicator, ((0, pad), (0, 0), (0, 0)))

    batch_spec = pl.BlockSpec((tb, F, D), lambda b: (b, 0, 0))
    # Weights use a constant index_map; tiny, so default double buffering is fine.
    w_qkv_spec = pl.BlockSpec((D, 3 * D), lambda b: (0, 0))
    m_gate_spec = pl.BlockSpec((D, D), lambda b: (0, 0))

    out = pl.pallas_call(
        interaction_pruning_kernel,
        out_shape=jax.ShapeDtypeStruct((Bp, F, D), feature.dtype),
        grid=(grid_b,),
        in_specs=[batch_spec, batch_spec, w_qkv_spec, m_gate_spec],
        out_specs=batch_spec,
        compiler_params=pltpu.CompilerParams(dimension_semantics=("parallel",)),
    )(indicator, feature, w_qkv, m_gate)

    return out[:B] if Bp != B else out


def reference(feature, indicator, params):
    """Pure-JAX reference matching the PyTorch module's forward."""
    wqi, wki, wq, wk, wv = params
    qi = indicator @ wqi
    ki = indicator @ wki
    gate = (jnp.tanh(jnp.einsum('bid,bjd->bij', qi, ki)) > 0.0).astype(jnp.float32)
    q = _elu1(feature @ wq)
    k = _elu1(feature @ wk)
    v = feature @ wv
    score = jnp.einsum('bid,bjd->bij', q, k)
    softmax = jax.nn.softmax(score, axis=-1)
    return jnp.einsum('bij,bjd->bid', softmax * gate, v)


if __name__ == "__main__":
    B = 64    # batch       -> tb = 32 (M = TB*F = 256 rows), 2 grid steps (dual TC)
    F = 8     # featureNumb -> sublane-aligned
    D = 128   # featureDim  -> lane-dense loads/stores (last dim multiple of 128)

    key = jax.random.PRNGKey(0)
    kf, ki, k1, k2, k3, k4, k5 = jax.random.split(key, 7)

    feature = jax.random.normal(kf, (B, F, D), dtype=jnp.float32)
    indicator = jax.random.normal(ki, (B, F, D), dtype=jnp.float32)

    # Deterministic synthetic parameters (module __init__ implies [D, D] projections:
    # QKVTransformV2(2, D, D) -> 2 weights; QKVTransform(1, D, D) -> 3 weights).
    params = tuple(0.1 * jax.random.normal(k, (D, D), dtype=jnp.float32)
                   for k in (k1, k2, k3, k4, k5))

    out = jax.block_until_ready(interaction_pruning_elu(feature, indicator, params))

    ref = reference(feature, indicator, params)
    assert out.shape == (B, F, D)
    # Tolerance covers f32 re-association only (wrapper-side weight fusion and
    # MXU vs XLA dot ordering); the softmax normalization is now exact.
    max_err = float(jnp.max(jnp.abs(out - ref)))
    assert jnp.allclose(out, ref, atol=5e-3, rtol=5e-3), (
        f"mismatch vs reference (max abs err = {max_err:.3e})")

    print("KERNEL_OK")
</pallas_src>

<mosaic_0001>
module attributes {stable_mosaic.version = 11 : i64} {
  func.func @interaction_pruning_kernel(%arg0: i32, %arg1: memref<32x8x128xf32, #tpu.memory_space<vmem>>, %arg2: memref<32x8x128xf32, #tpu.memory_space<vmem>>, %arg3: memref<128x384xf32, #tpu.memory_space<vmem>>, %arg4: memref<128x128xf32, #tpu.memory_space<vmem>>, %arg5: memref<32x8x128xf32, #tpu.memory_space<vmem>>) attributes {dimension_semantics = [#tpu.dimension_semantics<parallel>], iteration_bounds = array<i64: 2>, scalar_prefetch = 0 : i64, scratch_operands = 0 : i64, tpu.core_type = #tpu.core_type<tc>, window_params = [{transform_indices = @transform_0, window_bounds = array<i64: 32, 8, 128>}, {transform_indices = @transform_1, window_bounds = array<i64: 32, 8, 128>}, {pipeline_mode = #tpu.pipeline_mode<synchronous>, transform_indices = @transform_2, window_bounds = array<i64: 128, 384>}, {pipeline_mode = #tpu.pipeline_mode<synchronous>, transform_indices = @transform_3, window_bounds = array<i64: 128, 128>}, {transform_indices = @transform_4, window_bounds = array<i64: 32, 8, 128>}]} {
    %c0 = arith.constant 0 : index
    %c0_0 = arith.constant 0 : index
    %c0_1 = arith.constant 0 : index
    %0 = vector.load %arg2[%c0, %c0_0, %c0_1] : memref<32x8x128xf32, #tpu.memory_space<vmem>>, vector<32x8x128xf32>
    %1 = vector.shape_cast %0 : vector<32x8x128xf32> to vector<256x128xf32>
    %c0_2 = arith.constant 0 : index
    %c0_3 = arith.constant 0 : index
    %c0_4 = arith.constant 0 : index
    %2 = vector.load %arg1[%c0_2, %c0_3, %c0_4] : memref<32x8x128xf32, #tpu.memory_space<vmem>>, vector<32x8x128xf32>
    %3 = vector.shape_cast %2 : vector<32x8x128xf32> to vector<256x128xf32>
    %c0_5 = arith.constant 0 : index
    %c0_6 = arith.constant 0 : index
    %4 = vector.load %arg3[%c0_5, %c0_6] : memref<128x384xf32, #tpu.memory_space<vmem>>, vector<128x384xf32>
    %cst = arith.constant dense<0.000000e+00> : vector<256x384xf32>
    %5 = tpu.matmul %1, %4, %cst {dimension_numbers = #tpu.dot_dimension_numbers<[1], [0], [0], [1], [0, 0, 1, 1], [], []>} : vector<256x128xf32>, vector<128x384xf32>, vector<256x384xf32> -> vector<256x384xf32>
    %6 = vector.extract_strided_slice %5 {offsets = [0, 0], sizes = [256, 128], strides = [1, 1]} : vector<256x384xf32> to vector<256x128xf32>
    %cst_7 = arith.constant 0.000000e+00 : f32
    %7 = vector.broadcast %cst_7 : f32 to vector<256x128xf32>
    %8 = arith.cmpf ogt, %6, %7 : vector<256x128xf32>
    %cst_8 = arith.constant 1.000000e+00 : f32
    %9 = vector.broadcast %cst_8 : f32 to vector<256x128xf32>
    %10 = arith.addf %6, %9 : vector<256x128xf32>
    %11 = math.exp %6 : vector<256x128xf32>
    %12 = arith.select %8, %10, %11 : vector<256x128xi1>, vector<256x128xf32>
    %13 = vector.shape_cast %12 : vector<256x128xf32> to vector<32x8x128xf32>
    %14 = vector.extract_strided_slice %5 {offsets = [0, 128], sizes = [256, 128], strides = [1, 1]} : vector<256x384xf32> to vector<256x128xf32>
    %cst_9 = arith.constant 0.000000e+00 : f32
    %15 = vector.broadcast %cst_9 : f32 to vector<256x128xf32>
    %16 = arith.cmpf ogt, %14, %15 : vector<256x128xf32>
    %cst_10 = arith.constant 1.000000e+00 : f32
    %17 = vector.broadcast %cst_10 : f32 to vector<256x128xf32>
    %18 = arith.addf %14, %17 : vector<256x128xf32>
    %19 = math.exp %14 : vector<256x128xf32>
    %20 = arith.select %16, %18, %19 : vector<256x128xi1>, vector<256x128xf32>
    %21 = vector.shape_cast %20 : vector<256x128xf32> to vector<32x8x128xf32>
    %22 = vector.extract_strided_slice %5 {offsets = [0, 256], sizes = [256, 128], strides = [1, 1]} : vector<256x384xf32> to vector<256x128xf32>
    %23 = vector.shape_cast %22 : vector<256x128xf32> to vector<32x8x128xf32>
    %c0_11 = arith.constant 0 : index
    %c0_12 = arith.constant 0 : index
    %24 = vector.load %arg4[%c0_11, %c0_12] : memref<128x128xf32, #tpu.memory_space<vmem>>, vector<128x128xf32>
    %cst_13 = arith.constant dense<0.000000e+00> : vector<256x128xf32>
    %25 = tpu.matmul %3, %24, %cst_13 {dimension_numbers = #tpu.dot_dimension_numbers<[1], [0], [0], [1], [0, 0, 1, 1], [], []>} : vector<256x128xf32>, vector<128x128xf32>, vector<256x128xf32> -> vector<256x128xf32>
    %26 = vector.shape_cast %25 : vector<256x128xf32> to vector<32x8x128xf32>
    %c0_14 = arith.constant 0 : index
    %c0_15 = arith.constant 0 : index
    %c0_16 = arith.constant 0 : index
    %27 = vector.load %arg1[%c0_14, %c0_15, %c0_16] : memref<32x8x128xf32, #tpu.memory_space<vmem>>, vector<32x8x128xf32>
    "tpu.trace_start"() <{level = 10 : i32, message = "bid,bjd->bij"}> : () -> ()
    %cst_17 = arith.constant dense<0.000000e+00> : vector<32x8x8xf32>
    %28 = tpu.matmul %26, %27, %cst_17 {dimension_numbers = #tpu.dot_dimension_numbers<[2], [2], [1], [1], [0, 0, 0, 1, 1, 1], [0], [0]>} : vector<32x8x128xf32>, vector<32x8x128xf32>, vector<32x8x8xf32> -> vector<32x8x8xf32>
    %cst_18 = arith.constant dense<0.000000e+00> : vector<32x8x8xf32>
    %29 = tpu.matmul %13, %21, %cst_18 {dimension_numbers = #tpu.dot_dimension_numbers<[2], [2], [1], [1], [0, 0, 0, 1, 1, 1], [0], [0]>} : vector<32x8x128xf32>, vector<32x8x128xf32>, vector<32x8x8xf32> -> vector<32x8x8xf32>
    "tpu.trace_stop"() : () -> ()
    %cst_19 = arith.constant dense<0xFF800000> : vector<32x8xf32>
    %30 = vector.multi_reduction <maximumf>, %29, %cst_19 [2] : vector<32x8x8xf32> to vector<32x8xf32>
    %31 = vector.shape_cast %30 : vector<32x8xf32> to vector<32x8x1xf32>
    %32 = vector.broadcast %31 : vector<32x8x1xf32> to vector<32x8x8xf32>
    %33 = arith.subf %29, %32 : vector<32x8x8xf32>
    %34 = math.exp %33 : vector<32x8x8xf32>
    %cst_20 = arith.constant dense<0.000000e+00> : vector<32x8xf32>
    %35 = vector.multi_reduction <add>, %34, %cst_20 [2] : vector<32x8x8xf32> to vector<32x8xf32>
    %36 = vector.shape_cast %35 : vector<32x8xf32> to vector<32x8x1xf32>
    %37 = vector.broadcast %36 : vector<32x8x1xf32> to vector<32x8x8xf32>
    %38 = arith.divf %34, %37 : vector<32x8x8xf32>
    %cst_21 = arith.constant 0.000000e+00 : f32
    %39 = vector.broadcast %cst_21 : f32 to vector<32x8x8xf32>
    %40 = arith.cmpf ogt, %28, %39 : vector<32x8x8xf32>
    %cst_22 = arith.constant 0.000000e+00 : f32
    %41 = vector.broadcast %cst_22 : f32 to vector<32x8x8xf32>
    %42 = arith.select %40, %38, %41 : vector<32x8x8xi1>, vector<32x8x8xf32>
    "tpu.trace_start"() <{level = 10 : i32, message = "bij,bjd->bid"}> : () -> ()
    %cst_23 = arith.constant dense<0.000000e+00> : vector<32x8x128xf32>
    %43 = tpu.matmul %42, %23, %cst_23 {dimension_numbers = #tpu.dot_dimension_numbers<[2], [1], [1], [2], [0, 0, 0, 1, 1, 2], [0], [0]>} : vector<32x8x8xf32>, vector<32x8x128xf32>, vector<32x8x128xf32> -> vector<32x8x128xf32>
    "tpu.trace_stop"() : () -> ()
    %c0_24 = arith.constant 0 : index
    %c0_25 = arith.constant 0 : index
    %c0_26 = arith.constant 0 : index
    %44 = vector.load %arg5[%c0_24, %c0_25, %c0_26] : memref<32x8x128xf32, #tpu.memory_space<vmem>>, vector<32x8x128xf32>
    tpu.vector_store %arg5[%c0_24, %c0_25, %c0_26], %43 {strides = array<i32>} : memref<32x8x128xf32, #tpu.memory_space<vmem>>, vector<32x8x128xf32>,
    return
  }
  func.func @transform_0(%arg0: i32) -> (i32, i32, i32) {
    %c0_i32 = arith.constant 0 : i32
    %c0_i32_0 = arith.constant 0 : i32
    %c0_i32_1 = arith.constant 0 : i32
    return %arg0, %c0_i32, %c0_i32_0 : i32, i32, i32
  }
  func.func @transform_1(%arg0: i32) -> (i32, i32, i32) {
    %c0_i32 = arith.constant 0 : i32
    %c0_i32_0 = arith.constant 0 : i32
    %c0_i32_1 = arith.constant 0 : i32
    return %arg0, %c0_i32, %c0_i32_0 : i32, i32, i32
  }
  func.func @transform_2(%arg0: i32) -> (i32, i32) {
    %c0_i32 = arith.constant 0 : i32
    %c0_i32_0 = arith.constant 0 : i32
    %c0_i32_1 = arith.constant 0 : i32
    return %c0_i32, %c0_i32_0 : i32, i32
  }
  func.func @transform_3(%arg0: i32) -> (i32, i32) {
    %c0_i32 = arith.constant 0 : i32
    %c0_i32_0 = arith.constant 0 : i32
    %c0_i32_1 = arith.constant 0 : i32
    return %c0_i32, %c0_i32_0 : i32, i32
  }
  func.func @transform_4(%arg0: i32) -> (i32, i32, i32) {
    %c0_i32 = arith.constant 0 : i32
    %c0_i32_0 = arith.constant 0 : i32
    %c0_i32_1 = arith.constant 0 : i32
    return %arg0, %c0_i32, %c0_i32_0 : i32, i32, i32
  }
}

</mosaic_0001>

<bundles_post_ra>
// kernel: tpu_custom_call.1
= control target key start
LH: loop header
LB: loop body
LE: loop exit
PB: predicated region body
PF: predicated region fallthrough
CT: control target
= control target key end

     0   :  { %s12533_s0 = inlined_call_operand.hbm [shape: f32[64,8,128], index: 0, kind: input, shape index: {}]   ;;  %s12534_s1 = inlined_call_operand.hbm [shape: f32[64,8,128], index: 1, kind: input, shape index: {}]   ;;  %s12535_s2 = inlined_call_operand.hbm [shape: f32[128,384], index: 2, kind: input, shape index: {}]   ;;  %s12536_s3 = inlined_call_operand.hbm [shape: f32[128,128], index: 3, kind: input, shape index: {}]   ;;  %s12537_s4 = inlined_call_operand.hbm [shape: f32[64,8,128], index: 4, kind: output, shape index: {}]  }
   0x1   :  { %12566 = sst [smem:[#allocation67_spill]] %s12533_s0 }
   0x2   :  { %9 = vsyncpa [#allocation3], 0 }
   0x3   :  { %11 = vsyncpa [#allocation3 + $0x1], 0 }
   0x4   :  { %12 = vsyncpa [#allocation6], 0 }
   0x5   :  { %14 = vsyncpa [#allocation6 + $0x1], 0 }
   0x6   :  { %15 = vsyncpa [#allocation9], 0 }
   0x7   :  { %16 = vsyncpa [#allocation4], 0 }
   0x8   :  { %18 = vsyncpa [#allocation4 + $0x1], 0  ;;  %s10488_s15 = smov 0   ;;  %s10490_s16 = smov 0  }
   0x9   :  { %s10492_s17 = smov 0   ;;  %s10494_s18 = smov 0  }
   0xa LB: > { %s10509_s19 = sadd.s32 4294967295, %s10448_s18   ;;  %s8837_s20 = sadd.s32 4294967294, %s10448_s18   ;;  %s10448_s18 = sphi %s10494_s18, %s12721_s18   ;;  %s10444_s17 = sphi %s10492_s17, %s12720_s17   ;;  %s10440_s16 = sphi %s10490_s16, %s12719_s16   ;;  %s10436_s15 = sphi %s10488_s15, %s12718_s15  }
   0xb   : > { %p44_p0 = scmp.ne.s32.totalorder %s10440_s16, %s10436_s15  ;;  %p12538_p1 = scmp.eq.s32.totalorder %s10509_s19, 0 }
   0xc   : > { %p142_p3 = scmp.eq.s32.totalorder %s8837_s20, 1  ;;  %p8838_p5 = scmp.ge.s32.totalorder %s10448_s18, 1 }
   0xd   : > { %p10518_p4 = por %p12538_p1, %p44_p0  ;;  %p149_p7 = scmp.lt.s32.totalorder %s10448_s18, 3 }
   0xe   : > { %p10523_p6 = por %p142_p3, %p44_p0  ;;  %s10450_s24 = smov [#allocation7]  }
   0xf   : > { %s12567_s21 = scalar_select %p10518_p4, 1, 0 }
  0x10   : > { %s12568_s22 = scalar_select %p10523_p6, 1, 0 }
  0x11   : > { %p10528_p8 = pnand %p8838_p5, %p149_p7  ;;  %s161_s25 = sshll.u32 %s10450_s24, 4  ;;  %s10532_s25 = int_to_ptr.vmem [resolvable:$true] %s161_s25 }
  0x12   : > { %s10451_s27 = smov [#allocation8]   ;;  %s10254_s5 = scalar_lea.hbm %s12535_s2, 6144 }
  0x13   : > { %p9932_p9 = pneg %p10528_p8  ;;  %s174_s28 = sshll.u32 %s10451_s27, 4  ;;  %s10543_s28 = int_to_ptr.vmem [resolvable:$true] %s174_s28 }
  0x14   : > { %p10255_p12 = scmp.ne.s32.totalorder %s12535_s2, %s10254_s5  ;;  %p10261_p5 = scmp.lt.u32.totalorder %s10254_s5, %s12535_s2 }
  0x15   : > { %p10539_p11 = pnand %p9932_p9, %p12538_p1 }
  0x17   : > { %p10256_p13 = pneg %p10539_p11 }
  0x19   : > { %p10257_p0 = pnand %p10256_p13, %p10255_p12 }
  0x1b   : > { %p10258_p3 = pneg %p10257_p0 }
  0x1d   : > { %p10263_p7 = pnand %p10261_p5, %p10258_p3 }
  0x1f   : > { %10266 = shalt.err (!%p10263_p7)
}
  0x20   : > { %s10267_s10 = scalar_lea.vmem %s10532_s25, 6144  ;;  %p10275_p2 = scmp.lt.s32.totalorder %s10532_s25, %s10532_s25 }
  0x21   : > { %p10268_p9 = scmp.ne.s32.totalorder %s10532_s25, %s10267_s10  ;;  %p10276_p12 = scmp.lt.s32.totalorder %s10267_s10, %s10267_s10 }
  0x23   : > { %p10270_p10 = pnand %p10268_p9, %p10256_p13  ;;  %p10277_p0 = por %p10276_p12, %p10275_p2 }
  0x25   : > { %p10271_p1 = pneg %p10270_p10 }
  0x27   : > { %p10278_p6 = pnand %p10277_p0, %p10271_p1 }
  0x29   : > { %10281 = shalt.err (!%p10278_p6)
}
  0x2a   : > { %s10452_s11 = smov 384   ;;  %s10453_s12 = smov 24  }
  0x2b   : > { %9935 = dma.hbm_to_vmem [thread:$0]  (!%p10539_p11), %s12535_s2, 6144, %s10532_s25, [#allocation6], %s10452_s11, %s10452_s11, %s10453_s12  }
  0x2c   : > { %s10282_s27 = scalar_lea.hbm %s12536_s3, 2048 }
  0x2d   : > { %p10283_p2 = scmp.ne.s32.totalorder %s12536_s3, %s10282_s27  ;;  %p10289_p10 = scmp.lt.u32.totalorder %s10282_s27, %s12536_s3 }
  0x2f   : > { %p10285_p1 = pnand %p10283_p2, %p10256_p13 }
  0x31   : > { %p10286_p6 = pneg %p10285_p1 }
  0x33   : > { %p10291_p3 = pnand %p10289_p10, %p10286_p6 }
  0x35   : > { %10294 = shalt.err (!%p10291_p3)
}
  0x36   : > { %s10295_s25 = scalar_lea.vmem %s10543_s28, 2048  ;;  %p10303_p12 = scmp.lt.s32.totalorder %s10543_s28, %s10543_s28 }
  0x37   : > { %p10296_p5 = scmp.ne.s32.totalorder %s10543_s28, %s10295_s25  ;;  %p10304_p0 = scmp.lt.s32.totalorder %s10295_s25, %s10295_s25 }
  0x39   : > { %p10298_p7 = pnand %p10296_p5, %p10256_p13  ;;  %p10305_p2 = por %p10304_p0, %p10303_p12 }
  0x3b   : > { %p10299_p9 = pneg %p10298_p7 }
  0x3d   : > { %p10306_p1 = pnand %p10305_p2, %p10299_p9 }
  0x3f   : > { %10309 = shalt.err (!%p10306_p1)
}
  0x40   : > { %s12539_s7 = smov 128   ;;  %s12541_s8 = smov 8  }
  0x41   : > { %9938 = dma.hbm_to_vmem [thread:$0]  (!%p10539_p11), %s12536_s3, 2048, %s10543_s28, [#allocation9], %s12539_s7, %s12539_s7, %s12541_s8  }
  0x42   : > { %s10601_s11 = sadd.s32 1, %s10448_s18   ;;  %s31_s13 = sadd.s32 1, %s10444_s17 }
  0x43   : > { %s28_s12 = ssub.s32 %s10448_s18, %s10601_s11  ;;  %p38_p6 = scmp.ne.s32.totalorder %s10444_s17, %s10440_s16 }
  0x44   : > { %p29_p13 = scmp.eq.s32.totalorder %s28_s12, 0  ;;  %p39_p10 = scmp.eq.s32.totalorder %s10448_s18, 0 }
  0x45   : > { %p12571_p5 = scmp.eq.s32.totalorder %s10509_s19, 1  ;;  %p9952_p9 = scmp.lt.s32.totalorder %s10448_s18, 2 }
  0x46   : > { %s10610_s14 = scalar_select %p29_p13, %s10444_s17, %s31_s13  }
  0x47   : > { %p40_p3 = por %p39_p10, %p38_p6  ;;  %p10614_p7 = por %p12571_p5, %p38_p6 }
  0x48   : > { %s188_s20 = sand.u32 1, %s10444_s17   ;;  %s8891_s28 = sshll.u32 %s10448_s18, 12 }
  0x49   : > { %s12572_s26 = scalar_select %p10614_p7, 1, 0 }
  0x4a   : > { %s8842_s24 = sshll.u32 %s188_s20, 8  ;;  %s12573_s0 = sld [smem:[#allocation67_spill]] }
  0x4b   : > { %s192_s5 = scalar_lea.vmem [#allocation2], %s8842_s24  ;;  %p10628_p11 = pnand %p9952_p9, %p40_p3 }
  0x4c   : > { %s199_s6 = sshll.u32 %s192_s5, 4  ;;  %s10635_s12 = scalar_lea.hbm %s12534_s1, %s8891_s28  ;;  %s10626_s6 = int_to_ptr.vmem [resolvable:$true] %s199_s6 }
  0x4d   : > { %s213_s13 = scalar_lea.vmem [#allocation5], %s8842_s24  ;;  %s10639_s29 = scalar_lea.sflag [#allocation3], %s188_s20 }
  0x4e   : > { %s10637_s27 = sshll.u32 %s213_s13, 4  ;;  %p10312_p0 = pneg %p10628_p11  ;;  %s10671_s27 = int_to_ptr.vmem [resolvable:$true] %s10637_s27 }
  0x50   : > { %s10624_s30 = scalar_lea.hbm %s12573_s0, %s8891_s28  ;;  %s10315_s9 = scalar_lea.hbm %s12573_s0, 8192 }
  0x51   : > { %s10310_s5 = scalar_lea.hbm %s10624_s30, 4096  ;;  %p10316_p13 = scmp.lt.u32.totalorder %s10624_s30, %s12573_s0 }
  0x52   : > { %p10311_p12 = scmp.ne.s32.totalorder %s10624_s30, %s10310_s5  ;;  %p10317_p6 = scmp.lt.u32.totalorder %s10315_s9, %s10310_s5 }
  0x53   : > { %p10319_p3 = scmp.lt.u32.totalorder %s10310_s5, %s10624_s30 }
  0x54   : > { %p10313_p2 = pnand %p10312_p0, %p10311_p12  ;;  %p10318_p10 = por %p10317_p6, %p10316_p13 }
  0x56   : > { %p10314_p1 = pneg %p10313_p2  ;;  %p10320_p5 = por %p10319_p3, %p10318_p10 }
  0x58   : > { %p10321_p9 = pnand %p10320_p5, %p10314_p1 }
  0x5a   : > { %10324 = shalt.err (!%p10321_p9)
}
  0x5b   : > { %s10325_s20 = scalar_lea.vmem %s10626_s6, 4096  ;;  %s10456_s7 = smov [#allocation2]  }
  0x5c   : > { %p10326_p12 = scmp.ne.s32.totalorder %s10626_s6, %s10325_s20  ;;  %s10330_s8 = sshll.u32 %s10456_s7, 4  ;;  %s10331_s8 = int_to_ptr.vmem [resolvable:$false] %s10330_s8 }
  0x5d   : > { %s10332_s24 = scalar_lea.vmem %s10331_s8, 8192  ;;  %p10333_p4 = scmp.lt.s32.totalorder %s10626_s6, %s10331_s8 }
  0x5e   : > { %p10328_p2 = pnand %p10326_p12, %p10312_p0  ;;  %p10334_p13 = scmp.lt.s32.totalorder %s10332_s24, %s10325_s20 }
  0x60   : > { %p10329_p7 = pneg %p10328_p2  ;;  %p10335_p6 = por %p10334_p13, %p10333_p4 }
  0x62   : > { %p10336_p10 = pnand %p10335_p6, %p10329_p7 }
  0x64   : > { %10339 = shalt.err (!%p10336_p10)
}
  0x65   : > { %s12575_s13 = smov 8   ;;  %s12576_s5 = smov 128  }
  0x66   : > { %9942 = dma.hbm_to_vmem [thread:$0]  (!%p10628_p11), %s10624_s30, 4096, %s10626_s6, %s10639_s29, %s12576_s5, %s12576_s5, %s12575_s13  }
  0x67   : > { %s209_s9 = sand.u32 1, %s10448_s18   ;;  %s10340_s28 = scalar_lea.hbm %s10635_s12, 4096 }
  0x68   : > { %s10674_s10 = scalar_lea.sflag [#allocation6], %s209_s9  ;;  %p10341_p4 = scmp.ne.s32.totalorder %s10635_s12, %s10340_s28 }
  0x69   : > { %s10345_s8 = scalar_lea.hbm %s12534_s1, 8192  ;;  %p10346_p3 = scmp.lt.u32.totalorder %s10635_s12, %s12534_s1 }
  0x6a   : > { %p10343_p7 = pnand %p10341_p4, %p10312_p0  ;;  %p10347_p5 = scmp.lt.u32.totalorder %s10345_s8, %s10340_s28 }
  0x6b   : > { %p10349_p12 = scmp.lt.u32.totalorder %s10340_s28, %s10635_s12 }
  0x6c   : > { %p10344_p1 = pneg %p10343_p7  ;;  %p10348_p9 = por %p10347_p5, %p10346_p3 }
  0x6e   : > { %p10350_p2 = por %p10349_p12, %p10348_p9 }
  0x70   : > { %p10351_p13 = pnand %p10350_p2, %p10344_p1 }
  0x72   : > { %10354 = shalt.err (!%p10351_p13)
}
  0x73   : > { %s10355_s30 = scalar_lea.vmem %s10671_s27, 4096  ;;  %s10457_s6 = smov [#allocation5]  }
  0x74   : > { %p10356_p6 = scmp.ne.s32.totalorder %s10671_s27, %s10355_s30  ;;  %s10360_s29 = sshll.u32 %s10457_s6, 4  ;;  %s10361_s29 = int_to_ptr.vmem [resolvable:$false] %s10360_s29 }
  0x75   : > { %s10362_s0 = scalar_lea.vmem %s10361_s29, 8192  ;;  %p10363_p7 = scmp.lt.s32.totalorder %s10671_s27, %s10361_s29 }
  0x76   : > { %p10358_p10 = pnand %p10356_p6, %p10312_p0  ;;  %p10364_p3 = scmp.lt.s32.totalorder %s10362_s0, %s10355_s30 }
  0x78   : > { %p10359_p4 = pneg %p10358_p10  ;;  %p10365_p5 = por %p10364_p3, %p10363_p7 }
  0x7a   : > { %p10366_p9 = pnand %p10365_p5, %p10359_p4 }
  0x7c   : > { %10369 = shalt.err (!%p10366_p9)
}
  0x7d   : > { %9945 = dma.hbm_to_vmem [thread:$0]  (!%p10628_p11), %s10635_s12, 4096, %s10671_s27, %s10674_s10, %s12576_s5, %s12576_s5, %s12575_s13  }
  0x7e   : > { %232 = sbr.rel (%p10528_p8) target bundleno = 1340 (0x53c), region = 36 }
  0x85   : > { %s10706_s9 = sand.u32 1, %s10440_s16   ;;  %p12577_p0 = scmp.ne.s32.totalorder %s12567_s21, 0 }
  0x86   : > { %s10709_s28 = sshll.u32 %s10706_s9, 8  ;;  %s235_s25 = scalar_lea.sflag [#allocation3], %s10706_s9 }
  0x87   : > { %s10713_s20 = scalar_lea.vmem [#allocation2], %s10709_s28 }
  0x88   : > { %10415 = dma.done.wait (%p12577_p0), %s235_s25, 4096  }
  0x89   : > { %10417 = vsyncadd (%p12577_p0), %s235_s25, 4294963200  ;;  %s243_s23 = sand.u32 1, %s10509_s19   ;;  %s10721_s27 = scalar_lea.vmem [#allocation5], %s10709_s28 }
  0x8a   : > { %s244_s12 = scalar_lea.sflag [#allocation6], %s243_s23 }
  0x8b   : > { %10419 = dma.done.wait (%p12577_p0), %s244_s12, 4096  }
  0x8c   : > { %10421 = vsyncadd (%p12577_p0), %s244_s12, 4294963200  ;;  %p12578_p8 = scmp.eq.s32.totalorder %s10509_s19, 0 }
  0x8e   : > { %10423 = dma.done.wait (%p12578_p8), [#allocation6], 6144   ;;  %p12579_p11 = pmov %p12578_p8 }
  0x8f   : > { %p12580_p1 = pmov %p12578_p8 }
  0x90   : > { %10425 = vsyncadd (%p12579_p11), [#allocation6], 4294961152 }
  0x91   : > { %10427 = dma.done.wait (%p12580_p1), [#allocation9], 2048   ;;  %p12581_p12 = pmov %p12580_p1 }
  0x92   : > { %v12545_v0 = vmov 0.0   ;;  %v354_v1 = vld [vmem:[#allocation7 + $0x10] sm:$0xff]  ;;  %v357_v2 = vld [vmem:[#allocation7 + $0x28] sm:$0xff]  ;;  %v360_v3 = vld [vmem:[#allocation7 + $0x40] sm:$0xff]  ;;  %vm10459_vm0 = vmmov 0   ;;  %s12448_s21 = scalar_lea.vmem [#allocation10], %s10709_s28 }
  0x93   : > { %10429 = vsyncadd (%p12581_p12), [#allocation9], 4294965248  ;;  %464 = vmatprep.mubr.f32.mxu0 %v12545_v0  ;;  %v9854_v4 = vpack.c.bf16 %v357_v2, %v354_v1  ;;  %v363_v5 = vld [vmem:[#allocation7 + $0x58] sm:$0xff]  ;;  %v366_v7 = vld [vmem:[#allocation7 + $0x70] sm:$0xff]  ;;  %s8893_s13 = sshll.u32 %s10509_s19, 12  ;;  %s8722_s5 = sshll.u32 %s12448_s21, 4  ;;  %s12487_s5 = int_to_ptr.vmem [resolvable:$true] %s8722_s5 }
  0x94   : > { %v9858_v6 = vpack.c.bf16 %v363_v5, %v360_v3  ;;  %v369_v8 = vld [vmem:[#allocation7 + $0x88] sm:$0xff]  ;;  %v10737_v10 = vld [vmem:[%s10721_s27] sm:$0xff]  ;;  %v375_v12 = vld [vmem:[#allocation7 + $0xb8] sm:$0xff]  ;;  %s12485_s8 = scalar_lea.hbm %s12537_s4, %s8893_s13  ;;  %s8709_s19 = scalar_lea.sflag [#allocation4], %s10706_s9 }
  0x95   : > { %9855 = vmatprep.subr.bf16.mxu1 %v9854_v4  ;;  %v9862_v9 = vpack.c.bf16 %v369_v8, %v366_v7  ;;  %v372_v11 = vld [vmem:[#allocation7 + $0xa0] sm:$0xff]  ;;  %9214 = vmatprep.mubr.f32.mxu1 %v10737_v10  ;;  %v353_v13 = vld [vmem:[#allocation7 + $0x8] sm:$0xff]  ;;  %v355_v17 = vld [vmem:[#allocation7 + $0x18] sm:$0xff]  ;;  %s10370_s24 = scalar_lea.vmem %s12487_s5, 4096  ;;  %p12715_p13 = scmp.ne.s32.totalorder %s12572_s26, 0 }
  0x96   : > { %9857 = vmatpush3.bf16.msra.mxu1 %v9854_v4  ;;  %v356_v14 = vld [vmem:[#allocation7 + $0x20] sm:$0xff]  ;;  %v9866_v18 = vpack.c.bf16 %v375_v12, %v372_v11  ;;  %v378_v19 = vld [vmem:[#allocation7 + $0xd0] sm:$0xff]  ;;  %v381_v20 = vld [vmem:[#allocation7 + $0xe8] sm:$0xff]  ;;  %p10371_p2 = scmp.ne.s32.totalorder %s12487_s5, %s10370_s24  ;;  %s10460_s30 = smov [#allocation10]  }
  0x97   : > { %9859 = vmatprep.subr.bf16.mxu1 %v9858_v6  ;;  %v9822_v15 = vpack.c.bf16 %v356_v14, %v353_v13  ;;  %v352_v16 = vld [vmem:[#allocation7] sm:$0xff]  ;;  %v359_v22 = vld [vmem:[#allocation7 + $0x38] sm:$0xff]  ;;  %v362_v23 = vld [vmem:[#allocation7 + $0x50] sm:$0xff]  ;;  %v9870_v31 = vpack.c.bf16 %v381_v20, %v378_v19  ;;  %s10374_s6 = sshll.u32 %s10460_s30, 4  ;;  %s10375_s6 = int_to_ptr.vmem [resolvable:$false] %s10374_s6 }
  0x98   : > { %v9824_v21 = vpack.c.bf16 %v355_v17, %v352_v16  ;;  %v358_v24 = vld [vmem:[#allocation7 + $0x30] sm:$0xff]  ;;  %v9826_v25 = vpack.c.bf16 %v362_v23, %v359_v22  ;;  %v361_v26 = vld [vmem:[#allocation7 + $0x48] sm:$0xff]  ;;  %v368_v29 = vld [vmem:[#allocation7 + $0x80] sm:$0xff]  ;;  %p10372_p6 = pnand %p10371_p2, %p12715_p13  ;;  %s10376_s29 = scalar_lea.vmem %s10375_s6, 8192 }
  0x99   : > { %9823 = vmatprep.subr.bf16.mxu0 %v9822_v15  ;;  %v9828_v27 = vpack.c.bf16 %v361_v26, %v358_v24  ;;  %v365_v28 = vld [vmem:[#allocation7 + $0x68] sm:$0xff]  ;;  %v364_v30 = vld [vmem:[#allocation7 + $0x60] sm:$0xff]  ;;  %v367_v33 = vld [vmem:[#allocation7 + $0x78] sm:$0xff]  ;;  %p10377_p4 = scmp.lt.s32.totalorder %s12487_s5, %s10375_s6  ;;  %p10378_p7 = scmp.lt.s32.totalorder %s10376_s29, %s10370_s24 }
  0x9a   : > { %9861 = vmatpush3.bf16.msra.mxu1 %v9858_v6  ;;  %9825 = vmatpush1.bf16.msra.mxu0 %v9824_v21  ;;  %v9830_v32 = vpack.c.bf16 %v368_v29, %v365_v28  ;;  %v384_v34 = vld [vmem:[#allocation7 + $0x100] sm:$0xff]  ;;  %v387_v35 = vld [vmem:[#allocation7 + $0x118] sm:$0xff]  ;;  %v9832_v37 = vpack.c.bf16 %v367_v33, %v364_v30  ;;  %v374_v38 = vld [vmem:[#allocation7 + $0xb0] sm:$0xff]  ;;  %p10373_p10 = pneg %p10372_p6 }
  0x9b   : > { %9863 = vmatprep.subr.bf16.mxu1 %v9862_v9  ;;  %9827 = vmatprep.subr.bf16.mxu0 %v9826_v25  ;;  %v371_v36 = vld [vmem:[#allocation7 + $0x98] sm:$0xff]  ;;  %v370_v40 = vld [vmem:[#allocation7 + $0x90] sm:$0xff]  ;;  %v373_v41 = vld [vmem:[#allocation7 + $0xa8] sm:$0xff]  ;;  %v9874_v42 = vpack.c.bf16 %v387_v35, %v384_v34  ;;  %p10379_p3 = por %p10378_p7, %p10377_p4 }
  0x9c   : > { %v9834_v39 = vpack.c.bf16 %v374_v38, %v371_v36  ;;  %v377_v43 = vld [vmem:[#allocation7 + $0xc8] sm:$0xff]  ;;  %v380_v44 = vld [vmem:[#allocation7 + $0xe0] sm:$0xff]  ;;  %v390_v45 = vld [vmem:[#allocation7 + $0x130] sm:$0xff]  ;;  %v9836_v47 = vpack.c.bf16 %v373_v41, %v370_v40 }
  0x9d   : > { %v393_v46 = vld [vmem:[#allocation7 + $0x148] sm:$0xff]  ;;  %v9838_v48 = vpack.c.bf16 %v380_v44, %v377_v43  ;;  %v376_v49 = vld [vmem:[#allocation7 + $0xc0] sm:$0xff]  ;;  %v379_v50 = vld [vmem:[#allocation7 + $0xd8] sm:$0xff]  ;;  %p10380_p5 = pnand %p10379_p3, %p10373_p10 }
  0x9e   : > { %9865 = vmatpush3.bf16.msra.mxu1 %v9862_v9  ;;  %9829 = vmatpush1.bf16.msra.mxu0 %v9828_v27  ;;  %v9878_v51 = vpack.c.bf16 %v393_v46, %v390_v45  ;;  %v383_v52 = vld [vmem:[#allocation7 + $0xf8] sm:$0xff]  ;;  %v386_v53 = vld [vmem:[#allocation7 + $0x110] sm:$0xff]  ;;  %v396_v54 = vld [vmem:[#allocation7 + $0x160] sm:$0xff]  ;;  %v9840_v56 = vpack.c.bf16 %v379_v50, %v376_v49 }
  0x9f   : > { %9867 = vmatprep.subr.bf16.mxu1 %v9866_v18  ;;  %9831 = vmatprep.subr.bf16.mxu0 %v9830_v32  ;;  %v399_v55 = vld [vmem:[#allocation7 + $0x178] sm:$0xff]  ;;  %v9842_v57 = vpack.c.bf16 %v386_v53, %v383_v52  ;;  %v382_v58 = vld [vmem:[#allocation7 + $0xf0] sm:$0xff]  ;;  %v385_v59 = vld [vmem:[#allocation7 + $0x108] sm:$0xff] }
  0xa0   : > { %v9882_v60 = vpack.c.bf16 %v399_v55, %v396_v54  ;;  %v389_v61 = vld [vmem:[#allocation7 + $0x128] sm:$0xff]  ;;  %v392_v62 = vld [vmem:[#allocation7 + $0x140] sm:$0xff]  ;;  %v9844_v2 = vpack.c.bf16 %v385_v59, %v382_v58  ;;  %v391_v5 = vld [vmem:[#allocation7 + $0x138] sm:$0xff] }
  0xa1   : > { %v1202_v63 = vld [vmem:[#allocation8] sm:$0xff]  ;;  %v1203_v1 = vld [vmem:[#allocation8 + $0x8] sm:$0xff]  ;;  %v9846_v3 = vpack.c.bf16 %v392_v62, %v389_v61  ;;  %v1204_v7 = vld [vmem:[#allocation8 + $0x10] sm:$0xff] }
  0xa2   : > { %9869 = vmatpush3.bf16.msra.mxu1 %v9866_v18  ;;  %9833 = vmatpush1.bf16.msra.mxu0 %v9832_v37  ;;  %v388_v4 = vld [vmem:[#allocation7 + $0x120] sm:$0xff]  ;;  %v9886_v6 = vpack.c.bf16 %v1203_v1, %v1202_v63  ;;  %v1205_v8 = vld [vmem:[#allocation8 + $0x18] sm:$0xff]  ;;  %v398_v11 = vld [vmem:[#allocation7 + $0x170] sm:$0xff] }
  0xa3   : > { %9871 = vmatprep.subr.bf16.mxu1 %v9870_v31  ;;  %9835 = vmatprep.subr.bf16.mxu0 %v9834_v39  ;;  %v395_v9 = vld [vmem:[#allocation7 + $0x158] sm:$0xff]  ;;  %v9848_v12 = vpack.c.bf16 %v391_v5, %v388_v4  ;;  %v289_v13 = vld [vmem:[%s10721_s27 + $0x8] sm:$0xff]  ;;  %v394_v14 = vld [vmem:[#allocation7 + $0x150] sm:$0xff]  ;;  %v9890_v17 = vpack.c.bf16 %v1205_v8, %v1204_v7 }
  0xa4   : > { %v397_v15 = vld [vmem:[#allocation7 + $0x168] sm:$0xff]  ;;  %v290_v16 = vld [vmem:[%s10721_s27 + $0x10] sm:$0xff]  ;;  %v9850_v18 = vpack.c.bf16 %v398_v11, %v395_v9  ;;  %v1206_v19 = vld [vmem:[#allocation8 + $0x20] sm:$0xff] }
  0xa5   : > { %v1207_v20 = vld [vmem:[#allocation8 + $0x28] sm:$0xff]  ;;  %v9852_v21 = vpack.c.bf16 %v397_v15, %v394_v14  ;;  %v291_v22 = vld [vmem:[%s10721_s27 + $0x18] sm:$0xff]  ;;  %v292_v23 = vld [vmem:[%s10721_s27 + $0x20] sm:$0xff] }
  0xa6   : > { %9873 = vmatpush3.bf16.msra.mxu1 %v9870_v31  ;;  %9837 = vmatpush1.bf16.msra.mxu0 %v9836_v47  ;;  %v9894_v24 = vpack.c.bf16 %v1207_v20, %v1206_v19  ;;  %v1208_v25 = vld [vmem:[#allocation8 + $0x30] sm:$0xff]  ;;  %v1209_v26 = vld [vmem:[#allocation8 + $0x38] sm:$0xff]  ;;  %v293_v27 = vld [vmem:[%s10721_s27 + $0x28] sm:$0xff] }
  0xa7   : > { %9875 = vmatprep.subr.bf16.mxu1 %v9874_v42  ;;  %9839 = vmatprep.subr.bf16.mxu0 %v9838_v48  ;;  %v10746_v28 = vld [vmem:[%s10721_s27 + $0x30] sm:$0xff]  ;;  %v9898_v29 = vpack.c.bf16 %v1209_v26, %v1208_v25  ;;  %v1210_v30 = vld [vmem:[#allocation8 + $0x40] sm:$0xff]  ;;  %v1211_v31 = vld [vmem:[#allocation8 + $0x48] sm:$0xff] }
  0xa8   : > { %v295_v32 = vld [vmem:[%s10721_s27 + $0x38] sm:$0xff]  ;;  %v10754_v33 = vld [vmem:[%s10721_s27 + $0x40] sm:$0xff]  ;;  %v9902_v34 = vpack.c.bf16 %v1211_v31, %v1210_v30  ;;  %v1212_v35 = vld [vmem:[#allocation8 + $0x50] sm:$0xff] }
  0xa9   : > { %v1213_v36 = vld [vmem:[#allocation8 + $0x58] sm:$0xff]  ;;  %v10762_v37 = vld [vmem:[%s10713_s20] sm:$0xff]  ;;  %v10765_v38 = vld [vmem:[%s10721_s27 + $0x50] sm:$0xff] }
  0xaa   : > { %9877 = vmatpush3.bf16.msra.mxu1 %v9874_v42  ;;  %9841 = vmatpush1.bf16.msra.mxu0 %v9840_v56  ;;  %v9906_v39 = vpack.c.bf16 %v1213_v36, %v1212_v35  ;;  %v1214_v40 = vld [vmem:[#allocation8 + $0x60] sm:$0xff]  ;;  %v1215_v41 = vld [vmem:[#allocation8 + $0x68] sm:$0xff]  ;;  %v299_v42 = vld [vmem:[%s10721_s27 + $0x58] sm:$0xff] }
  0xab   : > { %9879 = vmatprep.subr.bf16.mxu1 %v9878_v51  ;;  %9843 = vmatprep.subr.bf16.mxu0 %v9842_v57  ;;  %v10774_v43 = vld [vmem:[%s10721_s27 + $0x60] sm:$0xff]  ;;  %v9910_v44 = vpack.c.bf16 %v1215_v41, %v1214_v40  ;;  %v1216_v45 = vld [vmem:[#allocation8 + $0x70] sm:$0xff]  ;;  %v1217_v46 = vld [vmem:[#allocation8 + $0x78] sm:$0xff] }
  0xac   : > { %v301_v47 = vld [vmem:[%s10721_s27 + $0x68] sm:$0xff]  ;;  %v10780_v48 = vld [vmem:[%s10721_s27 + $0x70] sm:$0xff]  ;;  %v9914_v49 = vpack.c.bf16 %v1217_v46, %v1216_v45  ;;  %v10785_v50 = vld [vmem:[%s10721_s27 + $0x78] sm:$0xff] }
  0xad   : > { %v10794_v52 = vld [vmem:[%s10721_s27 + $0x88] sm:$0xff]  ;;  %v10797_v53 = vld [vmem:[%s10721_s27 + $0x90] sm:$0xff]  ;;  %v10805_v54 = vld [vmem:[%s10721_s27 + $0x98] sm:$0xff] }
  0xae   : > { %9881 = vmatpush3.bf16.msra.mxu1 %v9878_v51  ;;  %9845 = vmatpush1.bf16.msra.mxu0 %v9844_v2  ;;  %v10788_v51 = vld [vmem:[%s10721_s27 + $0x80] sm:$0xff]  ;;  %v10814_v56 = vld [vmem:[%s10721_s27 + $0xa8] sm:$0xff]  ;;  %v10817_v57 = vld [vmem:[%s10721_s27 + $0xb0] sm:$0xff] }
  0xaf   : > { %9883 = vmatprep.subr.bf16.mxu1 %v9882_v60  ;;  %9847 = vmatprep.subr.bf16.mxu0 %v9846_v3  ;;  %v10808_v55 = vld [vmem:[%s10721_s27 + $0xa0] sm:$0xff]  ;;  %v10824_v58 = vld [vmem:[%s10721_s27 + $0xb8] sm:$0xff]  ;;  %v10837_v61 = vld [vmem:[%s10721_s27 + $0xd0] sm:$0xff] }
  0xb0   : > { %v10827_v59 = vld [vmem:[%s10721_s27 + $0xc0] sm:$0xff]  ;;  %v10844_v62 = vld [vmem:[%s10721_s27 + $0xd8] sm:$0xff]  ;;  %v10853_v1 = vld [vmem:[%s10721_s27 + $0xe8] sm:$0xff] }
  0xb1   : > { %v10847_v63 = vld [vmem:[%s10721_s27 + $0xe0] sm:$0xff]  ;;  %v10856_v2 = vld [vmem:[%s10721_s27 + $0xf0] sm:$0xff]  ;;  %v10863_v3 = vld [vmem:[%s10721_s27 + $0xf8] sm:$0xff] }
  0xb2   : > { %9885 = vmatpush3.bf16.msra.mxu1 %v9882_v60  ;;  %9849 = vmatpush1.bf16.msra.mxu0 %v9848_v12  ;;  %v10834_v60 = vld [vmem:[%s10721_s27 + $0xc8] sm:$0xff]  ;;  %v10870_v5 = vld [vmem:[%s10713_s20 + $0x10] sm:$0xff]  ;;  %v10879_v7 = vld [vmem:[%s10713_s20 + $0x20] sm:$0xff] }
  0xb3   : > { %9887 = vmatprep.subr.bf16.mxu1 %v9886_v6  ;;  %9851 = vmatprep.subr.bf16.mxu0 %v9850_v18  ;;  %v321_v4 = vld [vmem:[%s10713_s20 + $0x8] sm:$0xff]  ;;  %v10890_v9 = vld [vmem:[%s10713_s20 + $0x30] sm:$0xff]  ;;  %v10897_v11 = vld [vmem:[%s10713_s20 + $0x38] sm:$0xff] }
  0xb4   : > { %v10887_v8 = vld [vmem:[%s10713_s20 + $0x28] sm:$0xff]  ;;  %v10900_v12 = vld [vmem:[%s10713_s20 + $0x40] sm:$0xff]  ;;  %v10910_v14 = vld [vmem:[%s10713_s20 + $0x50] sm:$0xff] }
  0xb5   : > { %9215 = vmatmul.mubr.f32.vlgmr.msra.gmra.mrb[0].mxu1 %v289_v13  ;;  %v10917_v15 = vld [vmem:[%s10713_s20 + $0x58] sm:$0xff]  ;;  %v10930_v18 = vld [vmem:[%s10713_s20 + $0x70] sm:$0xff]  ;;  %v10940_v20 = vld [vmem:[%s10713_s20 + $0x80] sm:$0xff] }
  0xb6   : > { %9889 = vmatpush3.bf16.msra.mxu1 %v9886_v6  ;;  %9217 = vmatprep.mubr.f32.mxu1 %v290_v16  ;;  %v10876_v6 = vld [vmem:[%s10713_s20 + $0x18] sm:$0xff]  ;;  %v10967_v25 = vld [vmem:[%s10713_s20 + $0xa8] sm:$0xff]  ;;  %v10970_v26 = vld [vmem:[%s10713_s20 + $0xb0] sm:$0xff] }
  0xb7   : > { %9891 = vmatprep.subr.bf16.mxu1 %v9890_v17  ;;  %9853 = vmatpush1.bf16.msra.mxu0 %v9852_v21  ;;  %v10937_v19 = vld [vmem:[%s10713_s20 + $0x78] sm:$0xff]  ;;  %v10947_v21 = vld [vmem:[%s10713_s20 + $0x88] sm:$0xff]  ;;  %v10990_v30 = vld [vmem:[%s10713_s20 + $0xd0] sm:$0xff] }
  0xb8   : > { %9342 = vmatprep.subr.mxu0 %v12545_v0  ;;  %v10997_v31 = vld [vmem:[%s10713_s20 + $0xd8] sm:$0xff] }
  0xb9   : > { %9218 = vmatmul.mubr.f32.gmra.mrb[2].mxu1 %v291_v22  ;;  %v11017_v35 = vld [vmem:[%s10713_s20 + $0xf8] sm:$0xff] }
  0xba   : > { %9220 = vmatprep.mubr.f32.mxu1 %v292_v23  ;;  %9893 = vmatpush3.bf16.msra.mxu1 %v9890_v17  ;;  %v10927_v17 = vld [vmem:[%s10713_s20 + $0x68] sm:$0xff] }
  0xbb   : > { %9895 = vmatprep.subr.bf16.mxu1 %v9894_v24  ;;  %465 = vmatmul.mubr.f32.vlgmr.msra.gmra.mrb[0].mxu0 %v10737_v10  ;;  %v10759_v10 = vld [vmem:[%s10721_s27 + $0x48] sm:$0xff] }
  0xbc   : > { %470 = vmatprep.mubr.f32.mxu0 %v12545_v0 }
  0xbd   : > { %9221 = vmatmul.mubr.f32.gmra.mrb[4].mxu1 %v293_v27 }
  0xbe   : > { %9223 = vmatprep.mubr.f32.mxu1 %v10746_v28  ;;  %9897 = vmatpush3.bf16.msra.mxu1 %v9894_v24  ;;  %v10960_v24 = vld [vmem:[%s10713_s20 + $0xa0] sm:$0xff] }
  0xbf   : > { %9899 = vmatprep.subr.bf16.mxu1 %v9898_v29  ;;  %471 = vmatmul.mubr.f32.gmra.mrb[2].mxu0 %v289_v13  ;;  %v10907_v13 = vld [vmem:[%s10713_s20 + $0x48] sm:$0xff] }
  0xc0   : > { %476 = vmatprep.mubr.f32.mxu0 %v12545_v0  ;;  %9343 = vmatpush3.xpose.msra.mxu0 %v10762_v37 }
  0xc1   : > { %9224 = vmatmul.mubr.f32.gmra.mrb[6].mxu1 %v295_v32  ;;  %9352 = vmatprep.subr.mxu0 %v12545_v0 }
  0xc2   : > { %9226 = vmatprep.mubr.f32.mxu1 %v10754_v33  ;;  %9901 = vmatpush3.bf16.msra.mxu1 %v9898_v29  ;;  %v10987_v29 = vld [vmem:[%s10713_s20 + $0xc8] sm:$0xff] }
  0xc3   : > { %9903 = vmatprep.subr.bf16.mxu1 %v9902_v34  ;;  %477 = vmatmul.mubr.f32.gmra.mrb[4].mxu0 %v290_v16  ;;  %v10920_v16 = vld [vmem:[%s10713_s20 + $0x60] sm:$0xff] }
  0xc4   : > { %482 = vmatprep.mubr.f32.mxu0 %v12545_v0 }
  0xc5   : > { %9227 = vmatmul.mubr.f32.gmra.mrb[8].mxu1 %v10759_v10 }
  0xc6   : > { %9229 = vmatprep.mubr.f32.mxu1 %v10765_v38  ;;  %9905 = vmatpush3.bf16.msra.mxu1 %v9902_v34  ;;  %v11010_v34 = vld [vmem:[%s10713_s20 + $0xf0] sm:$0xff] }
  0xc7   : > { %9907 = vmatprep.subr.bf16.mxu1 %v9906_v39  ;;  %483 = vmatmul.mubr.f32.gmra.mrb[6].mxu0 %v291_v22  ;;  %v10950_v22 = vld [vmem:[%s10713_s20 + $0x90] sm:$0xff] }
  0xc8   : > { %488 = vmatprep.mubr.f32.mxu0 %v12545_v0 }
  0xc9   : > { %9230 = vmatmul.mubr.f32.gmra.mrb[10].mxu1 %v299_v42 }
  0xca   : > { %9232 = vmatprep.mubr.f32.mxu1 %v10774_v43  ;;  %9909 = vmatpush3.bf16.msra.mxu1 %v9906_v39 }
  0xcb   : > { %9911 = vmatprep.subr.bf16.mxu1 %v9910_v44  ;;  %489 = vmatmul.mubr.f32.gmra.mrb[8].mxu0 %v292_v23  ;;  %v10957_v23 = vld [vmem:[%s10713_s20 + $0x98] sm:$0xff] }
  0xcc   : > { %494 = vmatprep.mubr.f32.mxu0 %v12545_v0 }
  0xcd   : > { %9233 = vmatmul.mubr.f32.gmra.mrb[12].mxu1 %v301_v47 }
  0xce   : > { %9235 = vmatprep.mubr.f32.mxu1 %v10780_v48  ;;  %9913 = vmatpush3.bf16.msra.mxu1 %v9910_v44 }
  0xcf   : > { %9915 = vmatprep.subr.bf16.mxu1 %v9914_v49  ;;  %495 = vmatmul.mubr.f32.gmra.mrb[10].mxu0 %v293_v27  ;;  %v10977_v27 = vld [vmem:[%s10713_s20 + $0xb8] sm:$0xff] }
  0xd0   : > { %500 = vmatprep.mubr.f32.mxu0 %v12545_v0 }
  0xd1   : > { %9236 = vmatmul.mubr.f32.gmra.mrb[14].mxu1 %v10785_v50 }
  0xd2   : > { %9238 = vmatprep.mubr.f32.mxu1 %v10788_v51  ;;  %9917 = vmatpush3.bf16.msra.mxu1 %v9914_v49 }
  0xd3   : > { %9347 = vmatprep.subr.mxu1 %v12545_v0  ;;  %501 = vmatmul.mubr.f32.gmra.mrb[12].mxu0 %v10746_v28  ;;  %v10980_v28 = vld [vmem:[%s10713_s20 + $0xc0] sm:$0xff] }
  0xd4   : > { %506 = vmatprep.mubr.f32.mxu0 %v12545_v0 }
  0xd5   : > { %9239 = vmatmul.mubr.f32.gmra.mrb[16].mxu1 %v10794_v52 }
  0xd6   : > { %9241 = vmatprep.mubr.f32.mxu1 %v10797_v53 }
  0xd7   : > { %507 = vmatmul.mubr.f32.gmra.mrb[14].mxu0 %v295_v32  ;;  %v11000_v32 = vld [vmem:[%s10713_s20 + $0xe0] sm:$0xff] }
  0xd8   : > { %512 = vmatprep.mubr.f32.mxu0 %v12545_v0 }
  0xd9   : > { %9242 = vmatmul.mubr.f32.gmra.mrb[18].mxu1 %v10805_v54 }
  0xda   : > { %9244 = vmatprep.mubr.f32.mxu1 %v10808_v55 }
  0xdb   : > { %513 = vmatmul.mubr.f32.gmra.mrb[16].mxu0 %v10754_v33  ;;  %v11007_v33 = vld [vmem:[%s10713_s20 + $0xe8] sm:$0xff] }
  0xdc   : > { %518 = vmatprep.mubr.f32.mxu0 %v12545_v0 }
  0xdd   : > { %9245 = vmatmul.mubr.f32.gmra.mrb[20].mxu1 %v10814_v56 }
  0xde   : > { %9247 = vmatprep.mubr.f32.mxu1 %v10817_v57 }
  0xdf   : > { %519 = vmatmul.mubr.f32.gmra.mrb[18].mxu0 %v10759_v10 }
  0xe0   : > { %524 = vmatprep.mubr.f32.mxu0 %v12545_v0 }
  0xe1   : > { %9248 = vmatmul.mubr.f32.gmra.mrb[22].mxu1 %v10824_v58 }
  0xe2   : > { %9250 = vmatprep.mubr.f32.mxu1 %v10827_v59 }
  0xe3   : > { %525 = vmatmul.mubr.f32.gmra.mrb[20].mxu0 %v10765_v38 }
  0xe4   : > { %530 = vmatprep.mubr.f32.mxu0 %v12545_v0 }
  0xe5   : > { %9251 = vmatmul.mubr.f32.gmra.mrb[24].mxu1 %v10834_v60 }
  0xe6   : > { %9253 = vmatprep.mubr.f32.mxu1 %v10837_v61 }
  0xe7   : > { %531 = vmatmul.mubr.f32.gmra.mrb[22].mxu0 %v299_v42 }
  0xe8   : > { %536 = vmatprep.mubr.f32.mxu0 %v12545_v0 }
  0xe9   : > { %9254 = vmatmul.mubr.f32.gmra.mrb[26].mxu1 %v10844_v62 }
  0xea   : > { %9256 = vmatprep.mubr.f32.mxu1 %v10847_v63 }
  0xeb   : > { %537 = vmatmul.mubr.f32.gmra.mrb[24].mxu0 %v10774_v43 }
  0xec   : > { %542 = vmatprep.mubr.f32.mxu0 %v12545_v0 }
  0xed   : > { %9257 = vmatmul.mubr.f32.gmra.mrb[28].mxu1 %v10853_v1 }
  0xee   : > { %9259 = vmatprep.mubr.f32.mxu1 %v10856_v2 }
  0xef   : > { %543 = vmatmul.mubr.f32.gmra.mrb[26].mxu0 %v301_v47 }
  0xf0   : > { %548 = vmatprep.mubr.f32.mxu0 %v12545_v0 }
  0xf1   : > { %9260 = vmatmul.mubr.f32.gmra.mrb[30].mxu1 %v10863_v3 }
  0xf2   : > { %9294 = vmatprep.mubr.f32.mxu1 %v10762_v37 }
  0xf3   : > { %549 = vmatmul.mubr.f32.gmra.mrb[28].mxu0 %v10780_v48 }
  0xf4   : > { %554 = vmatprep.mubr.f32.mxu0 %v12545_v0 }
  0xf5   : > { %9295 = vmatmul.mubr.f32.vlgmr.msra.gmra.mrb[32].mxu1 %v321_v4 }
  0xf6   : > { %9297 = vmatprep.mubr.f32.mxu1 %v10870_v5  ;;  %9348 = vmatpush3.xpose.msra.mxu1 %v321_v4 }
  0xf7   : > { %9357 = vmatprep.subr.mxu1 %v12545_v0  ;;  %555 = vmatmul.mubr.f32.gmra.mrb[30].mxu0 %v10785_v50 }
  0xf8   : > { %560 = vmatprep.mubr.f32.mxu0 %v12545_v0 }
  0xf9   : > { %9298 = vmatmul.mubr.f32.gmra.mrb[34].mxu1 %v10876_v6 }
  0xfa   : > { %9300 = vmatprep.mubr.f32.mxu1 %v10879_v7 }
  0xfb   : > { %561 = vmatmul.mubr.f32.gmra.mrb[32].mxu0 %v10788_v51 }
  0xfc   : > { %566 = vmatprep.mubr.f32.mxu0 %v12545_v0 }
  0xfd   : > { %9301 = vmatmul.mubr.f32.gmra.mrb[36].mxu1 %v10887_v8 }
  0xfe   : > { %9303 = vmatprep.mubr.f32.mxu1 %v10890_v9 }
  0xff   : > { %567 = vmatmul.mubr.f32.gmra.mrb[34].mxu0 %v10794_v52 }
 0x100   : > { %572 = vmatprep.mubr.f32.mxu0 %v12545_v0 }
 0x101   : > { %9304 = vmatmul.mubr.f32.gmra.mrb[38].mxu1 %v10897_v11 }
 0x102   : > { %9306 = vmatprep.mubr.f32.mxu1 %v10900_v12 }
 0x103   : > { %573 = vmatmul.mubr.f32.gmra.mrb[36].mxu0 %v10797_v53 }
 0x104   : > { %578 = vmatprep.mubr.f32.mxu0 %v12545_v0 }
 0x105   : > { %9307 = vmatmul.mubr.f32.gmra.mrb[40].mxu1 %v10907_v13 }
 0x106   : > { %9309 = vmatprep.mubr.f32.mxu1 %v10910_v14 }
 0x107   : > { %579 = vmatmul.mubr.f32.gmra.mrb[38].mxu0 %v10805_v54 }
 0x108   : > { %584 = vmatprep.mubr.f32.mxu0 %v12545_v0 }
 0x109   : > { %9310 = vmatmul.mubr.f32.gmra.mrb[42].mxu1 %v10917_v15 }
 0x10a   : > { %9312 = vmatprep.mubr.f32.mxu1 %v10920_v16 }
 0x10b   : > { %585 = vmatmul.mubr.f32.gmra.mrb[40].mxu0 %v10808_v55 }
 0x10c   : > { %590 = vmatprep.mubr.f32.mxu0 %v12545_v0 }
 0x10d   : > { %9313 = vmatmul.mubr.f32.gmra.mrb[44].mxu1 %v10927_v17 }
 0x10e   : > { %9315 = vmatprep.mubr.f32.mxu1 %v10930_v18 }
 0x10f   : > { %591 = vmatmul.mubr.f32.gmra.mrb[42].mxu0 %v10814_v56 }
 0x110   : > { %596 = vmatprep.mubr.f32.mxu0 %v12545_v0 }
 0x111   : > { %9316 = vmatmul.mubr.f32.gmra.mrb[46].mxu1 %v10937_v19 }
 0x112   : > { %9318 = vmatprep.mubr.f32.mxu1 %v10940_v20 }
 0x113   : > { %597 = vmatmul.mubr.f32.gmra.mrb[44].mxu0 %v10817_v57 }
 0x114   : > { %602 = vmatprep.mubr.f32.mxu0 %v12545_v0 }
 0x115   : > { %9319 = vmatmul.mubr.f32.gmra.mrb[48].mxu1 %v10947_v21 }
 0x116   : > { %9321 = vmatprep.mubr.f32.mxu1 %v10950_v22 }
 0x117   : > { %603 = vmatmul.mubr.f32.gmra.mrb[46].mxu0 %v10824_v58 }
 0x118   : > { %608 = vmatprep.mubr.f32.mxu0 %v12545_v0 }
 0x119   : > { %9322 = vmatmul.mubr.f32.gmra.mrb[50].mxu1 %v10957_v23 }
 0x11a   : > { %9324 = vmatprep.mubr.f32.mxu1 %v10960_v24 }
 0x11b   : > { %609 = vmatmul.mubr.f32.gmra.mrb[48].mxu0 %v10827_v59 }
 0x11c   : > { %614 = vmatprep.mubr.f32.mxu0 %v12545_v0 }
 0x11d   : > { %9325 = vmatmul.mubr.f32.gmra.mrb[52].mxu1 %v10967_v25 }
 0x11e   : > { %9327 = vmatprep.mubr.f32.mxu1 %v10970_v26 }
 0x11f   : > { %615 = vmatmul.mubr.f32.gmra.mrb[50].mxu0 %v10834_v60 }
 0x120   : > { %620 = vmatprep.mubr.f32.mxu0 %v12545_v0 }
 0x121   : > { %9328 = vmatmul.mubr.f32.gmra.mrb[54].mxu1 %v10977_v27 }
 0x122   : > { %9330 = vmatprep.mubr.f32.mxu1 %v10980_v28 }
 0x123   : > { %621 = vmatmul.mubr.f32.gmra.mrb[52].mxu0 %v10837_v61 }
 0x124   : > { %626 = vmatprep.mubr.f32.mxu0 %v12545_v0 }
 0x125   : > { %9331 = vmatmul.mubr.f32.gmra.mrb[56].mxu1 %v10987_v29 }
 0x126   : > { %9333 = vmatprep.mubr.f32.mxu1 %v10990_v30 }
 0x127   : > { %627 = vmatmul.mubr.f32.gmra.mrb[54].mxu0 %v10844_v62 }
 0x128   : > { %632 = vmatprep.mubr.f32.mxu0 %v12545_v0 }
 0x129   : > { %9334 = vmatmul.mubr.f32.gmra.mrb[58].mxu1 %v10997_v31 }
 0x12a   : > { %9336 = vmatprep.mubr.f32.mxu1 %v11000_v32 }
 0x12b   : > { %633 = vmatmul.mubr.f32.gmra.mrb[56].mxu0 %v10847_v63 }
 0x12c   : > { %638 = vmatprep.mubr.f32.mxu0 %v12545_v0 }
 0x12d   : > { %9337 = vmatmul.mubr.f32.gmra.mrb[60].mxu1 %v11007_v33 }
 0x12e   : > { %9339 = vmatprep.mubr.f32.mxu1 %v11010_v34 }
 0x12f   : > { %639 = vmatmul.mubr.f32.gmra.mrb[58].mxu0 %v10853_v1 }
 0x130   : > { %644 = vmatprep.mubr.f32.mxu0 %v12545_v0 }
 0x131   : > { %9340 = vmatmul.mubr.f32.gmra.mrb[62].mxu1 %v11017_v35 }
 0x132   : > { %9349 = vmatprep.mubr.msk.f32.mxu1 %vm10459_vm0, %v12545_v0 }
 0x133   : > { %645 = vmatmul.mubr.f32.gmra.mrb[60].mxu0 %v10856_v2 }
 0x134   : > { %650 = vmatprep.mubr.f32.mxu0 %v12545_v0 }
 0x137   : > { %651 = vmatmul.mubr.f32.gmra.mrb[62].mxu0 %v10863_v3 }
 0x138   : > { %9344 = vmatprep.mubr.msk.f32.mxu0 %vm10459_vm0, %v12545_v0 }
 0x188   : > { %v11029_v36 = vpop.f32.mrb[0].mxu1 }
 0x189   : > { %12582 = vst [vmem:[#allocation16_spill] sm:$0xff] %v11029_v36  ;;  %v11031_v10 = vpop.f32.mrb[1].mxu1 }
 0x18a   : > { %12583 = vst [vmem:[#allocation17_spill] sm:$0xff] %v11031_v10 }
 0x18c   : > { %v11033_v37 = vpop.f32.mrb[2].mxu1 }
 0x18d   : > { %12584 = vst [vmem:[#allocation18_spill] sm:$0xff] %v11033_v37  ;;  %v11035_v38 = vpop.f32.mrb[3].mxu1 }
 0x18e   : > { %12585 = vst [vmem:[#allocation19_spill] sm:$0xff] %v11035_v38  ;;  %v11037_v39 = vpop.f32.mrb[0].mxu0 }
 0x18f   : > { %v11041_v41 = vpop.f32.mrb[1].mxu0  ;;  %vm882_vm1 = vcmp.gt.f32.partialorder %v11037_v39, 0.0 }
 0x190   : > { %v11039_v40 = vpop.f32.mrb[4].mxu1  ;;  %vm1042_vm2 = vcmp.gt.f32.partialorder %v11041_v41, 0.0 }
 0x191   : > { %12586 = vst [vmem:[#allocation20_spill] sm:$0xff] %v11039_v40  ;;  %v11043_v42 = vpop.f32.mrb[5].mxu1 }
 0x192   : > { %12587 = vst [vmem:[#allocation21_spill] sm:$0xff] %v11043_v42  ;;  %v11045_v43 = vpop.f32.mrb[2].mxu0 }
 0x193   : > { %v11049_v45 = vpop.f32.mrb[3].mxu0  ;;  %vm883_vm3 = vcmp.gt.f32.partialorder %v11045_v43, 0.0 }
 0x194   : > { %v11047_v44 = vpop.f32.mrb[6].mxu1  ;;  %vm1043_vm4 = vcmp.gt.f32.partialorder %v11049_v45, 0.0 }
 0x195   : > { %12588 = vst [vmem:[#allocation22_spill] sm:$0xff] %v11047_v44  ;;  %v11051_v46 = vpop.f32.mrb[7].mxu1 }
 0x196   : > { %12589 = vst [vmem:[#allocation23_spill] sm:$0xff] %v11051_v46  ;;  %v11053_v47 = vpop.f32.mrb[4].mxu0 }
 0x197   : > { %v11057_v49 = vpop.f32.mrb[5].mxu0  ;;  %vm884_vm5 = vcmp.gt.f32.partialorder %v11053_v47, 0.0 }
 0x198   : > { %v11055_v48 = vpop.f32.mrb[8].mxu1  ;;  %vm1044_vm6 = vcmp.gt.f32.partialorder %v11057_v49, 0.0 }
 0x199   : > { %12590 = vst [vmem:[#allocation24_spill] sm:$0xff] %v11055_v48  ;;  %v11059_v50 = vpop.f32.mrb[9].mxu1 }
 0x19a   : > { %12591 = vst [vmem:[#allocation25_spill] sm:$0xff] %v11059_v50  ;;  %v11061_v51 = vpop.f32.mrb[6].mxu0 }
 0x19b   : > { %v11065_v53 = vpop.f32.mrb[7].mxu0  ;;  %vm885_vm7 = vcmp.gt.f32.partialorder %v11061_v51, 0.0 }
 0x19c   : > { %v11063_v52 = vpop.f32.mrb[10].mxu1  ;;  %vm1045_vm8 = vcmp.gt.f32.partialorder %v11065_v53, 0.0 }
 0x19d   : > { %12592 = vst [vmem:[#allocation26_spill] sm:$0xff] %v11063_v52  ;;  %v11067_v54 = vpop.f32.mrb[11].mxu1 }
 0x19e   : > { %12593 = vst [vmem:[#allocation27_spill] sm:$0xff] %v11067_v54  ;;  %v11069_v55 = vpop.f32.mrb[8].mxu0 }
 0x19f   : > { %v11073_v57 = vpop.f32.mrb[9].mxu0  ;;  %vm886_vm9 = vcmp.gt.f32.partialorder %v11069_v55, 0.0 }
 0x1a0   : > { %v11071_v56 = vpop.f32.mrb[12].mxu1  ;;  %vm1046_vm10 = vcmp.gt.f32.partialorder %v11073_v57, 0.0 }
 0x1a1   : > { %12594 = vst [vmem:[#allocation28_spill] sm:$0xff] %v11071_v56  ;;  %v11075_v58 = vpop.f32.mrb[13].mxu1 }
 0x1a2   : > { %12595 = vst [vmem:[#allocation29_spill] sm:$0xff] %v11075_v58  ;;  %v11077_v59 = vpop.f32.mrb[10].mxu0 }
 0x1a3   : > { %v11081_v61 = vpop.f32.mrb[11].mxu0  ;;  %vm887_vm11 = vcmp.gt.f32.partialorder %v11077_v59, 0.0 }
 0x1a4   : > { %v11079_v60 = vpop.f32.mrb[14].mxu1  ;;  %vm1047_vm12 = vcmp.gt.f32.partialorder %v11081_v61, 0.0 }
 0x1a5   : > { %12596 = vst [vmem:[#allocation30_spill] sm:$0xff] %v11079_v60  ;;  %v11083_v62 = vpop.f32.mrb[15].mxu1 }
 0x1a6   : > { %12597 = vst [vmem:[#allocation31_spill] sm:$0xff] %v11083_v62  ;;  %v11085_v63 = vpop.f32.mrb[12].mxu0 }
 0x1a7   : > { %v11089_v2 = vpop.f32.mrb[13].mxu0  ;;  %vm888_vm13 = vcmp.gt.f32.partialorder %v11085_v63, 0.0 }
 0x1a8   : > { %v11087_v1 = vpop.f32.mrb[16].mxu1  ;;  %vm1048_vm14 = vcmp.gt.f32.partialorder %v11089_v2, 0.0 }
 0x1a9   : > { %12598 = vst [vmem:[#allocation32_spill] sm:$0xff] %v11087_v1  ;;  %v11091_v3 = vpop.f32.mrb[17].mxu1 }
 0x1aa   : > { %12599 = vst [vmem:[#allocation33_spill] sm:$0xff] %v11091_v3  ;;  %v11093_v4 = vpop.f32.mrb[14].mxu0 }
 0x1ab   : > { %v11097_v56 = vpop.f32.mrb[15].mxu0  ;;  %vm889_vm15 = vcmp.gt.f32.partialorder %v11093_v4, 0.0 }
 0x1ac   : > { %v11095_v0 = vpop.f32.mrb[18].mxu1 }
 0x1ad   : > { %12600 = vst [vmem:[#allocation34_spill] sm:$0xff] %v11095_v0  ;;  %v11099_v58 = vpop.f32.mrb[19].mxu1 }
 0x1ae   : > { %12601 = vst [vmem:[#allocation35_spill] sm:$0xff] %v11099_v58  ;;  %v11101_v60 = vpop.f32.mrb[16].mxu0 }
 0x1af   : > { %v11105_v62 = vpop.f32.mrb[17].mxu0 }
 0x1b0   : > { %v11103_v52 = vpop.f32.mrb[20].mxu1 }
 0x1b1   : > { %12602 = vst [vmem:[#allocation36_spill] sm:$0xff] %v11103_v52  ;;  %v11107_v54 = vpop.f32.mrb[21].mxu1 }
 0x1b2   : > { %12603 = vst [vmem:[#allocation37_spill] sm:$0xff] %v11107_v54  ;;  %v11109_v1 = vpop.f32.mrb[18].mxu0 }
 0x1b3   : > { %v11113_v3 = vpop.f32.mrb[19].mxu0 }
 0x1b4   : > { %v11111_v48 = vpop.f32.mrb[22].mxu1 }
 0x1b5   : > { %12604 = vst [vmem:[#allocation38_spill] sm:$0xff] %v11111_v48  ;;  %v11115_v50 = vpop.f32.mrb[23].mxu1 }
 0x1b6   : > { %12605 = vst [vmem:[#allocation39_spill] sm:$0xff] %v11115_v50  ;;  %v11117_v0 = vpop.f32.mrb[20].mxu0 }
 0x1b7   : > { %v11121_v58 = vpop.f32.mrb[21].mxu0 }
 0x1b8   : > { %v11119_v44 = vpop.f32.mrb[24].mxu1 }
 0x1b9   : > { %12606 = vst [vmem:[#allocation40_spill] sm:$0xff] %v11119_v44  ;;  %v11123_v46 = vpop.f32.mrb[25].mxu1 }
 0x1ba   : > { %12607 = vst [vmem:[#allocation41_spill] sm:$0xff] %v11123_v46  ;;  %v11125_v52 = vpop.f32.mrb[22].mxu0 }
 0x1bb   : > { %v11129_v54 = vpop.f32.mrb[23].mxu0 }
 0x1bc   : > { %v11127_v40 = vpop.f32.mrb[26].mxu1  ;;  %12609 = vst [vmem:[#allocation43_spill] sm:$0xff] %v11129_v54 }
 0x1bd   : > { %12608 = vst [vmem:[#allocation42_spill] sm:$0xff] %v11127_v40  ;;  %v11131_v42 = vpop.f32.mrb[27].mxu1 }
 0x1be   : > { %12610 = vst [vmem:[#allocation44_spill] sm:$0xff] %v11131_v42  ;;  %v11133_v48 = vpop.f32.mrb[24].mxu0 }
 0x1bf   : > { %12611 = vst [vmem:[#allocation45_spill] sm:$0xff] %v11133_v48  ;;  %v11137_v50 = vpop.f32.mrb[25].mxu0 }
 0x1c0   : > { %v11135_v37 = vpop.f32.mrb[28].mxu1 }
 0x1c1   : > { %12612 = vst [vmem:[#allocation46_spill] sm:$0xff] %v11135_v37  ;;  %v11139_v38 = vpop.f32.mrb[29].mxu1  ;;  %v12617_v37 = vmov 0.0  }
 0x1c2   : > { %12613 = vst [vmem:[#allocation47_spill] sm:$0xff] %v11139_v38  ;;  %v11141_v44 = vpop.f32.mrb[26].mxu0 }
 0x1c3   : > { %v11145_v46 = vpop.f32.mrb[27].mxu0 }
 0x1c4   : > { %v11143_v10 = vpop.f32.mrb[30].mxu1 }
 0x1c5   : > { %12614 = vst [vmem:[#allocation48_spill] sm:$0xff] %v11143_v10  ;;  %v11147_v36 = vpop.f32.mrb[31].mxu1 }
 0x1c6   : > { %12615 = vst [vmem:[#allocation49_spill] sm:$0xff] %v11147_v36  ;;  %v11149_v40 = vpop.f32.mrb[28].mxu0 }
 0x1c7   : > { %v11151_v42 = vpop.f32.mrb[29].mxu0 }
 0x1c8   : > { %v9296_v54 = vpop.f32.mrb[32].mxu1  ;;  %12616 = vst [vmem:[#allocation50_spill] sm:$0xff] %v11151_v42 }
 0x1c9   : > { %v1284_v48 = vpop.f32.mrb[33].mxu1  ;;  %9350 = vmatmul.mubr.f32.vlgmr.msra.gmra.mrb[64].mxu1 %v9296_v54 }
 0x1ca   : > { %9358 = vmatpush3.xpose.msra.mxu1 %v10876_v6  ;;  %9345 = vmatmul.mubr.f32.vlgmr.msra.gmra.mrb[64].mxu0 %v1284_v48  ;;  %v11157_v10 = vpop.f32.mrb[30].mxu0 }
 0x1cb   : > { %9353 = vmatpush3.xpose.msra.mxu0 %v10870_v5  ;;  %9359 = vmatprep.mubr.msk.f32.mxu1 %vm10459_vm0, %v12617_v37  ;;  %v11162_v36 = vpop.f32.mrb[31].mxu0 }
 0x1cc   : > { %v9299_v38 = vpop.f32.mrb[34].mxu1  ;;  %9367 = vmatprep.subr.mxu1 %v12617_v37  ;;  %9354 = vmatprep.mubr.msk.f32.mxu0 %vm10459_vm0, %v12617_v37 }
 0x1cd   : > { %v1294_v42 = vpop.f32.mrb[35].mxu1  ;;  %9360 = vmatmul.mubr.f32.vlgmr.msra.gmra.mrb[66].mxu1 %v9299_v38  ;;  %9362 = vmatprep.subr.mxu0 %v12617_v37 }
 0x1ce   : > { %9368 = vmatpush3.xpose.msra.mxu1 %v10887_v8  ;;  %9355 = vmatmul.mubr.f32.vlgmr.msra.gmra.mrb[66].mxu0 %v1294_v42  ;;  %v11169_v5 = vpop.f32.mrb[32].mxu0 }
 0x1cf   : > { %9363 = vmatpush3.xpose.msra.mxu0 %v10879_v7  ;;  %9369 = vmatprep.mubr.msk.f32.mxu1 %vm10459_vm0, %v12617_v37  ;;  %v11174_v48 = vpop.f32.mrb[33].mxu0 }
 0x1d0   : > { %v9302_v6 = vpop.f32.mrb[36].mxu1  ;;  %9377 = vmatprep.subr.mxu1 %v12617_v37  ;;  %9364 = vmatprep.mubr.msk.f32.mxu0 %vm10459_vm0, %v12617_v37 }
 0x1d1   : > { %v1304_v38 = vpop.f32.mrb[37].mxu1  ;;  %9370 = vmatmul.mubr.f32.vlgmr.msra.gmra.mrb[68].mxu1 %v9302_v6  ;;  %9372 = vmatprep.subr.mxu0 %v12617_v37 }
 0x1d2   : > { %9378 = vmatpush3.xpose.msra.mxu1 %v10897_v11  ;;  %9365 = vmatmul.mubr.f32.vlgmr.msra.gmra.mrb[68].mxu0 %v1304_v38  ;;  %v11181_v7 = vpop.f32.mrb[34].mxu0 }
 0x1d3   : > { %9373 = vmatpush3.xpose.msra.mxu0 %v10890_v9  ;;  %9379 = vmatprep.mubr.msk.f32.mxu1 %vm10459_vm0, %v12617_v37  ;;  %v11186_v42 = vpop.f32.mrb[35].mxu0 }
 0x1d4   : > { %v9305_v8 = vpop.f32.mrb[38].mxu1  ;;  %9387 = vmatprep.subr.mxu1 %v12617_v37  ;;  %9374 = vmatprep.mubr.msk.f32.mxu0 %vm10459_vm0, %v12617_v37 }
 0x1d5   : > { %v1314_v54 = vpop.f32.mrb[39].mxu1  ;;  %9380 = vmatmul.mubr.f32.vlgmr.msra.gmra.mrb[70].mxu1 %v9305_v8  ;;  %9382 = vmatprep.subr.mxu0 %v12617_v37 }
 0x1d6   : > { %9388 = vmatpush3.xpose.msra.mxu1 %v10907_v13  ;;  %9375 = vmatmul.mubr.f32.vlgmr.msra.gmra.mrb[70].mxu0 %v1314_v54  ;;  %v11193_v9 = vpop.f32.mrb[36].mxu0 }
 0x1d7   : > { %9383 = vmatpush3.xpose.msra.mxu0 %v10900_v12  ;;  %9389 = vmatprep.mubr.msk.f32.mxu1 %vm10459_vm0, %v12617_v37  ;;  %v11198_v6 = vpop.f32.mrb[37].mxu0 }
 0x1d8   : > { %v9308_v11 = vpop.f32.mrb[40].mxu1  ;;  %9397 = vmatprep.subr.mxu1 %v12617_v37  ;;  %9384 = vmatprep.mubr.msk.f32.mxu0 %vm10459_vm0, %v12617_v37 }
 0x1d9   : > { %v1324_v38 = vpop.f32.mrb[41].mxu1  ;;  %9390 = vmatmul.mubr.f32.vlgmr.msra.gmra.mrb[72].mxu1 %v9308_v11  ;;  %9392 = vmatprep.subr.mxu0 %v12617_v37 }
 0x1da   : > { %9398 = vmatpush3.xpose.msra.mxu1 %v10917_v15  ;;  %9385 = vmatmul.mubr.f32.vlgmr.msra.gmra.mrb[72].mxu0 %v1324_v38  ;;  %v11205_v12 = vpop.f32.mrb[38].mxu0 }
 0x1db   : > { %9393 = vmatpush3.xpose.msra.mxu0 %v10910_v14  ;;  %9399 = vmatprep.mubr.msk.f32.mxu1 %vm10459_vm0, %v12617_v37  ;;  %v11210_v8 = vpop.f32.mrb[39].mxu0 }
 0x1dc   : > { %v9311_v13 = vpop.f32.mrb[42].mxu1  ;;  %9407 = vmatprep.subr.mxu1 %v12617_v37  ;;  %9394 = vmatprep.mubr.msk.f32.mxu0 %vm10459_vm0, %v12617_v37 }
 0x1dd   : > { %v1334_v54 = vpop.f32.mrb[43].mxu1  ;;  %9400 = vmatmul.mubr.f32.vlgmr.msra.gmra.mrb[74].mxu1 %v9311_v13  ;;  %9402 = vmatprep.subr.mxu0 %v12617_v37 }
 0x1de   : > { %9408 = vmatpush3.xpose.msra.mxu1 %v10927_v17  ;;  %9395 = vmatmul.mubr.f32.vlgmr.msra.gmra.mrb[74].mxu0 %v1334_v54  ;;  %v11217_v14 = vpop.f32.mrb[40].mxu0 }
 0x1df   : > { %9403 = vmatpush3.xpose.msra.mxu0 %v10920_v16  ;;  %9409 = vmatprep.mubr.msk.f32.mxu1 %vm10459_vm0, %v12617_v37  ;;  %12618 = vst [vmem:[#allocation51_spill] sm:$0xff] %v11217_v14  ;;  %v11222_v11 = vpop.f32.mrb[41].mxu0  ;;  %v11329_v14 = vadd.f32 1.0, %v11065_v53 }
 0x1e0   : > { %v9314_v15 = vpop.f32.mrb[44].mxu1  ;;  %9417 = vmatprep.subr.mxu1 %v12617_v37  ;;  %9404 = vmatprep.mubr.msk.f32.mxu0 %vm10459_vm0, %v12617_v37  ;;  %12619 = vst [vmem:[#allocation52_spill] sm:$0xff] %v11222_v11 }
 0x1e1   : > { %v1344_v38 = vpop.f32.mrb[45].mxu1  ;;  %9410 = vmatmul.mubr.f32.vlgmr.msra.gmra.mrb[76].mxu1 %v9314_v15  ;;  %9412 = vmatprep.subr.mxu0 %v12617_v37 }
 0x1e2   : > { %9418 = vmatpush3.xpose.msra.mxu1 %v10937_v19  ;;  %9405 = vmatmul.mubr.f32.vlgmr.msra.gmra.mrb[76].mxu0 %v1344_v38  ;;  %v11229_v16 = vpop.f32.mrb[42].mxu0  ;;  %v946_v38 = vmul.f32 1.442695, %v11037_v39 }
 0x1e3   : > { %9413 = vmatpush3.xpose.msra.mxu0 %v10930_v18  ;;  %9419 = vmatprep.mubr.msk.f32.mxu1 %vm10459_vm0, %v12617_v37  ;;  %12620 = vst [vmem:[#allocation53_spill] sm:$0xff] %v11229_v16  ;;  %v11234_v13 = vpop.f32.mrb[43].mxu0 }
 0x1e4   : > { %v9317_v17 = vpop.f32.mrb[46].mxu1  ;;  %9427 = vmatprep.subr.mxu1 %v12617_v37  ;;  %9414 = vmatprep.mubr.msk.f32.mxu0 %vm10459_vm0, %v12617_v37  ;;  %9998 = vpow2.f32 %v946_v38 }
 0x1e5   : > { %v1354_v54 = vpop.f32.mrb[47].mxu1  ;;  %9420 = vmatmul.mubr.f32.vlgmr.msra.gmra.mrb[78].mxu1 %v9317_v17  ;;  %9422 = vmatprep.subr.mxu0 %v12617_v37 }
 0x1e6   : > { %9428 = vmatpush3.xpose.msra.mxu1 %v10947_v21  ;;  %9415 = vmatmul.mubr.f32.vlgmr.msra.gmra.mrb[78].mxu0 %v1354_v54  ;;  %v11241_v18 = vpop.f32.mrb[44].mxu0  ;;  %v948_v54 = vmul.f32 1.442695, %v11045_v43 }
 0x1e7   : > { %9423 = vmatpush3.xpose.msra.mxu0 %v10940_v20  ;;  %9429 = vmatprep.mubr.msk.f32.mxu1 %vm10459_vm0, %v12617_v37  ;;  %12621 = vst [vmem:[#allocation54_spill] sm:$0xff] %v11241_v18  ;;  %v11246_v15 = vpop.f32.mrb[45].mxu0  ;;  %v1106_v20 = vmul.f32 1.442695, %v11041_v41 }
 0x1e8   : > { %v9320_v19 = vpop.f32.mrb[48].mxu1  ;;  %9437 = vmatprep.subr.mxu1 %v12617_v37  ;;  %9424 = vmatprep.mubr.msk.f32.mxu0 %vm10459_vm0, %v12617_v37  ;;  %12622 = vst [vmem:[#allocation55_spill] sm:$0xff] %v11246_v15 }
 0x1e9   : > { %v1364_v17 = vpop.f32.mrb[49].mxu1  ;;  %9430 = vmatmul.mubr.f32.vlgmr.msra.gmra.mrb[80].mxu1 %v9320_v19  ;;  %9432 = vmatprep.subr.mxu0 %v12617_v37  ;;  %10000 = vpow2.f32 %v1106_v20 }
 0x1ea   : > { %9438 = vmatpush3.xpose.msra.mxu1 %v10957_v23  ;;  %9425 = vmatmul.mubr.f32.vlgmr.msra.gmra.mrb[80].mxu0 %v1364_v17  ;;  %v11255_v21 = vpop.f32.mrb[46].mxu0  ;;  %v1108_v23 = vmul.f32 1.442695, %v11049_v45  ;;  %10002 = vpow2.f32 %v948_v54  ;;  %v954_v54 = vmul.f32 1.442695, %v11069_v55 }
 0x1eb   : > { %9433 = vmatpush3.xpose.msra.mxu0 %v10950_v22  ;;  %9439 = vmatprep.mubr.msk.f32.mxu1 %vm10459_vm0, %v12617_v37  ;;  %12623 = vst [vmem:[#allocation56_spill] sm:$0xff] %v11255_v21  ;;  %v11261_v19 = vpop.f32.mrb[47].mxu0  ;;  %v950_v22 = vmul.f32 1.442695, %v11053_v47  ;;  %v1110_v21 = vmul.f32 1.442695, %v11057_v49 }
 0x1ec   : > { %v9323_v18 = vpop.f32.mrb[50].mxu1  ;;  %9447 = vmatprep.subr.mxu1 %v12617_v37  ;;  %9434 = vmatprep.mubr.msk.f32.mxu0 %vm10459_vm0, %v12617_v37  ;;  %12624 = vst [vmem:[#allocation57_spill] sm:$0xff] %v11261_v19  ;;  %10004 = vpow2.f32 %v1108_v23  ;;  %v1118_v19 = vmul.f32 1.442695, %v11089_v2 }
 0x1ed   : > { %v1374_v17 = vpop.f32.mrb[51].mxu1  ;;  %9440 = vmatmul.mubr.f32.vlgmr.msra.gmra.mrb[82].mxu1 %v9323_v18  ;;  %9442 = vmatprep.subr.mxu0 %v12617_v37  ;;  %10006 = vpow2.f32 %v950_v22 }
 0x1ee   : > { %9448 = vmatpush3.xpose.msra.mxu1 %v10967_v25  ;;  %9435 = vmatmul.mubr.f32.vlgmr.msra.gmra.mrb[82].mxu0 %v1374_v17  ;;  %v11271_v38 = vpop.f32.mrb[48].mxu0  ;;  %v952_v25 = vmul.f32 1.442695, %v11061_v51  ;;  %10008 = vpow2.f32 %v1110_v21  ;;  %v1114_v17 = vmul.f32 1.442695, %v11073_v57 }
 0x1ef   : > { %9443 = vmatpush3.xpose.msra.mxu0 %v10960_v24  ;;  %9449 = vmatprep.mubr.msk.f32.mxu1 %vm10459_vm0, %v12617_v37  ;;  %12625 = vst [vmem:[#allocation58_spill] sm:$0xff] %v11271_v38  ;;  %v11276_v18 = vpop.f32.mrb[49].mxu0  ;;  %v1112_v24 = vmul.f32 1.442695, %v11065_v53  ;;  %v9999_v38 = vpop.eup %9998 }
 0x1f0   : > { %v9326_v15 = vpop.f32.mrb[52].mxu1  ;;  %9457 = vmatprep.subr.mxu1 %v12617_v37  ;;  %9444 = vmatprep.mubr.msk.f32.mxu0 %vm10459_vm0, %v12617_v37  ;;  %12626 = vst [vmem:[#allocation59_spill] sm:$0xff] %v11276_v18  ;;  %10010 = vpow2.f32 %v952_v25  ;;  %v1075_v18 = vadd.f32 1.0, %v11049_v45  ;;  %v1116_v25 = vmul.f32 1.442695, %v11081_v61 }
 0x1f1   : > { %v1384_v20 = vpop.f32.mrb[53].mxu1  ;;  %9450 = vmatmul.mubr.f32.vlgmr.msra.gmra.mrb[84].mxu1 %v9326_v15  ;;  %9452 = vmatprep.subr.mxu0 %v12617_v37  ;;  %v914_v15 = vadd.f32 1.0, %v11037_v39  ;;  %10012 = vpow2.f32 %v1112_v24 }
 0x1f2   : > { %9458 = vmatpush3.xpose.msra.mxu1 %v10977_v27  ;;  %9445 = vmatmul.mubr.f32.vlgmr.msra.gmra.mrb[84].mxu0 %v1384_v20  ;;  %v11286_v23 = vpop.f32.mrb[50].mxu0  ;;  %v915_v20 = vadd.f32 1.0, %v11045_v43  ;;  %10014 = vpow2.f32 %v954_v54  ;;  %v1076_v54 = vadd.f32 1.0, %v11057_v49  ;;  %v11376_v43 = vadd.f32 1.0, %v11081_v61 }
 0x1f3   : > { %9453 = vmatpush3.xpose.msra.mxu0 %v10970_v26  ;;  %9459 = vmatprep.mubr.msk.f32.mxu1 %vm10459_vm0, %v12617_v37  ;;  %12627 = vst [vmem:[#allocation60_spill] sm:$0xff] %v11286_v23  ;;  %v11294_v27 = vpop.f32.mrb[51].mxu0  ;;  %v1074_v26 = vadd.f32 1.0, %v11041_v41  ;;  %v956_v23 = vmul.f32 1.442695, %v11077_v59  ;;  %v10001_v24 = vpop.eup %10000  ;;  %10016 = vpow2.f32 %v1114_v17  ;;  %v11405_v49 = vadd.f32 1.0, %v11089_v2 }
 0x1f4   : > { %v9329_v22 = vpop.f32.mrb[54].mxu1  ;;  %9467 = vmatprep.subr.mxu1 %v12617_v37  ;;  %9454 = vmatprep.mubr.msk.f32.mxu0 %vm10459_vm0, %v12617_v37  ;;  %12628 = vst [vmem:[#allocation61_spill] sm:$0xff] %v11294_v27  ;;  %v916_v27 = vadd.f32 1.0, %v11053_v47  ;;  %v10003_v16 = vpop.eup %10002  ;;  %v1132_v61 = vmul.f32 1.442695, %v11145_v46 }
 0x1f5   : > { %v1394_v21 = vpop.f32.mrb[55].mxu1  ;;  %9460 = vmatmul.mubr.f32.vlgmr.msra.gmra.mrb[86].mxu1 %v9329_v22  ;;  %9462 = vmatprep.subr.mxu0 %v12617_v37  ;;  %10018 = vpow2.f32 %v956_v23  ;;  %v11343_v23 = vsel %vm1042_vm2, %v1074_v26, %v10001_v24  ;;  %v11358_v26 = vadd.f32 1.0, %v11073_v57  ;;  %v962_v24 = vmul.f32 1.442695, %v11101_v60 }
 0x1f6   : > { %9468 = vmatpush3.xpose.msra.mxu1 %v10987_v29  ;;  %9455 = vmatmul.mubr.f32.vlgmr.msra.gmra.mrb[86].mxu0 %v1394_v21  ;;  %v11310_v22 = vpop.f32.mrb[52].mxu0  ;;  %v958_v29 = vmul.f32 1.442695, %v11085_v63  ;;  %v10005_v11 = vpop.eup %10004  ;;  %10020 = vpow2.f32 %v1116_v25  ;;  %vm890_vm2 = vcmp.gt.f32.partialorder %v11101_v60, 0.0 }
 0x1f7   : > { %9463 = vmatpush3.xpose.msra.mxu0 %v10980_v28  ;;  %9469 = vmatprep.mubr.msk.f32.mxu1 %vm10459_vm0, %v12617_v37  ;;  %12629 = vst [vmem:[#allocation62_spill] sm:$0xff] %v11310_v22  ;;  %v11318_v28 = vpop.f32.mrb[53].mxu0  ;;  %v11323_v22 = vadd.f32 1.0, %v11061_v51  ;;  %v10007_v39 = vpop.eup %10006 }
 0x1f8   : > { %v9332_v21 = vpop.f32.mrb[56].mxu1  ;;  %9477 = vmatprep.subr.mxu1 %v12617_v37  ;;  %9464 = vmatprep.mubr.msk.f32.mxu0 %vm10459_vm0, %v12617_v37  ;;  %12630 = vst [vmem:[#allocation63_spill] sm:$0xff] %v11318_v28  ;;  %v11334_v28 = vsel %vm882_vm1, %v914_v15, %v9999_v38  ;;  %v11348_v38 = vadd.f32 1.0, %v11069_v55  ;;  %10022 = vpow2.f32 %v958_v29  ;;  %v1120_v15 = vmul.f32 1.442695, %v11097_v56  ;;  %v10009_v41 = vpop.eup %10008 }
 0x1f9   : > { %v1404_v17 = vpop.f32.mrb[57].mxu1  ;;  %9470 = vmatmul.mubr.f32.vlgmr.msra.gmra.mrb[88].mxu1 %v9332_v21  ;;  %9472 = vmatprep.subr.mxu0 %v12617_v37  ;;  %v960_v21 = vmul.f32 1.442695, %v11093_v4  ;;  %10024 = vpow2.f32 %v1118_v19  ;;  %v11364_v29 = vsel %vm883_vm3, %v915_v20, %v10003_v16  ;;  %v1171_v19 = vsel %vm1043_vm4, %v1075_v18, %v10005_v11 }
 0x1fa   : > { %9478 = vmatpush3.xpose.msra.mxu1 %v10997_v31  ;;  %9465 = vmatmul.mubr.f32.vlgmr.msra.gmra.mrb[88].mxu0 %v1404_v17  ;;  %v11345_v31 = vpop.f32.mrb[54].mxu0  ;;  %v11383_v16 = vsel %vm884_vm5, %v916_v27, %v10007_v39  ;;  %v964_v11 = vmul.f32 1.442695, %v11109_v1  ;;  %v11399_v20 = vadd.f32 1.0, %v11085_v63  ;;  %vm1049_vm1 = vcmp.gt.f32.partialorder %v11097_v56, 0.0 }
 0x1fb   : > { %9473 = vmatpush3.xpose.msra.mxu0 %v10990_v30  ;;  %9479 = vmatprep.mubr.msk.f32.mxu1 %vm10459_vm0, %v12617_v37  ;;  %12631 = vst [vmem:[#allocation64_spill] sm:$0xff] %v11345_v31  ;;  %v11355_v30 = vpop.f32.mrb[55].mxu0  ;;  %v11368_v31 = vadd.f32 1.0, %v11077_v59  ;;  %10026 = vpow2.f32 %v960_v21  ;;  %v1124_v21 = vmul.f32 1.442695, %v11113_v3  ;;  %vm1050_vm3 = vcmp.gt.f32.partialorder %v11105_v62, 0.0 }
 0x1fc   : > { %v9335_v25 = vpop.f32.mrb[58].mxu1  ;;  %9487 = vmatprep.subr.mxu1 %v12617_v37  ;;  %9474 = vmatprep.mubr.msk.f32.mxu0 %vm10459_vm0, %v12617_v37  ;;  %12632 = vst [vmem:[#allocation65_spill] sm:$0xff] %v11355_v30  ;;  %v1122_v30 = vmul.f32 1.442695, %v11105_v62  ;;  %10028 = vpow2.f32 %v1120_v15  ;;  %vm891_vm4 = vcmp.gt.f32.partialorder %v11109_v1, 0.0  ;;  %vm1051_vm5 = vcmp.gt.f32.partialorder %v11113_v3, 0.0 }
 0x1fd   : > { %v1414_v17 = vpop.f32.mrb[59].mxu1  ;;  %9480 = vmatmul.mubr.f32.vlgmr.msra.gmra.mrb[90].mxu1 %v9335_v25  ;;  %9482 = vmatprep.subr.mxu0 %v12617_v37  ;;  %v10011_v25 = vpop.eup %10010  ;;  %10030 = vpow2.f32 %v962_v24  ;;  %v11416_v24 = vadd.f32 1.0, %v11093_v4  ;;  %v1084_v63 = vadd.f32 1.0, %v11121_v58  ;;  %v976_v4 = vmul.f32 1.442695, %v11157_v10 }
 0x1fe   : > { %9488 = vmatpush3.xpose.msra.mxu1 %v11007_v33  ;;  %9475 = vmatmul.mubr.f32.vlgmr.msra.gmra.mrb[90].mxu0 %v1414_v17  ;;  %v11385_v33 = vpop.f32.mrb[56].mxu0  ;;  %v10013_v45 = vpop.eup %10012  ;;  %10032 = vpow2.f32 %v1122_v30  ;;  %v1126_v17 = vmul.f32 1.442695, %v11121_v58 }
 0x1ff   : > { %9483 = vmatpush3.xpose.msra.mxu0 %v11000_v32  ;;  %9489 = vmatprep.mubr.msk.f32.mxu1 %vm10459_vm0, %v12617_v37  ;;  %v11394_v32 = vsel %vm1044_vm6, %v1076_v54, %v10009_v41  ;;  %v11396_v47 = vpop.f32.mrb[57].mxu0  ;;  %v10015_v27 = vpop.eup %10014  ;;  %v966_v54 = vmul.f32 1.442695, %v11117_v0  ;;  %v11412_v41 = vsel %vm885_vm7, %v11323_v22, %v10011_v25  ;;  %v11429_v22 = vadd.f32 1.0, %v11097_v56 }
 0x200   : > { %v9338_v18 = vpop.f32.mrb[60].mxu1  ;;  %9497 = vmatprep.subr.mxu1 %v12617_v37  ;;  %9484 = vmatprep.mubr.msk.f32.mxu0 %vm10459_vm0, %v12617_v37  ;;  %v10017_v15 = vpop.eup %10016  ;;  %10034 = vpow2.f32 %v964_v11  ;;  %vm892_vm6 = vcmp.gt.f32.partialorder %v11117_v0, 0.0  ;;  %vm1052_vm7 = vcmp.gt.f32.partialorder %v11121_v58, 0.0 }
 0x201   : > { %v1424_v39 = vpop.f32.mrb[61].mxu1  ;;  %9490 = vmatmul.mubr.f32.vlgmr.msra.gmra.mrb[92].mxu1 %v9338_v18  ;;  %9492 = vmatprep.subr.mxu0 %v12617_v37  ;;  %v10019_v51 = vpop.eup %10018  ;;  %10036 = vpow2.f32 %v1124_v21  ;;  %v11447_v18 = vsel %vm1046_vm10, %v11358_v26, %v10017_v15 }
 0x202   : > { %9498 = vmatpush3.xpose.msra.mxu1 %v11017_v35  ;;  %9485 = vmatmul.mubr.f32.vlgmr.msra.gmra.mrb[92].mxu0 %v1424_v39  ;;  %v1173_v35 = vsel %vm1045_vm8, %v11329_v14, %v10013_v45  ;;  %v11425_v30 = vpop.f32.mrb[58].mxu0  ;;  %v10021_v14 = vpop.eup %10020  ;;  %v968_v45 = vmul.f32 1.442695, %v11125_v52  ;;  %10038 = vpow2.f32 %v966_v54  ;;  %v11464_v26 = vsel %vm887_vm11, %v11368_v31, %v10019_v51 }
 0x203   : > { %9493 = vmatpush3.xpose.msra.mxu0 %v11010_v34  ;;  %9499 = vmatprep.mubr.msk.f32.mxu1 %vm10459_vm0, %v12617_v37  ;;  %12633 = vst [vmem:[#allocation66_spill] sm:$0xff] %v11425_v30  ;;  %v11437_v34 = vsel %vm886_vm9, %v11348_v38, %v10015_v27  ;;  %v11439_v53 = vpop.f32.mrb[59].mxu0  ;;  %v10023_v55 = vpop.eup %10022  ;;  %v11450_v38 = vadd.f32 1.0, %v11101_v60  ;;  %v12634_v27 = vld [vmem:[#allocation43_spill] sm:$0xff]  ;;  %10040 = vpow2.f32 %v1126_v17  ;;  %v12635_v30 = vld [vmem:[#allocation45_spill] sm:$0xff]  ;;  %v1175_v59 = vsel %vm1047_vm12, %v11376_v43, %v10021_v14 }
 0x204   : > { %v9341_v25 = vpop.f32.mrb[62].mxu1  ;;  %9507 = vmatprep.subr.mxu1 %v12617_v37  ;;  %9494 = vmatprep.mubr.msk.f32.mxu0 %vm10459_vm0, %v12617_v37  ;;  %v1128_v21 = vmul.f32 1.442695, %v12634_v27  ;;  %v10025_v39 = vpop.eup %10024  ;;  %v970_v57 = vmul.f32 1.442695, %v12635_v30  ;;  %v11483_v17 = vadd.f32 1.0, %v11113_v3  ;;  %10042 = vpow2.f32 %v968_v45 }
 0x205   : > { %v1434_v11 = vpop.f32.mrb[63].mxu1  ;;  %9500 = vmatmul.mubr.f32.vlgmr.msra.gmra.mrb[94].mxu1 %v9341_v25  ;;  %9502 = vmatprep.subr.mxu0 %v12617_v37  ;;  %v11455_v25 = vadd.f32 1.0, %v11105_v62  ;;  %v1130_v54 = vmul.f32 1.442695, %v11137_v50  ;;  %v10027_v31 = vpop.eup %10026  ;;  %v972_v51 = vmul.f32 1.442695, %v11141_v44  ;;  %v1176_v43 = vsel %vm1048_vm14, %v11405_v49, %v10025_v39 }
 0x206   : > { %9508 = vmatpush3.xpose.msra.mxu1 %v1171_v19  ;;  %9495 = vmatmul.mubr.f32.vlgmr.msra.gmra.mrb[94].mxu0 %v1434_v11  ;;  %v11466_v15 = vpop.f32.mrb[60].mxu0  ;;  %v11470_v19 = vadd.f32 1.0, %v11109_v1  ;;  %v10029_v11 = vpop.eup %10028  ;;  %10044 = vpow2.f32 %v1128_v21  ;;  %v11496_v14 = vsel %vm888_vm13, %v11399_v20, %v10023_v55  ;;  %v974_v20 = vmul.f32 1.442695, %v11149_v40 }
 0x207   : > { %9503 = vmatpush3.xpose.msra.mxu0 %v11343_v23  ;;  %9509 = vmatprep.mubr.msk.f32.mxu1 %vm10459_vm0, %v12617_v37  ;;  %v11479_v23 = vpop.f32.mrb[61].mxu0  ;;  %v10031_v45 = vpop.eup %10030  ;;  %10046 = vpow2.f32 %v970_v57  ;;  %vm893_vm8 = vcmp.gt.f32.partialorder %v11125_v52, 0.0  ;;  %v1177_v21 = vsel %vm1049_vm1, %v11429_v22, %v10029_v11  ;;  %v925_v57 = vadd.f32 1.0, %v11125_v52 }
 0x208   : > { %9517 = vmatprep.subr.mxu1 %v12617_v37  ;;  %9504 = vmatprep.mubr.msk.f32.mxu0 %vm10459_vm0, %v12617_v37  ;;  %10048 = vpow2.f32 %v1130_v54  ;;  %vm1053_vm9 = vcmp.gt.f32.partialorder %v12634_v27, 0.0  ;;  %v1136_v54 = vmul.f32 1.442695, %v11162_v36  ;;  %v11540_v22 = vsel %vm890_vm2, %v11450_v38, %v10031_v45 }
 0x209   : > { %9510 = vmatmul.mubr.f32.vlgmr.msra.gmra.mrb[96].mxu1 %v11364_v29  ;;  %9512 = vmatprep.subr.mxu0 %v12617_v37  ;;  %v11500_v29 = vadd.f32 1.0, %v11117_v0  ;;  %10050 = vpow2.f32 %v972_v51  ;;  %vm894_vm10 = vcmp.gt.f32.partialorder %v12635_v30, 0.0  ;;  %vm1054_vm11 = vcmp.gt.f32.partialorder %v11137_v50, 0.0 }
 0x20a   : > { %9518 = vmatpush3.xpose.msra.mxu1 %v1173_v35  ;;  %9505 = vmatmul.mubr.f32.vlgmr.msra.gmra.mrb[96].mxu0 %v11334_v28  ;;  %v11506_v2 = vpop.f32.mrb[62].mxu0  ;;  %v10033_v28 = vpop.eup %10032  ;;  %v12636_v35 = vld [vmem:[#allocation50_spill] sm:$0xff]  ;;  %10052 = vpow2.f32 %v1132_v61  ;;  %v978_v60 = vmul.f32 1.442695, %v11169_v5  ;;  %vm895_vm12 = vcmp.gt.f32.partialorder %v11141_v44, 0.0  ;;  %vm1055_vm13 = vcmp.gt.f32.partialorder %v11145_v46, 0.0 }
 0x20b   : > { %9513 = vmatpush3.xpose.msra.mxu0 %v11394_v32  ;;  %9519 = vmatprep.mubr.msk.f32.mxu1 %vm10459_vm0, %v12617_v37  ;;  %v1017_v32 = vsel %vm889_vm15, %v11416_v24, %v10027_v31  ;;  %v11516_v49 = vpop.f32.mrb[63].mxu0  ;;  %v1134_v55 = vmul.f32 1.442695, %v12636_v35  ;;  %v10035_v39 = vpop.eup %10034  ;;  %v1178_v56 = vsel %vm1050_vm3, %v11455_v25, %v10033_v28  ;;  %10054 = vpow2.f32 %v974_v20 }
 0x20c   : > { %9527 = vmatprep.subr.mxu1 %v12617_v37  ;;  %9514 = vmatprep.mubr.msk.f32.mxu0 %vm10459_vm0, %v12617_v37  ;;  %v10037_v24 = vpop.eup %10036  ;;  %v1019_v38 = vsel %vm891_vm4, %v11470_v19, %v10035_v39  ;;  %v1138_v25 = vmul.f32 1.442695, %v11174_v48  ;;  %v1087_v1 = vadd.f32 1.0, %v11145_v46  ;;  %vm896_vm14 = vcmp.gt.f32.partialorder %v11149_v40, 0.0  ;;  %v12637_v46 = vld [vmem:[#allocation52_spill] sm:$0xff] }
 0x20d   : > { %9520 = vmatmul.mubr.f32.vlgmr.msra.gmra.mrb[98].mxu1 %v11412_v41  ;;  %9522 = vmatprep.subr.mxu0 %v12617_v37  ;;  %v1085_v41 = vadd.f32 1.0, %v12634_v27  ;;  %10056 = vpow2.f32 %v1134_v55  ;;  %v1179_v31 = vsel %vm1051_vm5, %v11483_v17, %v10037_v24  ;;  %v928_v61 = vadd.f32 1.0, %v11149_v40  ;;  %v12639_v40 = vld [vmem:[#allocation53_spill] sm:$0xff] }
 0x20e   : > { %9528 = vmatpush3.xpose.msra.mxu1 %v1175_v59  ;;  %9515 = vmatmul.mubr.f32.vlgmr.msra.gmra.mrb[98].mxu0 %v11383_v16  ;;  %v10039_v16 = vpop.eup %10038  ;;  %v11544_v59 = vadd.f32 1.0, %v12635_v30  ;;  %10058 = vpow2.f32 %v976_v4  ;;  %vm1056_vm15 = vcmp.gt.f32.partialorder %v12636_v35, 0.0  ;;  %v1088_v58 = vadd.f32 1.0, %v12636_v35 }
 0x20f   : > { %9523 = vmatpush3.xpose.msra.mxu0 %v11447_v18  ;;  %9529 = vmatprep.mubr.msk.f32.mxu1 %vm10459_vm0, %v12617_v37  ;;  %v10041_v62 = vpop.eup %10040  ;;  %v1086_v18 = vadd.f32 1.0, %v11137_v50  ;;  %10060 = vpow2.f32 %v1136_v54  ;;  %v11578_v17 = vsel %vm892_vm6, %v11500_v29, %v10039_v16  ;;  %v982_v28 = vmul.f32 1.442695, %v11193_v9 }
 0x210   : > { %9537 = vmatprep.subr.mxu1 %v12617_v37  ;;  %9524 = vmatprep.mubr.msk.f32.mxu0 %vm10459_vm0, %v12617_v37  ;;  %v10043_v51 = vpop.eup %10042  ;;  %v1180_v3 = vsel %vm1052_vm7, %v1084_v63, %v10041_v62  ;;  %10062 = vpow2.f32 %v978_v60  ;;  %vm897_vm1 = vcmp.gt.f32.partialorder %v11157_v10, 0.0  ;;  %v11591_v63 = vadd.f32 1.0, %v11157_v10  ;;  %v12638_v60 = vld [vmem:[#allocation51_spill] sm:$0xff] }
 0x211   : > { %9530 = vmatmul.mubr.f32.vlgmr.msra.gmra.mrb[100].mxu1 %v11464_v26  ;;  %9532 = vmatprep.subr.mxu0 %v12617_v37  ;;  %v927_v26 = vadd.f32 1.0, %v11141_v44  ;;  %v10045_v19 = vpop.eup %10044  ;;  %10064 = vpow2.f32 %v1138_v25  ;;  %v1021_v0 = vsel %vm893_vm8, %v925_v57, %v10043_v51  ;;  %v1142_v20 = vmul.f32 1.442695, %v11198_v6 }
 0x212   : > { %9538 = vmatpush3.xpose.msra.mxu1 %v1177_v21  ;;  %9525 = vmatmul.mubr.f32.vlgmr.msra.gmra.mrb[100].mxu0 %v11437_v34  ;;  %v1140_v34 = vmul.f32 1.442695, %v11186_v42  ;;  %v10047_v11 = vpop.eup %10046  ;;  %vm1057_vm2 = vcmp.gt.f32.partialorder %v11162_v36, 0.0  ;;  %v1089_v52 = vadd.f32 1.0, %v11162_v36  ;;  %vm898_vm3 = vcmp.gt.f32.partialorder %v11169_v5, 0.0 }
 0x213   : > { %9533 = vmatpush3.xpose.msra.mxu0 %v1176_v43  ;;  %9539 = vmatprep.mubr.msk.f32.mxu1 %vm10459_vm0, %v12617_v37  ;;  %v980_v43 = vmul.f32 1.442695, %v11181_v7  ;;  %v10049_v45 = vpop.eup %10048  ;;  %v1022_v21 = vsel %vm894_vm10, %v11544_v59, %v10047_v11  ;;  %v11612_v57 = vadd.f32 1.0, %v11169_v5  ;;  %vm1058_vm4 = vcmp.gt.f32.partialorder %v11174_v48, 0.0  ;;  %v12641_v11 = vld [vmem:[#allocation55_spill] sm:$0xff] }
 0x214   : > { %9547 = vmatprep.subr.mxu1 %v12617_v37  ;;  %9534 = vmatprep.mubr.msk.f32.mxu0 %vm10459_vm0, %v12617_v37  ;;  %v10051_v29 = vpop.eup %10050  ;;  %10066 = vpow2.f32 %v1140_v34  ;;  %v1182_v27 = vsel %vm1054_vm11, %v1086_v18, %v10049_v45  ;;  %v11616_v4 = vadd.f32 1.0, %v11174_v48  ;;  %v984_v50 = vmul.f32 1.442695, %v11205_v12  ;;  %v12642_v45 = vld [vmem:[#allocation54_spill] sm:$0xff] }
 0x215   : > { %9540 = vmatmul.mubr.f32.vlgmr.msra.gmra.mrb[102].mxu1 %v1017_v32  ;;  %9542 = vmatprep.subr.mxu0 %v12617_v37  ;;  %v1181_v32 = vsel %vm1053_vm9, %v1085_v41, %v10045_v19  ;;  %v10053_v55 = vpop.eup %10052  ;;  %10068 = vpow2.f32 %v980_v43  ;;  %v1023_v41 = vsel %vm895_vm12, %v927_v26, %v10051_v29  ;;  %vm899_vm5 = vcmp.gt.f32.partialorder %v11181_v7, 0.0  ;;  %v12640_v19 = vld [vmem:[#allocation57_spill] sm:$0xff] }
 0x216   : > { %9548 = vmatpush3.xpose.msra.mxu1 %v1179_v31  ;;  %9535 = vmatmul.mubr.f32.vlgmr.msra.gmra.mrb[102].mxu0 %v11496_v14  ;;  %v1144_v14 = vmul.f32 1.442695, %v11210_v8  ;;  %v10055_v39 = vpop.eup %10054  ;;  %10070 = vpow2.f32 %v982_v28  ;;  %v1183_v30 = vsel %vm1055_vm13, %v1087_v1, %v10053_v55  ;;  %vm1059_vm6 = vcmp.gt.f32.partialorder %v11186_v42, 0.0  ;;  %v12643_v28 = vld [vmem:[#allocation56_spill] sm:$0xff]  ;;  %v12644_v55 = vld [vmem:[#allocation61_spill] sm:$0xff] }
 0x217   : > { %9543 = vmatpush3.xpose.msra.mxu0 %v1178_v56  ;;  %9549 = vmatprep.mubr.msk.f32.mxu1 %vm10459_vm0, %v12617_v37  ;;  %v10057_v24 = vpop.eup %10056  ;;  %10072 = vpow2.f32 %v1142_v20  ;;  %v11628_v56 = vadd.f32 1.0, %v11181_v7  ;;  %v1091_v44 = vadd.f32 1.0, %v11186_v42  ;;  %v1146_v59 = vmul.f32 1.442695, %v12637_v46  ;;  %v12647_v42 = vld [vmem:[#allocation60_spill] sm:$0xff] }
 0x218   : > { %9557 = vmatprep.subr.mxu1 %v12617_v37  ;;  %9544 = vmatprep.mubr.msk.f32.mxu0 %vm10459_vm0, %v12617_v37  ;;  %v10059_v54 = vpop.eup %10058  ;;  %10074 = vpow2.f32 %v1144_v14  ;;  %v1024_v62 = vsel %vm896_vm14, %v928_v61, %v10055_v39  ;;  %vm900_vm7 = vcmp.gt.f32.partialorder %v11193_v9, 0.0  ;;  %v11642_v18 = vadd.f32 1.0, %v11193_v9  ;;  %v12645_v14 = vld [vmem:[#allocation59_spill] sm:$0xff] }
 0x219   : > { %9550 = vmatmul.mubr.f32.vlgmr.msra.gmra.mrb[104].mxu1 %v1019_v38  ;;  %9552 = vmatprep.subr.mxu0 %v12617_v37  ;;  %v10061_v16 = vpop.eup %10060  ;;  %v986_v38 = vmul.f32 1.442695, %v12638_v60  ;;  %v1184_v25 = vsel %vm1056_vm15, %v1088_v58, %v10057_v24  ;;  %vm1060_vm8 = vcmp.gt.f32.partialorder %v11198_v6, 0.0  ;;  %v11650_v51 = vadd.f32 1.0, %v11198_v6 }
 0x21a   : > { %9558 = vmatpush3.xpose.msra.mxu1 %v1181_v32  ;;  %9545 = vmatmul.mubr.f32.vlgmr.msra.gmra.mrb[104].mxu0 %v11540_v22  ;;  %v1148_v22 = vmul.f32 1.442695, %v11234_v13  ;;  %v10063_v31 = vpop.eup %10062  ;;  %10076 = vpow2.f32 %v984_v50  ;;  %v988_v26 = vmul.f32 1.442695, %v12639_v40  ;;  %v1152_v34 = vmul.f32 1.442695, %v12640_v19 }
 0x21b   : > { %9553 = vmatpush3.xpose.msra.mxu0 %v1180_v3  ;;  %9559 = vmatprep.mubr.msk.f32.mxu1 %vm10459_vm0, %v12617_v37  ;;  %v10065_v1 = vpop.eup %10064  ;;  %v1185_v35 = vsel %vm1057_vm2, %v1089_v52, %v10061_v16  ;;  %v1025_v3 = vsel %vm897_vm1, %v11591_v63, %v10059_v54  ;;  %vm901_vm9 = vcmp.gt.f32.partialorder %v11205_v12, 0.0  ;;  %v1150_v61 = vmul.f32 1.442695, %v12641_v11  ;;  %v12648_v54 = vld [vmem:[#allocation65_spill] sm:$0xff]  ;;  %v12649_v16 = vld [vmem:[#allocation63_spill] sm:$0xff] }
 0x21c   : > { %9567 = vmatprep.subr.mxu1 %v12617_v37  ;;  %9554 = vmatprep.mubr.msk.f32.mxu0 %vm10459_vm0, %v12617_v37  ;;  %10078 = vpow2.f32 %v1148_v22  ;;  %vm1061_vm10 = vcmp.gt.f32.partialorder %v11210_v8, 0.0  ;;  %v1093_v36 = vadd.f32 1.0, %v11210_v8  ;;  %v990_v10 = vmul.f32 1.442695, %v12642_v45 }
 0x21d   : > { %9560 = vmatmul.mubr.f32.vlgmr.msra.gmra.mrb[106].mxu1 %v1021_v0  ;;  %9562 = vmatprep.subr.mxu0 %v12617_v37  ;;  %10080 = vpow2.f32 %v1146_v59  ;;  %v992_v0 = vmul.f32 1.442695, %v12643_v28  ;;  %v1186_v29 = vsel %vm1058_vm4, %v11616_v4, %v10065_v1  ;;  %v1026_v63 = vsel %vm898_vm3, %v11612_v57, %v10063_v31  ;;  %v12646_v57 = vld [vmem:[#allocation58_spill] sm:$0xff] }
 0x21e   : > { %9568 = vmatpush3.xpose.msra.mxu1 %v1183_v30  ;;  %9555 = vmatmul.mubr.f32.vlgmr.msra.gmra.mrb[106].mxu0 %v11578_v17  ;;  %v11666_v17 = vadd.f32 1.0, %v11205_v12  ;;  %v10067_v43 = vpop.eup %10066  ;;  %10082 = vpow2.f32 %v986_v38  ;;  %vm902_vm11 = vcmp.gt.f32.partialorder %v12638_v60, 0.0  ;;  %v11684_v32 = vadd.f32 1.0, %v12638_v60 }
 0x21f   : > { %9563 = vmatpush3.xpose.msra.mxu0 %v1182_v27  ;;  %9569 = vmatprep.mubr.msk.f32.mxu1 %vm10459_vm0, %v12617_v37  ;;  %v10069_v58 = vpop.eup %10068  ;;  %10084 = vpow2.f32 %v988_v26  ;;  %vm1062_vm12 = vcmp.gt.f32.partialorder %v12637_v46, 0.0  ;;  %v1156_v52 = vmul.f32 1.442695, %v12644_v55  ;;  %v11692_v5 = vadd.f32 1.0, %v12637_v46  ;;  %v12651_v26 = vld [vmem:[#allocation64_spill] sm:$0xff] }
 0x220   : > { %9577 = vmatprep.subr.mxu1 %v12617_v37  ;;  %9564 = vmatprep.mubr.msk.f32.mxu0 %vm10459_vm0, %v12617_v37  ;;  %v10071_v20 = vpop.eup %10070  ;;  %10086 = vpow2.f32 %v1152_v34  ;;  %v1154_v27 = vmul.f32 1.442695, %v12645_v14  ;;  %vm903_vm13 = vcmp.gt.f32.partialorder %v12639_v40, 0.0  ;;  %v994_v4 = vmul.f32 1.442695, %v12646_v57 }
 0x221   : > { %9570 = vmatmul.mubr.f32.vlgmr.msra.gmra.mrb[108].mxu1 %v1023_v41  ;;  %9572 = vmatprep.subr.mxu0 %v12617_v37  ;;  %v10073_v48 = vpop.eup %10072  ;;  %10088 = vpow2.f32 %v1150_v61  ;;  %v1027_v24 = vsel %vm899_vm5, %v11628_v56, %v10069_v58  ;;  %v11704_v50 = vadd.f32 1.0, %v12639_v40  ;;  %vm1063_vm14 = vcmp.gt.f32.partialorder %v11234_v13, 0.0 }
 0x222   : > { %9578 = vmatpush3.xpose.msra.mxu1 %v1185_v35  ;;  %9565 = vmatmul.mubr.f32.vlgmr.msra.gmra.mrb[108].mxu0 %v1022_v21  ;;  %v1187_v21 = vsel %vm1059_vm6, %v1091_v44, %v10067_v43  ;;  %v10075_v39 = vpop.eup %10074  ;;  %10090 = vpow2.f32 %v990_v10  ;;  %v996_v30 = vmul.f32 1.442695, %v12647_v42  ;;  %v1095_v41 = vadd.f32 1.0, %v11234_v13 }
 0x223   : > { %9573 = vmatpush3.xpose.msra.mxu0 %v1184_v25  ;;  %9579 = vmatprep.mubr.msk.f32.mxu1 %vm10459_vm0, %v12617_v37  ;;  %10092 = vpow2.f32 %v992_v0  ;;  %v1160_v22 = vmul.f32 1.442695, %v12648_v54  ;;  %v1028_v7 = vsel %vm900_vm7, %v11642_v18, %v10071_v20  ;;  %v1158_v44 = vmul.f32 1.442695, %v12649_v16  ;;  %v12650_v18 = vld [vmem:[#allocation62_spill] sm:$0xff] }
 0x224   : > { %9587 = vmatprep.subr.mxu1 %v12617_v37  ;;  %9574 = vmatprep.mubr.msk.f32.mxu0 %vm10459_vm0, %v12617_v37  ;;  %10094 = vpow2.f32 %v1156_v52  ;;  %v10077_v56 = vpop.eup %10076  ;;  %v1189_v59 = vsel %vm1061_vm10, %v1093_v36, %v10075_v39  ;;  %vm904_vm15 = vcmp.gt.f32.partialorder %v12642_v45, 0.0  ;;  %v11727_v9 = vadd.f32 1.0, %v12642_v45  ;;  %v12652_v0 = vld [vmem:[#allocation66_spill] sm:$0xff] }
 0x225   : > { %9580 = vmatmul.mubr.f32.vlgmr.msra.gmra.mrb[110].mxu1 %v1025_v3  ;;  %9582 = vmatprep.subr.mxu0 %v12617_v37  ;;  %10096 = vpow2.f32 %v1154_v27  ;;  %v998_v25 = vmul.f32 1.442695, %v12650_v18  ;;  %vm1064_vm1 = vcmp.gt.f32.partialorder %v12641_v11, 0.0  ;;  %v1096_v8 = vadd.f32 1.0, %v12641_v11 }
 0x226   : > { %9588 = vmatpush3.xpose.msra.mxu1 %v1187_v21  ;;  %9575 = vmatmul.mubr.f32.vlgmr.msra.gmra.mrb[110].mxu0 %v1024_v62  ;;  %v1188_v62 = vsel %vm1060_vm8, %v11650_v51, %v10073_v48  ;;  %v10079_v38 = vpop.eup %10078  ;;  %10098 = vpow2.f32 %v994_v4  ;;  %v1000_v6 = vmul.f32 1.442695, %v12651_v26  ;;  %vm905_vm2 = vcmp.gt.f32.partialorder %v12643_v28, 0.0 }
 0x227   : > { %9583 = vmatpush3.xpose.msra.mxu0 %v1186_v29  ;;  %9589 = vmatprep.mubr.msk.f32.mxu1 %vm10459_vm0, %v12617_v37  ;;  %v10081_v31 = vpop.eup %10080  ;;  %10100 = vpow2.f32 %v996_v30  ;;  %v1164_v1 = vmul.f32 1.442695, %v11439_v53  ;;  %v1029_v34 = vsel %vm901_vm9, %v11666_v17, %v10077_v56  ;;  %v1097_v3 = vadd.f32 1.0, %v12640_v19 }
 0x228   : > { %9597 = vmatprep.subr.mxu1 %v12617_v37  ;;  %9584 = vmatprep.mubr.msk.f32.mxu0 %vm10459_vm0, %v12617_v37  ;;  %v10083_v51 = vpop.eup %10082  ;;  %10102 = vpow2.f32 %v1160_v22  ;;  %v1162_v61 = vmul.f32 1.442695, %v11396_v47  ;;  %v1191_v43 = vsel %vm1063_vm14, %v1095_v41, %v10079_v38  ;;  %vm1065_vm3 = vcmp.gt.f32.partialorder %v12640_v19, 0.0 }
 0x229   : > { %9590 = vmatmul.mubr.f32.vlgmr.msra.gmra.mrb[112].mxu1 %v1027_v24  ;;  %9592 = vmatprep.subr.mxu0 %v12617_v37  ;;  %v10085_v35 = vpop.eup %10084  ;;  %10104 = vpow2.f32 %v1158_v44  ;;  %v1002_v10 = vmul.f32 1.442695, %v11385_v33  ;;  %v1190_v12 = vsel %vm1062_vm12, %v11692_v5, %v10081_v31  ;;  %v937_v58 = vadd.f32 1.0, %v12643_v28 }
 0x22a   : > { %9598 = vmatpush3.xpose.msra.mxu1 %v1189_v59  ;;  %9585 = vmatmul.mubr.f32.vlgmr.msra.gmra.mrb[112].mxu0 %v1026_v63  ;;  %v10087_v36 = vpop.eup %10086  ;;  %10106 = vpow2.f32 %v998_v25  ;;  %v1004_v29 = vmul.f32 1.442695, %v12652_v0  ;;  %v1030_v13 = vsel %vm902_vm11, %v11684_v32, %v10083_v51  ;;  %v11761_v20 = vadd.f32 1.0, %v12646_v57 }
 0x22b   : > { %9593 = vmatpush3.xpose.msra.mxu0 %v1188_v62  ;;  %9599 = vmatprep.mubr.msk.f32.mxu1 %vm10459_vm0, %v12617_v37  ;;  %v10089_v17 = vpop.eup %10088  ;;  %10108 = vpow2.f32 %v1000_v6  ;;  %v1168_v46 = vmul.f32 1.442695, %v11516_v49  ;;  %v1031_v52 = vsel %vm903_vm13, %v11704_v50, %v10085_v35  ;;  %v1099_v60 = vadd.f32 1.0, %v12644_v55 }
 0x22c   : > { %9607 = vmatprep.subr.mxu1 %v12617_v37  ;;  %9594 = vmatprep.mubr.msk.f32.mxu0 %vm10459_vm0, %v12617_v37  ;;  %v10091_v63 = vpop.eup %10090  ;;  %10110 = vpow2.f32 %v1164_v1  ;;  %v1166_v32 = vmul.f32 1.442695, %v11479_v23  ;;  %v1193_v5 = vsel %vm1065_vm3, %v1097_v3, %v10087_v36  ;;  %v1098_v21 = vadd.f32 1.0, %v12645_v14 }
 0x22d   : > { %9600 = vmatmul.mubr.f32.vlgmr.msra.gmra.mrb[114].mxu1 %v1029_v34  ;;  %9602 = vmatprep.subr.mxu0 %v12617_v37  ;;  %v10093_v48 = vpop.eup %10092  ;;  %10112 = vpow2.f32 %v1162_v61  ;;  %vm1067_vm4 = vcmp.gt.f32.partialorder %v12644_v55, 0.0  ;;  %v1192_v40 = vsel %vm1064_vm1, %v1096_v8, %v10089_v17  ;;  %vm1066_vm5 = vcmp.gt.f32.partialorder %v12645_v14, 0.0 }
 0x22e   : > { %9608 = vmatpush3.xpose.msra.mxu1 %v1191_v43  ;;  %9595 = vmatmul.mubr.f32.vlgmr.msra.gmra.mrb[114].mxu0 %v1028_v7  ;;  %v10095_v27 = vpop.eup %10094  ;;  %10114 = vpow2.f32 %v1002_v10  ;;  %vm907_vm6 = vcmp.gt.f32.partialorder %v12647_v42, 0.0  ;;  %v1008_v19 = vmul.f32 1.442695, %v11506_v2  ;;  %v939_v24 = vadd.f32 1.0, %v12647_v42 }
 0x22f   : > { %9603 = vmatpush3.xpose.msra.mxu0 %v1190_v12  ;;  %9609 = vmatprep.mubr.msk.f32.mxu1 %vm10459_vm0, %v12617_v37  ;;  %v10097_v39 = vpop.eup %10096  ;;  %10116 = vpow2.f32 %v1004_v29  ;;  %v1006_v50 = vmul.f32 1.442695, %v11466_v15  ;;  %v1033_v11 = vsel %vm905_vm2, %v937_v58, %v10093_v48  ;;  %v1101_v41 = vadd.f32 1.0, %v12648_v54 }
 0x230   : > { %9617 = vmatprep.subr.mxu1 %v12617_v37  ;;  %9604 = vmatprep.mubr.msk.f32.mxu0 %vm10459_vm0, %v12617_v37  ;;  %v10099_v4 = vpop.eup %10098  ;;  %10118 = vpow2.f32 %v1168_v46  ;;  %v1195_v22 = vsel %vm1067_vm4, %v1099_v60, %v10095_v27  ;;  %v1032_v7 = vsel %vm904_vm15, %v11727_v9, %v10091_v63  ;;  %vm906_vm7 = vcmp.gt.f32.partialorder %v12646_v57, 0.0 }
 0x231   : > { %9610 = vmatmul.mubr.f32.vlgmr.msra.gmra.mrb[116].mxu1 %v1031_v52  ;;  %9612 = vmatprep.subr.mxu0 %v12617_v37  ;;  %v10101_v30 = vpop.eup %10100  ;;  %10120 = vpow2.f32 %v1166_v32  ;;  %v1100_v28 = vadd.f32 1.0, %v12649_v16  ;;  %vm1069_vm8 = vcmp.gt.f32.partialorder %v12648_v54, 0.0  ;;  %v1194_v44 = vsel %vm1066_vm5, %v1098_v21, %v10097_v39 }
 0x232   : > { %9618 = vmatpush3.xpose.msra.mxu1 %v1193_v5  ;;  %9605 = vmatmul.mubr.f32.vlgmr.msra.gmra.mrb[116].mxu0 %v1030_v13  ;;  %v10103_v56 = vpop.eup %10102  ;;  %vm1068_vm9 = vcmp.gt.f32.partialorder %v12649_v16, 0.0  ;;  %10122 = vpow2.f32 %v1008_v19  ;;  %v940_v55 = vadd.f32 1.0, %v12650_v18  ;;  %v941_v62 = vadd.f32 1.0, %v12651_v26 }
 0x233   : > { %9613 = vmatpush3.xpose.msra.mxu0 %v1192_v40  ;;  %9619 = vmatprep.mubr.msk.f32.mxu1 %vm10459_vm0, %v12617_v37  ;;  %v10105_v59 = vpop.eup %10104  ;;  %10124 = vpow2.f32 %v1006_v50  ;;  %v1035_v14 = vsel %vm907_vm6, %v939_v24, %v10101_v30  ;;  %vm909_vm10 = vcmp.gt.f32.partialorder %v12651_v26, 0.0  ;;  %v1103_v9 = vadd.f32 1.0, %v11439_v53 }
 0x234   : > { %9627 = vmatprep.subr.mxu1 %v12617_v37  ;;  %9614 = vmatprep.mubr.msk.f32.mxu0 %vm10459_vm0, %v12617_v37  ;;  %v10107_v45 = vpop.eup %10106  ;;  %v1197_v25 = vsel %vm1069_vm8, %v1101_v41, %v10103_v56  ;;  %v1034_v31 = vsel %vm906_vm7, %v11761_v20, %v10099_v4  ;;  %vm908_vm11 = vcmp.gt.f32.partialorder %v12650_v18, 0.0  ;;  %v1102_v42 = vadd.f32 1.0, %v11396_v47 }
 0x235   : > { %9620 = vmatmul.mubr.f32.vlgmr.msra.gmra.mrb[118].mxu1 %v1033_v11  ;;  %9622 = vmatprep.subr.mxu0 %v12617_v37  ;;  %v10109_v38 = vpop.eup %10108  ;;  %vm1071_vm12 = vcmp.gt.f32.partialorder %v11439_v53, 0.0  ;;  %v1196_v6 = vsel %vm1068_vm9, %v1100_v28, %v10105_v59  ;;  %vm1070_vm13 = vcmp.gt.f32.partialorder %v11396_v47, 0.0  ;;  %v942_v54 = vadd.f32 1.0, %v11385_v33 }
 0x236   : > { %9628 = vmatpush3.xpose.msra.mxu1 %v1195_v22  ;;  %9615 = vmatmul.mubr.f32.vlgmr.msra.gmra.mrb[118].mxu0 %v1032_v7  ;;  %v10111_v8 = vpop.eup %10110  ;;  %v943_v1 = vadd.f32 1.0, %v12652_v0  ;;  %v1037_v16 = vsel %vm909_vm10, %v941_v62, %v10109_v38  ;;  %vm911_vm14 = vcmp.gt.f32.partialorder %v12652_v0, 0.0  ;;  %v1105_v35 = vadd.f32 1.0, %v11516_v49 }
 0x237   : > { %9623 = vmatpush3.xpose.msra.mxu0 %v1194_v44  ;;  %9629 = vmatprep.mubr.msk.f32.mxu1 %vm10459_vm0, %v12617_v37  ;;  %v10113_v51 = vpop.eup %10112  ;;  %v1199_v3 = vsel %vm1071_vm12, %v1103_v9, %v10111_v8  ;;  %v1036_v61 = vsel %vm908_vm11, %v940_v55, %v10107_v45  ;;  %vm910_vm15 = vcmp.gt.f32.partialorder %v11385_v33, 0.0  ;;  %v1104_v26 = vadd.f32 1.0, %v11479_v23 }
 0x238   : > { %9637 = vmatprep.subr.mxu1 %v12617_v37  ;;  %9624 = vmatprep.mubr.msk.f32.mxu0 %vm10459_vm0, %v12617_v37  ;;  %v10115_v57 = vpop.eup %10114  ;;  %vm1073_vm1 = vcmp.gt.f32.partialorder %v11516_v49, 0.0  ;;  %v1198_v36 = vsel %vm1070_vm13, %v1102_v42, %v10113_v51  ;;  %vm1072_vm2 = vcmp.gt.f32.partialorder %v11479_v23, 0.0  ;;  %v945_v53 = vadd.f32 1.0, %v11506_v2  ;;  %v12654_v49 = vld [vmem:[#allocation17_spill] sm:$0xff] }
 0x239   : > { %9630 = vmatmul.mubr.f32.vlgmr.msra.gmra.mrb[120].mxu1 %v1035_v14  ;;  %9632 = vmatprep.subr.mxu0 %v12617_v37  ;;  %v10117_v34 = vpop.eup %10116  ;;  %v944_v47 = vadd.f32 1.0, %v11466_v15  ;;  %vm913_vm3 = vcmp.gt.f32.partialorder %v11506_v2, 0.0  ;;  %v1038_v58 = vsel %vm910_vm15, %v942_v54, %v10115_v57  ;;  %vm912_vm4 = vcmp.gt.f32.partialorder %v11466_v15, 0.0  ;;  %v12653_v15 = vld [vmem:[#allocation16_spill] sm:$0xff] }
 0x23a   : > { %9638 = vmatpush3.xpose.msra.mxu1 %v1197_v25  ;;  %9625 = vmatmul.mubr.f32.vlgmr.msra.gmra.mrb[120].mxu0 %v1034_v31  ;;  %v10119_v43 = vpop.eup %10118  ;;  %v1039_v18 = vsel %vm911_vm14, %v943_v1, %v10117_v34  ;;  %vm5923_vm5 = vcmask 64512  }
 0x23b   : > { %9633 = vmatpush3.xpose.msra.mxu0 %v1196_v6  ;;  %9639 = vmatprep.mubr.msk.f32.mxu1 %vm10459_vm0, %v12617_v37  ;;  %v10121_v10 = vpop.eup %10120  ;;  %v1201_v17 = vsel %vm1073_vm1, %v1105_v35, %v10119_v43 }
 0x23c   : > { %9647 = vmatprep.subr.mxu1 %v12617_v37  ;;  %9634 = vmatprep.mubr.msk.f32.mxu0 %vm10459_vm0, %v12617_v37  ;;  %v10123_v12 = vpop.eup %10122  ;;  %v1200_v0 = vsel %vm1072_vm2, %v1104_v26, %v10121_v10 }
 0x23d   : > { %9640 = vmatmul.mubr.f32.vlgmr.msra.gmra.mrb[122].mxu1 %v1037_v16  ;;  %9642 = vmatprep.subr.mxu0 %v12617_v37  ;;  %v10125_v29 = vpop.eup %10124  ;;  %v1041_v2 = vsel %vm913_vm3, %v945_v53, %v10123_v12 }
 0x23e   : > { %9648 = vmatpush3.xpose.msra.mxu1 %v1199_v3  ;;  %9635 = vmatmul.mubr.f32.vlgmr.msra.gmra.mrb[122].mxu0 %v1036_v61  ;;  %v1040_v33 = vsel %vm912_vm4, %v944_v47, %v10125_v29 }
 0x23f   : > { %9643 = vmatpush3.xpose.msra.mxu0 %v1198_v36  ;;  %9649 = vmatprep.mubr.msk.f32.mxu1 %vm10459_vm0, %v12617_v37 }
 0x240   : > { %9657 = vmatprep.subr.mxu1 %v12617_v37  ;;  %9644 = vmatprep.mubr.msk.f32.mxu0 %vm10459_vm0, %v12617_v37 }
 0x241   : > { %9650 = vmatmul.mubr.f32.vlgmr.msra.gmra.mrb[124].mxu1 %v1039_v18  ;;  %9652 = vmatprep.subr.mxu0 %v12617_v37 }
 0x242   : > { %9658 = vmatpush3.xpose.msra.mxu1 %v1201_v17  ;;  %9645 = vmatmul.mubr.f32.vlgmr.msra.gmra.mrb[124].mxu0 %v1038_v58 }
 0x243   : > { %9653 = vmatpush3.xpose.msra.mxu0 %v1200_v0  ;;  %9659 = vmatprep.mubr.msk.f32.mxu1 %vm10459_vm0, %v12617_v37 }
 0x244   : > { %9667 = vmatprep.subr.mxu1 %v12617_v37  ;;  %9654 = vmatprep.mubr.msk.f32.mxu0 %vm10459_vm0, %v12617_v37 }
 0x245   : > { %9660 = vmatmul.mubr.f32.vlgmr.msra.gmra.mrb[126].mxu1 %v1041_v2  ;;  %9662 = vmatprep.subr.mxu0 %v12617_v37 }
 0x246   : > { %9668 = vmatpush3.msra.mxu1 %v12653_v15  ;;  %9655 = vmatmul.mubr.f32.vlgmr.msra.gmra.mrb[126].mxu0 %v1040_v33 }
 0x247   : > { %9663 = vmatpush3.msra.mxu0 %v12654_v49  ;;  %9664 = vmatprep.mubr.msk.f32.mxu0 %vm10459_vm0, %v12617_v37 }
 0x248   : > { %9672 = vmatprep.subr.mxu0 %v12617_v37  ;;  %9669 = vmatprep.mubr.msk.f32.mxu1 %vm10459_vm0, %v12617_v37 }
 0x249   : > { %9677 = vmatprep.subr.mxu1 %v12617_v37 }
 0x29c   : > { %v11881_v23 = vpop.f32.mrb[64].mxu1 }
 0x29d   : > { %v11883_v13 = vpop.f32.mrb[64].mxu0  ;;  %v9351_v63 = vpop.f32.mrb[65].mxu1  ;;  %vm6277_vm7 = vcmp.gt.f32.partialorder %v11881_v23, 0.0 }
 0x29e   : > { %v9346_v20 = vpop.f32.mrb[65].mxu0  ;;  %vm6276_vm6 = vcmp.gt.f32.partialorder %v11883_v13, 0.0 }
 0x2a0   : > { %v11885_v46 = vpop.f32.mrb[66].mxu1 }
 0x2a1   : > { %v11887_v52 = vpop.f32.mrb[66].mxu0  ;;  %v9361_v48 = vpop.f32.mrb[67].mxu1  ;;  %vm6279_vm9 = vcmp.gt.f32.partialorder %v11885_v46, 0.0  ;;  %v12673_v46 = vld [vmem:[#allocation20_spill] sm:$0xff] }
 0x2a2   : > { %v9356_v60 = vpop.f32.mrb[67].mxu0  ;;  %vm6278_vm8 = vcmp.gt.f32.partialorder %v11887_v52, 0.0 }
 0x2a4   : > { %v11889_v32 = vpop.f32.mrb[68].mxu1 }
 0x2a5   : > { %v11891_v5 = vpop.f32.mrb[68].mxu0  ;;  %v9371_v27 = vpop.f32.mrb[69].mxu1  ;;  %vm6281_vm11 = vcmp.gt.f32.partialorder %v11889_v32, 0.0 }
 0x2a6   : > { %v9366_v21 = vpop.f32.mrb[69].mxu0  ;;  %vm6280_vm10 = vcmp.gt.f32.partialorder %v11891_v5, 0.0 }
 0x2a8   : > { %v11893_v40 = vpop.f32.mrb[70].mxu1 }
 0x2a9   : > { %v11895_v39 = vpop.f32.mrb[70].mxu0  ;;  %v9381_v19 = vpop.f32.mrb[71].mxu1  ;;  %vm6283_vm13 = vcmp.gt.f32.partialorder %v11893_v40, 0.0 }
 0x2aa   : > { %v9376_v4 = vpop.f32.mrb[71].mxu0  ;;  %vm6282_vm12 = vcmp.gt.f32.partialorder %v11895_v39, 0.0 }
 0x2ac   : > { %v11897_v24 = vpop.f32.mrb[72].mxu1 }
 0x2ad   : > { %v11899_v50 = vpop.f32.mrb[72].mxu0  ;;  %v9391_v11 = vpop.f32.mrb[73].mxu1  ;;  %vm6285_vm15 = vcmp.gt.f32.partialorder %v11897_v24, 0.0 }
 0x2ae   : > { %v9386_v30 = vpop.f32.mrb[73].mxu0  ;;  %vm6284_vm14 = vcmp.gt.f32.partialorder %v11899_v50, 0.0 }
 0x2b0   : > { %v11901_v41 = vpop.f32.mrb[74].mxu1 }
 0x2b1   : > { %v11903_v22 = vpop.f32.mrb[74].mxu0  ;;  %v9401_v7 = vpop.f32.mrb[75].mxu1  ;;  %vm6287_vm2 = vcmp.gt.f32.partialorder %v11901_v41, 0.0 }
 0x2b2   : > { %v9396_v56 = vpop.f32.mrb[75].mxu0  ;;  %vm6286_vm1 = vcmp.gt.f32.partialorder %v11903_v22, 0.0 }
 0x2b4   : > { %v11905_v28 = vpop.f32.mrb[76].mxu1 }
 0x2b5   : > { %v11907_v44 = vpop.f32.mrb[76].mxu0  ;;  %v9411_v59 = vpop.f32.mrb[77].mxu1  ;;  %vm6289_vm4 = vcmp.gt.f32.partialorder %v11905_v28, 0.0 }
 0x2b6   : > { %v9406_v45 = vpop.f32.mrb[77].mxu0  ;;  %vm6288_vm3 = vcmp.gt.f32.partialorder %v11907_v44, 0.0 }
 0x2b8   : > { %v11909_v55 = vpop.f32.mrb[78].mxu1 }
 0x2b9   : > { %v11911_v62 = vpop.f32.mrb[78].mxu0  ;;  %v9421_v14 = vpop.f32.mrb[79].mxu1 }
 0x2ba   : > { %v9416_v38 = vpop.f32.mrb[79].mxu0 }
 0x2bc   : > { %v11913_v9 = vpop.f32.mrb[80].mxu1 }
 0x2bd   : > { %12655 = vst [vmem:[#allocation43_spill] sm:$0xff] %v11913_v9  ;;  %v11915_v25 = vpop.f32.mrb[80].mxu0  ;;  %v9431_v31 = vpop.f32.mrb[81].mxu1 }
 0x2be   : > { %v9426_v8 = vpop.f32.mrb[81].mxu0 }
 0x2c0   : > { %v11917_v42 = vpop.f32.mrb[82].mxu1 }
 0x2c1   : > { %12656 = vst [vmem:[#allocation45_spill] sm:$0xff] %v11917_v42  ;;  %v11919_v6 = vpop.f32.mrb[82].mxu0  ;;  %v9441_v51 = vpop.f32.mrb[83].mxu1 }
 0x2c2   : > { %12657 = vst [vmem:[#allocation50_spill] sm:$0xff] %v11919_v6  ;;  %v9436_v57 = vpop.f32.mrb[83].mxu0 }
 0x2c4   : > { %v11921_v54 = vpop.f32.mrb[84].mxu1 }
 0x2c5   : > { %12658 = vst [vmem:[#allocation52_spill] sm:$0xff] %v11921_v54  ;;  %v11923_v1 = vpop.f32.mrb[84].mxu0  ;;  %v9451_v16 = vpop.f32.mrb[85].mxu1 }
 0x2c6   : > { %12659 = vst [vmem:[#allocation51_spill] sm:$0xff] %v11923_v1  ;;  %v9446_v34 = vpop.f32.mrb[85].mxu0 }
 0x2c8   : > { %v11925_v35 = vpop.f32.mrb[86].mxu1 }
 0x2c9   : > { %12660 = vst [vmem:[#allocation53_spill] sm:$0xff] %v11925_v35  ;;  %v11927_v3 = vpop.f32.mrb[86].mxu0  ;;  %v9461_v61 = vpop.f32.mrb[87].mxu1 }
 0x2ca   : > { %12661 = vst [vmem:[#allocation57_spill] sm:$0xff] %v11927_v3  ;;  %v9456_v43 = vpop.f32.mrb[87].mxu0 }
 0x2cc   : > { %v11929_v26 = vpop.f32.mrb[88].mxu1 }
 0x2cd   : > { %12662 = vst [vmem:[#allocation55_spill] sm:$0xff] %v11929_v26  ;;  %v11931_v36 = vpop.f32.mrb[88].mxu0  ;;  %v9471_v10 = vpop.f32.mrb[89].mxu1 }
 0x2ce   : > { %12663 = vst [vmem:[#allocation54_spill] sm:$0xff] %v11931_v36  ;;  %v9466_v53 = vpop.f32.mrb[89].mxu0 }
 0x2d0   : > { %v11933_v18 = vpop.f32.mrb[90].mxu1 }
 0x2d1   : > { %12664 = vst [vmem:[#allocation56_spill] sm:$0xff] %v11933_v18  ;;  %v11935_v12 = vpop.f32.mrb[90].mxu0  ;;  %v9481_v47 = vpop.f32.mrb[91].mxu1 }
 0x2d2   : > { %12665 = vst [vmem:[#allocation61_spill] sm:$0xff] %v11935_v12  ;;  %v9476_v17 = vpop.f32.mrb[91].mxu0 }
 0x2d4   : > { %v11937_v58 = vpop.f32.mrb[92].mxu1 }
 0x2d5   : > { %12666 = vst [vmem:[#allocation59_spill] sm:$0xff] %v11937_v58  ;;  %v11939_v29 = vpop.f32.mrb[92].mxu0  ;;  %v9491_v0 = vpop.f32.mrb[93].mxu1 }
 0x2d6   : > { %12667 = vst [vmem:[#allocation58_spill] sm:$0xff] %v11939_v29  ;;  %v9486_v2 = vpop.f32.mrb[93].mxu0 }
 0x2d8   : > { %v11941_v33 = vpop.f32.mrb[94].mxu1 }
 0x2d9   : > { %12668 = vst [vmem:[#allocation60_spill] sm:$0xff] %v11941_v33  ;;  %v11943_v15 = vpop.f32.mrb[94].mxu0  ;;  %v9501_v49 = vpop.f32.mrb[95].mxu1 }
 0x2da   : > { %12669 = vst [vmem:[#allocation65_spill] sm:$0xff] %v11943_v15  ;;  %v9496_v63 = vpop.f32.mrb[95].mxu0 }
 0x2dc   : > { %v11945_v20 = vpop.f32.mrb[96].mxu1 }
 0x2dd   : > { %v11947_v48 = vpop.f32.mrb[96].mxu0  ;;  %v9511_v60 = vpop.f32.mrb[97].mxu1  ;;  %v5927_v56 = vsel %vm5923_vm5, %v11945_v20, -inf }
 0x2de   : > { %v9506_v27 = vpop.f32.mrb[97].mxu0  ;;  %v5924_v21 = vsel %vm5923_vm5, %v11947_v48, -inf }
 0x2df   : > { %5925 = vmax.xlane.f32.xlu0 %v5924_v21 }
 0x2e0   : > { %v11951_v19 = vpop.f32.mrb[98].mxu1 }
 0x2e1   : > { %v11953_v4 = vpop.f32.mrb[98].mxu0  ;;  %v9521_v11 = vpop.f32.mrb[99].mxu1  ;;  %v5933_v30 = vsel %vm5923_vm5, %v11951_v19, -inf }
 0x2e2   : > { %5934 = vmax.xlane.f32.xlu1 %v5933_v30  ;;  %v9516_v7 = vpop.f32.mrb[99].mxu0  ;;  %v5930_v38 = vsel %vm5923_vm5, %v11953_v4, -inf }
 0x2e3   : > { %5928 = vmax.xlane.f32.xlu0 %v5927_v56 }
 0x2e4   : > { %v11959_v59 = vpop.f32.mrb[100].mxu1 }
 0x2e5   : > { %v11961_v45 = vpop.f32.mrb[100].mxu0  ;;  %v9531_v14 = vpop.f32.mrb[101].mxu1  ;;  %v5939_v34 = vsel %vm5923_vm5, %v11959_v59, -inf }
 0x2e6   : > { %5931 = vmax.xlane.f32.xlu1 %v5930_v38  ;;  %v9526_v31 = vpop.f32.mrb[101].mxu0  ;;  %v5936_v8 = vsel %vm5923_vm5, %v11961_v45, -inf }
 0x2e7   : > { %5937 = vmax.xlane.f32.xlu0 %v5936_v8 }
 0x2e8   : > { %v11967_v51 = vpop.f32.mrb[102].mxu1 }
 0x2e9   : > { %v11969_v57 = vpop.f32.mrb[102].mxu0  ;;  %v9541_v16 = vpop.f32.mrb[103].mxu1  ;;  %v5945_v17 = vsel %vm5923_vm5, %v11967_v51, -inf }
 0x2ea   : > { %5940 = vmax.xlane.f32.xlu1 %v5939_v34  ;;  %v9536_v61 = vpop.f32.mrb[103].mxu0  ;;  %v5942_v43 = vsel %vm5923_vm5, %v11969_v57, -inf }
 0x2eb   : > { %5943 = vmax.xlane.f32.xlu0 %v5942_v43 }
 0x2ec   : > { %v11975_v10 = vpop.f32.mrb[104].mxu1 }
 0x2ed   : > { %v11977_v53 = vpop.f32.mrb[104].mxu0  ;;  %v9551_v47 = vpop.f32.mrb[105].mxu1  ;;  %v5951_v27 = vsel %vm5923_vm5, %v11975_v10, -inf }
 0x2ee   : > { %5946 = vmax.xlane.f32.xlu1 %v5945_v17  ;;  %v9546_v0 = vpop.f32.mrb[105].mxu0  ;;  %v5948_v2 = vsel %vm5923_vm5, %v11977_v53, -inf }
 0x2ef   : > { %5949 = vmax.xlane.f32.xlu0 %v5948_v2 }
 0x2f0   : > { %v11983_v49 = vpop.f32.mrb[106].mxu1 }
 0x2f1   : > { %v11985_v63 = vpop.f32.mrb[106].mxu0  ;;  %v9561_v60 = vpop.f32.mrb[107].mxu1  ;;  %v5957_v14 = vsel %vm5923_vm5, %v11983_v49, -inf }
 0x2f2   : > { %5952 = vmax.xlane.f32.xlu1 %v5951_v27  ;;  %v9556_v21 = vpop.f32.mrb[107].mxu0  ;;  %v5954_v11 = vsel %vm5923_vm5, %v11985_v63, -inf }
 0x2f3   : > { %5955 = vmax.xlane.f32.xlu0 %v5954_v11 }
 0x2f4   : > { %v11991_v30 = vpop.f32.mrb[108].mxu1 }
 0x2f5   : > { %v11993_v7 = vpop.f32.mrb[108].mxu0  ;;  %v9571_v56 = vpop.f32.mrb[109].mxu1  ;;  %v5963_v61 = vsel %vm5923_vm5, %v11991_v30, -inf }
 0x2f6   : > { %5958 = vmax.xlane.f32.xlu1 %v5957_v14  ;;  %v9566_v38 = vpop.f32.mrb[109].mxu0  ;;  %v5960_v31 = vsel %vm5923_vm5, %v11993_v7, -inf }
 0x2f7   : > { %5961 = vmax.xlane.f32.xlu0 %v5960_v31 }
 0x2f8   : > { %v11999_v8 = vpop.f32.mrb[110].mxu1 }
 0x2f9   : > { %v12001_v16 = vpop.f32.mrb[110].mxu0  ;;  %v9581_v34 = vpop.f32.mrb[111].mxu1  ;;  %v5969_v60 = vsel %vm5923_vm5, %v11999_v8, -inf }
 0x2fa   : > { %5964 = vmax.xlane.f32.xlu1 %v5963_v61  ;;  %v9576_v43 = vpop.f32.mrb[111].mxu0  ;;  %v5966_v47 = vsel %vm5923_vm5, %v12001_v16, -inf }
 0x2fb   : > { %5967 = vmax.xlane.f32.xlu0 %v5966_v47 }
 0x2fc   : > { %v12007_v17 = vpop.f32.mrb[112].mxu1 }
 0x2fd   : > { %v12009_v0 = vpop.f32.mrb[112].mxu0  ;;  %v9591_v2 = vpop.f32.mrb[113].mxu1  ;;  %v5975_v38 = vsel %vm5923_vm5, %v12007_v17, -inf }
 0x2fe   : > { %5970 = vmax.xlane.f32.xlu1 %v5969_v60  ;;  %v9586_v27 = vpop.f32.mrb[113].mxu0  ;;  %v5972_v21 = vsel %vm5923_vm5, %v12009_v0, -inf }
 0x2ff   : > { %5973 = vmax.xlane.f32.xlu0 %v5972_v21 }
 0x300   : > { %v12015_v11 = vpop.f32.mrb[114].mxu1 }
 0x301   : > { %v12017_v56 = vpop.f32.mrb[114].mxu0  ;;  %v9601_v14 = vpop.f32.mrb[115].mxu1  ;;  %v5981_v2 = vsel %vm5923_vm5, %v12015_v11, -inf }
 0x302   : > { %5976 = vmax.xlane.f32.xlu1 %v5975_v38  ;;  %v9596_v31 = vpop.f32.mrb[115].mxu0  ;;  %v5978_v34 = vsel %vm5923_vm5, %v12017_v56, -inf }
 0x303   : > { %5979 = vmax.xlane.f32.xlu0 %v5978_v34 }
 0x304   : > { %v12023_v61 = vpop.f32.mrb[116].mxu1 }
 0x305   : > { %v12025_v43 = vpop.f32.mrb[116].mxu0  ;;  %v9611_v47 = vpop.f32.mrb[117].mxu1  ;;  %v5987_v31 = vsel %vm5923_vm5, %v12023_v61, -inf }
 0x306   : > { %5982 = vmax.xlane.f32.xlu1 %v5981_v2  ;;  %v9606_v60 = vpop.f32.mrb[117].mxu0  ;;  %v5984_v27 = vsel %vm5923_vm5, %v12025_v43, -inf }
 0x307   : > { %5985 = vmax.xlane.f32.xlu0 %v5984_v27 }
 0x308   : > { %v12031_v21 = vpop.f32.mrb[118].mxu1 }
 0x309   : > { %v12033_v14 = vpop.f32.mrb[118].mxu0  ;;  %v9621_v38 = vpop.f32.mrb[119].mxu1  ;;  %v5993_v27 = vsel %vm5923_vm5, %v12031_v21, -inf }
 0x30a   : > { %5988 = vmax.xlane.f32.xlu1 %v5987_v31  ;;  %v9616_v34 = vpop.f32.mrb[119].mxu0  ;;  %v5990_v47 = vsel %vm5923_vm5, %v12033_v14, -inf }
 0x30b   : > { %5991 = vmax.xlane.f32.xlu0 %v5990_v47 }
 0x30c   : > { %v12039_v2 = vpop.f32.mrb[120].mxu1 }
 0x30d   : > { %v12041_v60 = vpop.f32.mrb[120].mxu0  ;;  %v9631_v33 = vpop.f32.mrb[121].mxu1  ;;  %v5999_v47 = vsel %vm5923_vm5, %v12039_v2, -inf }
 0x30e   : > { %5994 = vmax.xlane.f32.xlu1 %v5993_v27  ;;  %v9626_v15 = vpop.f32.mrb[121].mxu0  ;;  %v5996_v38 = vsel %vm5923_vm5, %v12041_v60, -inf }
 0x30f   : > { %5997 = vmax.xlane.f32.xlu0 %v5996_v38 }
 0x310   : > { %v12047_v31 = vpop.f32.mrb[122].mxu1 }
 0x311   : > { %v12049_v34 = vpop.f32.mrb[122].mxu0  ;;  %v9641_v58 = vpop.f32.mrb[123].mxu1  ;;  %v6005_v38 = vsel %vm5923_vm5, %v12047_v31, -inf }
 0x312   : > { %6000 = vmax.xlane.f32.xlu1 %v5999_v47  ;;  %v9636_v29 = vpop.f32.mrb[123].mxu0  ;;  %v6002_v33 = vsel %vm5923_vm5, %v12049_v34, -inf }
 0x313   : > { %6003 = vmax.xlane.f32.xlu0 %v6002_v33 }
 0x314   : > { %v12055_v27 = vpop.f32.mrb[124].mxu1 }
 0x315   : > { %v12057_v15 = vpop.f32.mrb[124].mxu0  ;;  %v9651_v18 = vpop.f32.mrb[125].mxu1  ;;  %v6011_v33 = vsel %vm5923_vm5, %v12055_v27, -inf }
 0x316   : > { %6006 = vmax.xlane.f32.xlu1 %v6005_v38  ;;  %v9646_v12 = vpop.f32.mrb[125].mxu0  ;;  %v6008_v58 = vsel %vm5923_vm5, %v12057_v15, -inf }
 0x317   : > { %6009 = vmax.xlane.f32.xlu0 %v6008_v58 }
 0x318   : > { %v12063_v47 = vpop.f32.mrb[126].mxu1 }
 0x319   : > { %v12065_v29 = vpop.f32.mrb[126].mxu0  ;;  %v9661_v26 = vpop.f32.mrb[127].mxu1  ;;  %v6017_v12 = vsel %vm5923_vm5, %v12063_v47, -inf }
 0x31a   : > { %6012 = vmax.xlane.f32.xlu1 %v6011_v33  ;;  %v9656_v36 = vpop.f32.mrb[127].mxu0  ;;  %v6014_v18 = vsel %vm5923_vm5, %v12065_v29, -inf }
 0x31b   : > { %6015 = vmax.xlane.f32.xlu0 %v6014_v18 }
 0x31e   : > { %6018 = vmax.xlane.f32.xlu1 %v6017_v12 }
 0x36c   : > { %v5926_v38 = vpop.xlane.xlu0 %5925 }
 0x36d   : > { %v6020_v58 = vsub.f32 %v11947_v48, %v5926_v38 }
 0x36f   : > { %v6052_v35 = vmul.f32 1.442695, %v6020_v58  ;;  %v5935_v3 = vpop.xlane.xlu1 %5934 }
 0x370   : > { %v6023_v26 = vsub.f32 %v11951_v19, %v5935_v3  ;;  %v5929_v54 = vpop.xlane.xlu0 %5928 }
 0x371   : > { %10126 = vpow2.f32 %v6052_v35  ;;  %v6021_v33 = vsub.f32 %v11945_v20, %v5929_v54 }
 0x372   : > { %v6058_v36 = vmul.f32 1.442695, %v6023_v26 }
 0x373   : > { %v6054_v1 = vmul.f32 1.442695, %v6021_v33  ;;  %v5932_v42 = vpop.xlane.xlu1 %5931 }
 0x374   : > { %v6022_v18 = vsub.f32 %v11953_v4, %v5932_v42  ;;  %v5938_v6 = vpop.xlane.xlu0 %5937 }
 0x375   : > { %10128 = vpow2.f32 %v6054_v1  ;;  %v6024_v12 = vsub.f32 %v11961_v45, %v5938_v6 }
 0x376   : > { %v6056_v9 = vmul.f32 1.442695, %v6022_v18  ;;  %10130 = vpow2.f32 %v6058_v36 }
 0x377   : > { %v6060_v48 = vmul.f32 1.442695, %v6024_v12  ;;  %v5941_v38 = vpop.xlane.xlu1 %5940 }
 0x378   : > { %10132 = vpow2.f32 %v6056_v9  ;;  %v6025_v3 = vsub.f32 %v11959_v59, %v5941_v38  ;;  %v5944_v19 = vpop.xlane.xlu0 %5943 }
 0x379   : > { %v6026_v35 = vsub.f32 %v11969_v57, %v5944_v19  ;;  %10134 = vpow2.f32 %v6060_v48 }
 0x37a   : > { %v6062_v54 = vmul.f32 1.442695, %v6025_v3 }
 0x37b   : > { %v12080_v20 = vpop.eup %10126  ;;  %v6064_v58 = vmul.f32 1.442695, %v6026_v35  ;;  %v5947_v42 = vpop.xlane.xlu1 %5946 }
 0x37c   : > { %10136 = vpow2.f32 %v6062_v54  ;;  %v6027_v1 = vsub.f32 %v11967_v51, %v5947_v42  ;;  %v5950_v6 = vpop.xlane.xlu0 %5949  ;;  %v6116_v4 = vsel %vm5923_vm5, %v12080_v20, 0.0 }
 0x37d   : > { %v6028_v9 = vsub.f32 %v11977_v53, %v5950_v6  ;;  %6117 = vadd.xlane.f32.xlu0 %v6116_v4  ;;  %10138 = vpow2.f32 %v6064_v58 }
 0x37e   : > { %v6066_v59 = vmul.f32 1.442695, %v6027_v1 }
 0x37f   : > { %v12086_v45 = vpop.eup %10128  ;;  %v6068_v57 = vmul.f32 1.442695, %v6028_v9  ;;  %v5953_v26 = vpop.xlane.xlu1 %5952 }
 0x380   : > { %10140 = vpow2.f32 %v6066_v59  ;;  %v6029_v33 = vsub.f32 %v11975_v10, %v5953_v26  ;;  %v5956_v36 = vpop.xlane.xlu0 %5955  ;;  %v6119_v51 = vsel %vm5923_vm5, %v12086_v45, 0.0  ;;  %v12091_v18 = vpop.eup %10130 }
 0x381   : > { %v6030_v12 = vsub.f32 %v11985_v63, %v5956_v36  ;;  %6120 = vadd.xlane.f32.xlu1 %v6119_v51  ;;  %10142 = vpow2.f32 %v6068_v57  ;;  %v6125_v63 = vsel %vm5923_vm5, %v12091_v18, 0.0 }
 0x382   : > { %v12094_v53 = vpop.eup %10132  ;;  %v6070_v48 = vmul.f32 1.442695, %v6029_v33 }
 0x383   : > { %v6072_v38 = vmul.f32 1.442695, %v6030_v12  ;;  %v5959_v3 = vpop.xlane.xlu1 %5958  ;;  %v6122_v19 = vsel %vm5923_vm5, %v12094_v53, 0.0  ;;  %v12098_v35 = vpop.eup %10134 }
 0x384   : > { %10144 = vpow2.f32 %v6070_v48  ;;  %v6031_v10 = vsub.f32 %v11983_v49, %v5959_v3  ;;  %v5962_v54 = vpop.xlane.xlu0 %5961  ;;  %6123 = vadd.xlane.f32.xlu0 %v6122_v19  ;;  %v6128_v9 = vsel %vm5923_vm5, %v12098_v35, 0.0 }
 0x385   : > { %v6032_v58 = vsub.f32 %v11993_v7, %v5962_v54  ;;  %6126 = vadd.xlane.f32.xlu1 %v6125_v63  ;;  %10146 = vpow2.f32 %v6072_v38 }
 0x386   : > { %v12104_v42 = vpop.eup %10136  ;;  %v6074_v1 = vmul.f32 1.442695, %v6031_v10 }
 0x387   : > { %v6076_v6 = vmul.f32 1.442695, %v6032_v58  ;;  %v5965_v4 = vpop.xlane.xlu1 %5964  ;;  %v6131_v49 = vsel %vm5923_vm5, %v12104_v42, 0.0  ;;  %v12110_v59 = vpop.eup %10138 }
 0x388   : > { %10148 = vpow2.f32 %v6074_v1  ;;  %v6033_v57 = vsub.f32 %v11991_v30, %v5965_v4  ;;  %v5968_v26 = vpop.xlane.xlu0 %5967  ;;  %6129 = vadd.xlane.f32.xlu0 %v6128_v9  ;;  %v6134_v48 = vsel %vm5923_vm5, %v12110_v59, 0.0 }
 0x389   : > { %v6034_v7 = vsub.f32 %v12001_v16, %v5968_v26  ;;  %6132 = vadd.xlane.f32.xlu1 %v6131_v49  ;;  %10150 = vpow2.f32 %v6076_v6 }
 0x38a   : > { %v12114_v33 = vpop.eup %10140  ;;  %v6078_v36 = vmul.f32 1.442695, %v6033_v57 }
 0x38b   : > { %v6080_v51 = vmul.f32 1.442695, %v6034_v7  ;;  %v5971_v12 = vpop.xlane.xlu1 %5970  ;;  %v6137_v38 = vsel %vm5923_vm5, %v12114_v33, 0.0  ;;  %v12120_v3 = vpop.eup %10142 }
 0x38c   : > { %10152 = vpow2.f32 %v6078_v36  ;;  %v6035_v30 = vsub.f32 %v11999_v8, %v5971_v12  ;;  %v5974_v19 = vpop.xlane.xlu0 %5973  ;;  %6135 = vadd.xlane.f32.xlu0 %v6134_v48  ;;  %v6140_v1 = vsel %vm5923_vm5, %v12120_v3, 0.0 }
 0x38d   : > { %v6036_v16 = vsub.f32 %v12009_v0, %v5974_v19  ;;  %6138 = vadd.xlane.f32.xlu1 %v6137_v38  ;;  %10154 = vpow2.f32 %v6080_v51 }
 0x38e   : > { %v12124_v10 = vpop.eup %10144  ;;  %v6082_v54 = vmul.f32 1.442695, %v6035_v30 }
 0x38f   : > { %v6084_v63 = vmul.f32 1.442695, %v6036_v16  ;;  %v5977_v58 = vpop.xlane.xlu1 %5976  ;;  %v6143_v6 = vsel %vm5923_vm5, %v12124_v10, 0.0  ;;  %v12130_v4 = vpop.eup %10146 }
 0x390   : > { %10156 = vpow2.f32 %v6082_v54  ;;  %v6037_v8 = vsub.f32 %v12007_v17, %v5977_v58  ;;  %v5980_v9 = vpop.xlane.xlu0 %5979  ;;  %6141 = vadd.xlane.f32.xlu0 %v6140_v1  ;;  %v6146_v36 = vsel %vm5923_vm5, %v12130_v4, 0.0 }
 0x391   : > { %v6038_v0 = vsub.f32 %v12017_v56, %v5980_v9  ;;  %6144 = vadd.xlane.f32.xlu1 %v6143_v6  ;;  %10158 = vpow2.f32 %v6084_v63 }
 0x392   : > { %v12134_v49 = vpop.eup %10148  ;;  %v6086_v57 = vmul.f32 1.442695, %v6037_v8 }
 0x393   : > { %v6088_v26 = vmul.f32 1.442695, %v6038_v0  ;;  %v5983_v7 = vpop.xlane.xlu1 %5982  ;;  %v6149_v51 = vsel %vm5923_vm5, %v12134_v49, 0.0  ;;  %v12140_v12 = vpop.eup %10150 }
 0x394   : > { %10160 = vpow2.f32 %v6086_v57  ;;  %v6039_v17 = vsub.f32 %v12015_v11, %v5983_v7  ;;  %v5986_v48 = vpop.xlane.xlu0 %5985  ;;  %6147 = vadd.xlane.f32.xlu0 %v6146_v36  ;;  %v6152_v54 = vsel %vm5923_vm5, %v12140_v12, 0.0 }
 0x395   : > { %v6040_v56 = vsub.f32 %v12025_v43, %v5986_v48  ;;  %6150 = vadd.xlane.f32.xlu1 %v6149_v51  ;;  %10162 = vpow2.f32 %v6088_v26 }
 0x396   : > { %v12144_v38 = vpop.eup %10152  ;;  %v6090_v30 = vmul.f32 1.442695, %v6039_v17 }
 0x397   : > { %v6092_v19 = vmul.f32 1.442695, %v6040_v56  ;;  %v5989_v16 = vpop.xlane.xlu1 %5988  ;;  %v6155_v63 = vsel %vm5923_vm5, %v12144_v38, 0.0  ;;  %v12150_v58 = vpop.eup %10154 }
 0x398   : > { %10164 = vpow2.f32 %v6090_v30  ;;  %v6041_v11 = vsub.f32 %v12023_v61, %v5989_v16  ;;  %v5992_v1 = vpop.xlane.xlu0 %5991  ;;  %6153 = vadd.xlane.f32.xlu0 %v6152_v54  ;;  %v6158_v57 = vsel %vm5923_vm5, %v12150_v58, 0.0 }
 0x399   : > { %v6042_v43 = vsub.f32 %v12033_v14, %v5992_v1  ;;  %6156 = vadd.xlane.f32.xlu1 %v6155_v63  ;;  %10166 = vpow2.f32 %v6092_v19 }
 0x39a   : > { %v12154_v6 = vpop.eup %10156  ;;  %v6094_v8 = vmul.f32 1.442695, %v6041_v11 }
 0x39b   : > { %v6096_v9 = vmul.f32 1.442695, %v6042_v43  ;;  %v5995_v0 = vpop.xlane.xlu1 %5994  ;;  %v6161_v26 = vsel %vm5923_vm5, %v12154_v6, 0.0  ;;  %v12160_v7 = vpop.eup %10158 }
 0x39c   : > { %10168 = vpow2.f32 %v6094_v8  ;;  %v6043_v61 = vsub.f32 %v12031_v21, %v5995_v0  ;;  %v5998_v36 = vpop.xlane.xlu0 %5997  ;;  %6159 = vadd.xlane.f32.xlu0 %v6158_v57  ;;  %v6164_v30 = vsel %vm5923_vm5, %v12160_v7, 0.0 }
 0x39d   : > { %v6044_v14 = vsub.f32 %v12041_v60, %v5998_v36  ;;  %6162 = vadd.xlane.f32.xlu1 %v6161_v26  ;;  %10170 = vpow2.f32 %v6096_v9 }
 0x39e   : > { %v12164_v51 = vpop.eup %10160  ;;  %v6098_v17 = vmul.f32 1.442695, %v6043_v61 }
 0x39f   : > { %v6100_v48 = vmul.f32 1.442695, %v6044_v14  ;;  %v6001_v56 = vpop.xlane.xlu1 %6000  ;;  %v6167_v19 = vsel %vm5923_vm5, %v12164_v51, 0.0  ;;  %v12170_v16 = vpop.eup %10162 }
 0x3a0   : > { %10172 = vpow2.f32 %v6098_v17  ;;  %v6045_v21 = vsub.f32 %v12039_v2, %v6001_v56  ;;  %v6004_v54 = vpop.xlane.xlu0 %6003  ;;  %6165 = vadd.xlane.f32.xlu0 %v6164_v30  ;;  %v6170_v8 = vsel %vm5923_vm5, %v12170_v16, 0.0 }
 0x3a1   : > { %v6046_v60 = vsub.f32 %v12049_v34, %v6004_v54  ;;  %6168 = vadd.xlane.f32.xlu1 %v6167_v19  ;;  %10174 = vpow2.f32 %v6100_v48 }
 0x3a2   : > { %v12174_v63 = vpop.eup %10164  ;;  %v6102_v11 = vmul.f32 1.442695, %v6045_v21 }
 0x3a3   : > { %v6104_v1 = vmul.f32 1.442695, %v6046_v60  ;;  %v6007_v43 = vpop.xlane.xlu1 %6006  ;;  %v6173_v9 = vsel %vm5923_vm5, %v12174_v63, 0.0  ;;  %v12180_v0 = vpop.eup %10166 }
 0x3a4   : > { %10176 = vpow2.f32 %v6102_v11  ;;  %v6047_v2 = vsub.f32 %v12047_v31, %v6007_v43  ;;  %v6010_v57 = vpop.xlane.xlu0 %6009  ;;  %6171 = vadd.xlane.f32.xlu0 %v6170_v8  ;;  %v6176_v17 = vsel %vm5923_vm5, %v12180_v0, 0.0 }
 0x3a5   : > { %v6048_v34 = vsub.f32 %v12057_v15, %v6010_v57  ;;  %6174 = vadd.xlane.f32.xlu1 %v6173_v9  ;;  %10178 = vpow2.f32 %v6104_v1 }
 0x3a6   : > { %v12184_v26 = vpop.eup %10168  ;;  %v6106_v61 = vmul.f32 1.442695, %v6047_v2 }
 0x3a7   : > { %v6108_v36 = vmul.f32 1.442695, %v6048_v34  ;;  %v6013_v14 = vpop.xlane.xlu1 %6012  ;;  %v6179_v48 = vsel %vm5923_vm5, %v12184_v26, 0.0  ;;  %v12190_v56 = vpop.eup %10170 }
 0x3a8   : > { %10180 = vpow2.f32 %v6106_v61  ;;  %v6049_v31 = vsub.f32 %v12055_v27, %v6013_v14  ;;  %6177 = vadd.xlane.f32.xlu0 %v6176_v17  ;;  %v6016_v15 = vpop.xlane.xlu0 %6015  ;;  %v6182_v11 = vsel %vm5923_vm5, %v12190_v56, 0.0 }
 0x3a9   : > { %v6050_v30 = vsub.f32 %v12065_v29, %v6016_v15  ;;  %6180 = vadd.xlane.f32.xlu1 %v6179_v48  ;;  %10182 = vpow2.f32 %v6108_v36 }
 0x3aa   : > { %v12194_v19 = vpop.eup %10172  ;;  %v6110_v21 = vmul.f32 1.442695, %v6049_v31 }
 0x3ab   : > { %v6112_v54 = vmul.f32 1.442695, %v6050_v30  ;;  %v6019_v60 = vpop.xlane.xlu1 %6018  ;;  %v6185_v1 = vsel %vm5923_vm5, %v12194_v19, 0.0  ;;  %v12200_v43 = vpop.eup %10174 }
 0x3ac   : > { %10184 = vpow2.f32 %v6110_v21  ;;  %v6051_v27 = vsub.f32 %v12063_v47, %v6019_v60  ;;  %6183 = vadd.xlane.f32.xlu0 %v6182_v11  ;;  %v6188_v9 = vsel %vm5923_vm5, %v12200_v43, 0.0 }
 0x3ad   : > { %6186 = vadd.xlane.f32.xlu1 %v6185_v1  ;;  %10186 = vpow2.f32 %v6112_v54 }
 0x3ae   : > { %v12203_v29 = vpop.eup %10176  ;;  %v6114_v8 = vmul.f32 1.442695, %v6051_v27 }
 0x3af   : > { %v6191_v2 = vsel %vm5923_vm5, %v12203_v29, 0.0  ;;  %v12209_v57 = vpop.eup %10178 }
 0x3b0   : > { %10188 = vpow2.f32 %v6114_v8  ;;  %6189 = vadd.xlane.f32.xlu0 %v6188_v9  ;;  %v6194_v47 = vsel %vm5923_vm5, %v12209_v57, 0.0 }
 0x3b1   : > { %6192 = vadd.xlane.f32.xlu1 %v6191_v2 }
 0x3b2   : > { %v12211_v34 = vpop.eup %10180 }
 0x3b3   : > { %v6197_v61 = vsel %vm5923_vm5, %v12211_v34, 0.0  ;;  %v12217_v36 = vpop.eup %10182 }
 0x3b4   : > { %6195 = vadd.xlane.f32.xlu0 %v6194_v47  ;;  %v6200_v17 = vsel %vm5923_vm5, %v12217_v36, 0.0 }
 0x3b5   : > { %6198 = vadd.xlane.f32.xlu1 %v6197_v61 }
 0x3b6   : > { %v12219_v14 = vpop.eup %10184 }
 0x3b7   : > { %v6203_v48 = vsel %vm5923_vm5, %v12219_v14, 0.0  ;;  %v12225_v31 = vpop.eup %10186 }
 0x3b8   : > { %6201 = vadd.xlane.f32.xlu0 %v6200_v17  ;;  %v6206_v30 = vsel %vm5923_vm5, %v12225_v31, 0.0 }
 0x3b9   : > { %6204 = vadd.xlane.f32.xlu1 %v6203_v48  ;;  %v12670_v48 = vld [vmem:[#allocation19_spill] sm:$0xff] }
 0x3ba   : > { %v12227_v15 = vpop.eup %10188 }
 0x3bb   : > { %v6209_v21 = vsel %vm5923_vm5, %v12227_v15, 0.0 }
 0x3bc   : > { %6207 = vadd.xlane.f32.xlu0 %v6206_v30 }
 0x3bd   : > { %6210 = vadd.xlane.f32.xlu1 %v6209_v21 }
 0x40a   : > { %v6118_v54 = vpop.xlane.xlu0 %6117 }
 0x40b   : > { %10190 = vrcp.f32 %v6118_v54 }
 0x40e   : > { %v6121_v60 = vpop.xlane.xlu1 %6120 }
 0x40f   : > { %10192 = vrcp.f32 %v6121_v60 }
 0x411   : > { %v6124_v11 = vpop.xlane.xlu0 %6123 }
 0x412   : > { %10194 = vrcp.f32 %v6124_v11  ;;  %v6127_v1 = vpop.xlane.xlu1 %6126 }
 0x413   : > { %10196 = vrcp.f32 %v6127_v1 }
 0x415   : > { %v10191_v27 = vpop.eup %10190  ;;  %v6130_v8 = vpop.xlane.xlu0 %6129 }
 0x416   : > { %10198 = vrcp.f32 %v6130_v8  ;;  %v6133_v9 = vpop.xlane.xlu1 %6132  ;;  %v6213_v2 = vmul.f32 %v10191_v27, %v12080_v20 }
 0x417   : > { %10200 = vrcp.f32 %v6133_v9  ;;  %v12672_v9 = vld [vmem:[#allocation21_spill] sm:$0xff] }
 0x418   : > { %v6308_v47 = vsel %vm6276_vm6, %v6213_v2, 0.0  ;;  %vm6290_vm6 = vcmp.gt.f32.partialorder %v11911_v62, 0.0 }
 0x419   : > { %v10193_v61 = vpop.eup %10192  ;;  %9665 = vmatmul.mubr.msk.f32.vlgmr.msra.gmra.mrb[128].mxu0 %vm5923_vm5, %v6308_v47  ;;  %v6136_v17 = vpop.xlane.xlu0 %6135 }
 0x41a   : > { %9673 = vmatpush3.msra.mxu0 %v12670_v48  ;;  %10202 = vrcp.f32 %v6136_v17  ;;  %v6139_v30 = vpop.xlane.xlu1 %6138  ;;  %v6215_v21 = vmul.f32 %v10193_v61, %v12086_v45  ;;  %9674 = vmatprep.mubr.msk.f32.mxu0 %vm10459_vm0, %v12617_v37  ;;  %v12671_v45 = vld [vmem:[#allocation18_spill] sm:$0xff] }
 0x41b   : > { %10204 = vrcp.f32 %v6139_v30  ;;  %9682 = vmatprep.subr.mxu0 %v12617_v37  ;;  %v12674_v30 = vld [vmem:[#allocation23_spill] sm:$0xff] }
 0x41c   : > { %v10195_v13 = vpop.eup %10194  ;;  %v6309_v20 = vsel %vm6277_vm7, %v6215_v21, 0.0  ;;  %vm6291_vm7 = vcmp.gt.f32.partialorder %v11909_v55, 0.0 }
 0x41d   : > { %v10197_v54 = vpop.eup %10196  ;;  %v6142_v60 = vpop.xlane.xlu0 %6141  ;;  %9670 = vmatmul.mubr.msk.f32.vlgmr.msra.gmra.mrb[128].mxu1 %vm5923_vm5, %v6309_v20  ;;  %v6217_v11 = vmul.f32 %v10195_v13, %v12094_v53 }
 0x41e   : > { %10206 = vrcp.f32 %v6142_v60  ;;  %9678 = vmatpush3.msra.mxu1 %v12671_v45  ;;  %v6145_v1 = vpop.xlane.xlu1 %6144  ;;  %9679 = vmatprep.mubr.msk.f32.mxu1 %vm10459_vm0, %v12617_v37  ;;  %v6219_v23 = vmul.f32 %v10197_v54, %v12091_v18 }
 0x41f   : > { %10208 = vrcp.f32 %v6145_v1  ;;  %v6310_v27 = vsel %vm6278_vm8, %v6217_v11, 0.0  ;;  %9687 = vmatprep.subr.mxu1 %v12617_v37  ;;  %v12676_v11 = vld [vmem:[#allocation25_spill] sm:$0xff]  ;;  %vm6292_vm8 = vcmp.gt.f32.partialorder %v11915_v25, 0.0 }
 0x420   : > { %v10199_v8 = vpop.eup %10198  ;;  %9675 = vmatmul.mubr.msk.f32.vlgmr.msra.gmra.mrb[130].mxu0 %vm5923_vm5, %v6310_v27  ;;  %v6311_v53 = vsel %vm6279_vm9, %v6219_v23, 0.0 }
 0x421   : > { %v10201_v52 = vpop.eup %10200  ;;  %9683 = vmatpush3.msra.mxu0 %v12672_v9  ;;  %v6148_v2 = vpop.xlane.xlu0 %6147  ;;  %9680 = vmatmul.mubr.msk.f32.vlgmr.msra.gmra.mrb[130].mxu1 %vm5923_vm5, %v6311_v53  ;;  %v6221_v47 = vmul.f32 %v10199_v8, %v12098_v35  ;;  %v12678_v53 = vld [vmem:[#allocation27_spill] sm:$0xff] }
 0x422   : > { %10210 = vrcp.f32 %v6148_v2  ;;  %9688 = vmatpush3.msra.mxu1 %v12673_v46  ;;  %v6151_v18 = vpop.xlane.xlu1 %6150  ;;  %9684 = vmatprep.mubr.msk.f32.mxu0 %vm10459_vm0, %v12617_v37  ;;  %v6223_v61 = vmul.f32 %v10201_v52, %v12104_v42  ;;  %v12675_v42 = vld [vmem:[#allocation22_spill] sm:$0xff] }
 0x423   : > { %10212 = vrcp.f32 %v6151_v18  ;;  %9692 = vmatprep.subr.mxu0 %v12617_v37  ;;  %v6312_v17 = vsel %vm6280_vm10, %v6221_v47, 0.0  ;;  %9689 = vmatprep.mubr.msk.f32.mxu1 %vm10459_vm0, %v12617_v37  ;;  %v12680_v18 = vld [vmem:[#allocation29_spill] sm:$0xff] }
 0x424   : > { %v10203_v35 = vpop.eup %10202  ;;  %9685 = vmatmul.mubr.msk.f32.vlgmr.msra.gmra.mrb[132].mxu0 %vm5923_vm5, %v6312_v17  ;;  %9697 = vmatprep.subr.mxu1 %v12617_v37  ;;  %v6313_v5 = vsel %vm6281_vm11, %v6223_v61, 0.0 }
 0x425   : > { %v10205_v48 = vpop.eup %10204  ;;  %9693 = vmatpush3.msra.mxu0 %v12674_v30  ;;  %v6154_v21 = vpop.xlane.xlu0 %6153  ;;  %9690 = vmatmul.mubr.msk.f32.vlgmr.msra.gmra.mrb[132].mxu1 %vm5923_vm5, %v6313_v5  ;;  %v6225_v32 = vmul.f32 %v10203_v35, %v12110_v59  ;;  %v12682_v30 = vld [vmem:[#allocation31_spill] sm:$0xff] }
 0x426   : > { %10214 = vrcp.f32 %v6154_v21  ;;  %9698 = vmatpush3.msra.mxu1 %v12675_v42  ;;  %v6157_v13 = vpop.xlane.xlu1 %6156  ;;  %9694 = vmatprep.mubr.msk.f32.mxu0 %vm10459_vm0, %v12617_v37  ;;  %v6227_v20 = vmul.f32 %v10205_v48, %v12114_v33  ;;  %v12677_v33 = vld [vmem:[#allocation24_spill] sm:$0xff] }
 0x427   : > { %10216 = vrcp.f32 %v6157_v13  ;;  %9702 = vmatprep.subr.mxu0 %v12617_v37  ;;  %v6314_v54 = vsel %vm6282_vm12, %v6225_v32, 0.0  ;;  %9699 = vmatprep.mubr.msk.f32.mxu1 %vm10459_vm0, %v12617_v37 }
 0x428   : > { %v10207_v59 = vpop.eup %10206  ;;  %9695 = vmatmul.mubr.msk.f32.vlgmr.msra.gmra.mrb[134].mxu0 %vm5923_vm5, %v6314_v54  ;;  %9707 = vmatprep.subr.mxu1 %v12617_v37  ;;  %v6315_v39 = vsel %vm6283_vm13, %v6227_v20, 0.0  ;;  %v12684_v54 = vld [vmem:[#allocation33_spill] sm:$0xff] }
 0x429   : > { %v10209_v60 = vpop.eup %10208  ;;  %9703 = vmatpush3.msra.mxu0 %v12676_v11  ;;  %v6160_v45 = vpop.xlane.xlu0 %6159  ;;  %9700 = vmatmul.mubr.msk.f32.vlgmr.msra.gmra.mrb[134].mxu1 %vm5923_vm5, %v6315_v39  ;;  %v6229_v40 = vmul.f32 %v10207_v59, %v12120_v3  ;;  %v12686_v11 = vld [vmem:[#allocation43_spill] sm:$0xff] }
 0x42a   : > { %10218 = vrcp.f32 %v6160_v45  ;;  %9708 = vmatpush3.msra.mxu1 %v12677_v33  ;;  %v6163_v1 = vpop.xlane.xlu1 %6162  ;;  %9704 = vmatprep.mubr.msk.f32.mxu0 %vm10459_vm0, %v12617_v37  ;;  %v6231_v23 = vmul.f32 %v10209_v60, %v12124_v10  ;;  %v12679_v10 = vld [vmem:[#allocation26_spill] sm:$0xff]  ;;  %vm6293_vm9 = vcmp.gt.f32.partialorder %v12686_v11, 0.0  ;;  %v12687_v33 = vld [vmem:[#allocation35_spill] sm:$0xff] }
 0x42b   : > { %10220 = vrcp.f32 %v6163_v1  ;;  %9712 = vmatprep.subr.mxu0 %v12617_v37  ;;  %v6316_v27 = vsel %vm6284_vm14, %v6229_v40, 0.0  ;;  %9709 = vmatprep.mubr.msk.f32.mxu1 %vm10459_vm0, %v12617_v37 }
 0x42c   : > { %v10211_v3 = vpop.eup %10210  ;;  %9705 = vmatmul.mubr.msk.f32.vlgmr.msra.gmra.mrb[136].mxu0 %vm5923_vm5, %v6316_v27  ;;  %9717 = vmatprep.subr.mxu1 %v12617_v37  ;;  %v6317_v50 = vsel %vm6285_vm15, %v6231_v23, 0.0  ;;  %v12688_v23 = vld [vmem:[#allocation50_spill] sm:$0xff] }
 0x42d   : > { %v10213_v8 = vpop.eup %10212  ;;  %9713 = vmatpush3.msra.mxu0 %v12678_v53  ;;  %v6166_v52 = vpop.xlane.xlu0 %6165  ;;  %9710 = vmatmul.mubr.msk.f32.vlgmr.msra.gmra.mrb[136].mxu1 %vm5923_vm5, %v6317_v50  ;;  %v6233_v24 = vmul.f32 %v10211_v3, %v12130_v4  ;;  %vm6294_vm10 = vcmp.gt.f32.partialorder %v12688_v23, 0.0  ;;  %v12689_v27 = vld [vmem:[#allocation34_spill] sm:$0xff] }
 0x42e   : > { %10222 = vrcp.f32 %v6166_v52  ;;  %9718 = vmatpush3.msra.mxu1 %v12679_v10  ;;  %v6169_v9 = vpop.xlane.xlu1 %6168  ;;  %9714 = vmatprep.mubr.msk.f32.mxu0 %vm10459_vm0, %v12617_v37  ;;  %v6235_v2 = vmul.f32 %v10213_v8, %v12134_v49  ;;  %v12681_v49 = vld [vmem:[#allocation28_spill] sm:$0xff]  ;;  %v12690_v8 = vld [vmem:[#allocation45_spill] sm:$0xff] }
 0x42f   : > { %10224 = vrcp.f32 %v6169_v9  ;;  %9722 = vmatprep.subr.mxu0 %v12617_v37  ;;  %v6318_v47 = vsel %vm6286_vm1, %v6233_v24, 0.0  ;;  %9719 = vmatprep.mubr.msk.f32.mxu1 %vm10459_vm0, %v12617_v37  ;;  %vm6295_vm11 = vcmp.gt.f32.partialorder %v12690_v8, 0.0  ;;  %v12691_v10 = vld [vmem:[#allocation37_spill] sm:$0xff] }
 0x430   : > { %v10215_v4 = vpop.eup %10214  ;;  %9715 = vmatmul.mubr.msk.f32.vlgmr.msra.gmra.mrb[138].mxu0 %vm5923_vm5, %v6318_v47  ;;  %9727 = vmatprep.subr.mxu1 %v12617_v37  ;;  %v6319_v22 = vsel %vm6287_vm2, %v6235_v2, 0.0  ;;  %v12692_v2 = vld [vmem:[#allocation51_spill] sm:$0xff]  ;;  %v12693_v47 = vld [vmem:[#allocation36_spill] sm:$0xff] }
 0x431   : > { %v10217_v46 = vpop.eup %10216  ;;  %9723 = vmatpush3.msra.mxu0 %v12680_v18  ;;  %v6172_v61 = vpop.xlane.xlu0 %6171  ;;  %9720 = vmatmul.mubr.msk.f32.vlgmr.msra.gmra.mrb[138].mxu1 %vm5923_vm5, %v6319_v22  ;;  %v6237_v41 = vmul.f32 %v10215_v4, %v12140_v12  ;;  %vm6296_vm12 = vcmp.gt.f32.partialorder %v12692_v2, 0.0 }
 0x432   : > { %10226 = vrcp.f32 %v6172_v61  ;;  %9728 = vmatpush3.msra.mxu1 %v12681_v49  ;;  %v6175_v17 = vpop.xlane.xlu1 %6174  ;;  %9724 = vmatprep.mubr.msk.f32.mxu0 %vm10459_vm0, %v12617_v37  ;;  %v6239_v35 = vmul.f32 %v10217_v46, %v12144_v38  ;;  %v12683_v38 = vld [vmem:[#allocation30_spill] sm:$0xff]  ;;  %v12694_v46 = vld [vmem:[#allocation52_spill] sm:$0xff]  ;;  %v12695_v49 = vld [vmem:[#allocation39_spill] sm:$0xff] }
 0x433   : > { %10228 = vrcp.f32 %v6175_v17  ;;  %9732 = vmatprep.subr.mxu0 %v12617_v37  ;;  %v6320_v5 = vsel %vm6288_vm3, %v6237_v41, 0.0  ;;  %9729 = vmatprep.mubr.msk.f32.mxu1 %vm10459_vm0, %v12617_v37  ;;  %vm6297_vm13 = vcmp.gt.f32.partialorder %v12694_v46, 0.0 }
 0x434   : > { %v10219_v12 = vpop.eup %10218  ;;  %9725 = vmatmul.mubr.msk.f32.vlgmr.msra.gmra.mrb[140].mxu0 %vm5923_vm5, %v6320_v5  ;;  %9737 = vmatprep.subr.mxu1 %v12617_v37  ;;  %v6321_v44 = vsel %vm6289_vm4, %v6239_v35, 0.0  ;;  %v12696_v35 = vld [vmem:[#allocation57_spill] sm:$0xff]  ;;  %v12697_v5 = vld [vmem:[#allocation38_spill] sm:$0xff] }
 0x435   : > { %v10221_v48 = vpop.eup %10220  ;;  %9733 = vmatpush3.msra.mxu0 %v12682_v30  ;;  %v6178_v21 = vpop.xlane.xlu0 %6177  ;;  %9730 = vmatmul.mubr.msk.f32.vlgmr.msra.gmra.mrb[140].mxu1 %vm5923_vm5, %v6321_v44  ;;  %v6241_v28 = vmul.f32 %v10219_v12, %v12150_v58  ;;  %vm6298_vm14 = vcmp.gt.f32.partialorder %v12696_v35, 0.0 }
 0x436   : > { %10230 = vrcp.f32 %v6178_v21  ;;  %9738 = vmatpush3.msra.mxu1 %v12683_v38  ;;  %v6181_v32 = vpop.xlane.xlu1 %6180  ;;  %9734 = vmatprep.mubr.msk.f32.mxu0 %vm10459_vm0, %v12617_v37  ;;  %v6243_v42 = vmul.f32 %v10221_v48, %v12154_v6  ;;  %v12685_v6 = vld [vmem:[#allocation32_spill] sm:$0xff]  ;;  %v12698_v48 = vld [vmem:[#allocation53_spill] sm:$0xff] }
 0x437   : > { %10232 = vrcp.f32 %v6181_v32  ;;  %9742 = vmatprep.subr.mxu0 %v12617_v37  ;;  %v6322_v13 = vsel %vm6290_vm6, %v6241_v28, 0.0  ;;  %9739 = vmatprep.mubr.msk.f32.mxu1 %vm10459_vm0, %v12617_v37  ;;  %vm6299_vm15 = vcmp.gt.f32.partialorder %v12698_v48, 0.0  ;;  %v12699_v38 = vld [vmem:[#allocation41_spill] sm:$0xff] }
 0x438   : > { %v10223_v58 = vpop.eup %10222  ;;  %9735 = vmatmul.mubr.msk.f32.vlgmr.msra.gmra.mrb[142].mxu0 %vm5923_vm5, %v6322_v13  ;;  %9747 = vmatprep.subr.mxu1 %v12617_v37  ;;  %v6323_v62 = vsel %vm6291_vm7, %v6243_v42, 0.0  ;;  %v12700_v42 = vld [vmem:[#allocation54_spill] sm:$0xff]  ;;  %v12701_v13 = vld [vmem:[#allocation40_spill] sm:$0xff] }
 0x439   : > { %v10225_v20 = vpop.eup %10224  ;;  %9743 = vmatpush3.msra.mxu0 %v12684_v54  ;;  %v6184_v59 = vpop.xlane.xlu0 %6183  ;;  %9740 = vmatmul.mubr.msk.f32.vlgmr.msra.gmra.mrb[142].mxu1 %vm5923_vm5, %v6323_v62  ;;  %v6245_v55 = vmul.f32 %v10223_v58, %v12160_v7  ;;  %vm6300_vm1 = vcmp.gt.f32.partialorder %v12700_v42, 0.0 }
 0x43a   : > { %10234 = vrcp.f32 %v6184_v59  ;;  %9748 = vmatpush3.msra.mxu1 %v12685_v6  ;;  %v6187_v39 = vpop.xlane.xlu1 %6186  ;;  %9744 = vmatprep.mubr.msk.f32.mxu0 %vm10459_vm0, %v12617_v37  ;;  %v6247_v60 = vmul.f32 %v10225_v20, %v12164_v51  ;;  %v12702_v20 = vld [vmem:[#allocation55_spill] sm:$0xff]  ;;  %v12703_v6 = vld [vmem:[#allocation44_spill] sm:$0xff] }
 0x43b   : > { %10236 = vrcp.f32 %v6187_v39  ;;  %9752 = vmatprep.subr.mxu0 %v12617_v37  ;;  %v6324_v45 = vsel %vm6292_vm8, %v6245_v55, 0.0  ;;  %9749 = vmatprep.mubr.msk.f32.mxu1 %vm10459_vm0, %v12617_v37  ;;  %vm6301_vm2 = vcmp.gt.f32.partialorder %v12702_v20, 0.0  ;;  %v12704_v39 = vld [vmem:[#allocation61_spill] sm:$0xff] }
 0x43c   : > { %v10227_v7 = vpop.eup %10226  ;;  %9745 = vmatmul.mubr.msk.f32.vlgmr.msra.gmra.mrb[144].mxu0 %vm5923_vm5, %v6324_v45  ;;  %9757 = vmatprep.subr.mxu1 %v12617_v37  ;;  %v6325_v25 = vsel %vm6293_vm9, %v6247_v60, 0.0  ;;  %vm6302_vm3 = vcmp.gt.f32.partialorder %v12704_v39, 0.0  ;;  %v12705_v60 = vld [vmem:[#allocation42_spill] sm:$0xff]  ;;  %v12706_v45 = vld [vmem:[#allocation56_spill] sm:$0xff] }
 0x43d   : > { %v10229_v40 = vpop.eup %10228  ;;  %9753 = vmatpush3.msra.mxu0 %v12687_v33  ;;  %v6190_v1 = vpop.xlane.xlu0 %6189  ;;  %9750 = vmatmul.mubr.msk.f32.vlgmr.msra.gmra.mrb[144].mxu1 %vm5923_vm5, %v6325_v25  ;;  %v6249_v51 = vmul.f32 %v10227_v7, %v12170_v16  ;;  %vm6303_vm4 = vcmp.gt.f32.partialorder %v12706_v45, 0.0  ;;  %v12707_v33 = vld [vmem:[#allocation47_spill] sm:$0xff] }
 0x43e   : > { %10238 = vrcp.f32 %v6190_v1  ;;  %9758 = vmatpush3.msra.mxu1 %v12689_v27  ;;  %v6193_v3 = vpop.xlane.xlu1 %6192  ;;  %9754 = vmatprep.mubr.msk.f32.mxu0 %vm10459_vm0, %v12617_v37  ;;  %v6251_v50 = vmul.f32 %v10229_v40, %v12174_v63  ;;  %v12708_v1 = vld [vmem:[#allocation58_spill] sm:$0xff]  ;;  %v12710_v27 = vld [vmem:[#allocation59_spill] sm:$0xff] }
 0x43f   : > { %10240 = vrcp.f32 %v6193_v3  ;;  %9762 = vmatprep.subr.mxu0 %v12617_v37  ;;  %v6326_v53 = vsel %vm6294_vm10, %v6249_v51, 0.0  ;;  %9759 = vmatprep.mubr.msk.f32.mxu1 %vm10459_vm0, %v12617_v37  ;;  %vm6304_vm6 = vcmp.gt.f32.partialorder %v12708_v1, 0.0  ;;  %v12709_v51 = vld [vmem:[#allocation46_spill] sm:$0xff]  ;;  %vm6305_vm7 = vcmp.gt.f32.partialorder %v12710_v27, 0.0 }
 0x440   : > { %v10231_v16 = vpop.eup %10230  ;;  %9755 = vmatmul.mubr.msk.f32.vlgmr.msra.gmra.mrb[146].mxu0 %vm5923_vm5, %v6326_v53  ;;  %9767 = vmatprep.subr.mxu1 %v12617_v37  ;;  %v6327_v52 = vsel %vm6295_vm11, %v6251_v50, 0.0  ;;  %v12711_v53 = vld [vmem:[#allocation49_spill] sm:$0xff] }
 0x441   : > { %v10233_v24 = vpop.eup %10232  ;;  %9763 = vmatpush3.msra.mxu0 %v12691_v10  ;;  %v6196_v9 = vpop.xlane.xlu0 %6195  ;;  %9760 = vmatmul.mubr.msk.f32.vlgmr.msra.gmra.mrb[146].mxu1 %vm5923_vm5, %v6327_v52  ;;  %v6253_v63 = vmul.f32 %v10231_v16, %v12180_v0  ;;  %v12712_v16 = vld [vmem:[#allocation65_spill] sm:$0xff]  ;;  %v12713_v52 = vld [vmem:[#allocation48_spill] sm:$0xff] }
 0x442   : > { %10242 = vrcp.f32 %v6196_v9  ;;  %9768 = vmatpush3.msra.mxu1 %v12693_v47  ;;  %v6199_v4 = vpop.xlane.xlu1 %6198  ;;  %9764 = vmatprep.mubr.msk.f32.mxu0 %vm10459_vm0, %v12617_v37  ;;  %v6255_v22 = vmul.f32 %v10233_v24, %v12184_v26  ;;  %vm6306_vm8 = vcmp.gt.f32.partialorder %v12712_v16, 0.0  ;;  %v12714_v10 = vld [vmem:[#allocation60_spill] sm:$0xff] }
 0x443   : > { %10244 = vrcp.f32 %v6199_v4  ;;  %9772 = vmatprep.subr.mxu0 %v12617_v37  ;;  %v6328_v18 = vsel %vm6296_vm12, %v6253_v63, 0.0  ;;  %9769 = vmatprep.mubr.msk.f32.mxu1 %vm10459_vm0, %v12617_v37  ;;  %vm6307_vm9 = vcmp.gt.f32.partialorder %v12714_v10, 0.0 }
 0x444   : > { %v10235_v0 = vpop.eup %10234  ;;  %9765 = vmatmul.mubr.msk.f32.vlgmr.msra.gmra.mrb[148].mxu0 %vm5923_vm5, %v6328_v18  ;;  %9777 = vmatprep.subr.mxu1 %v12617_v37  ;;  %v6329_v61 = vsel %vm6297_vm13, %v6255_v22, 0.0 }
 0x445   : > { %v10237_v41 = vpop.eup %10236  ;;  %9773 = vmatpush3.msra.mxu0 %v12695_v49  ;;  %v6202_v17 = vpop.xlane.xlu0 %6201  ;;  %9770 = vmatmul.mubr.msk.f32.vlgmr.msra.gmra.mrb[148].mxu1 %vm5923_vm5, %v6329_v61  ;;  %v6257_v26 = vmul.f32 %v10235_v0, %v12190_v56 }
 0x446   : > { %10246 = vrcp.f32 %v6202_v17  ;;  %9778 = vmatpush3.msra.mxu1 %v12697_v5  ;;  %v6205_v12 = vpop.xlane.xlu1 %6204  ;;  %9774 = vmatprep.mubr.msk.f32.mxu0 %vm10459_vm0, %v12617_v37  ;;  %v6259_v44 = vmul.f32 %v10237_v41, %v12194_v19 }
 0x447   : > { %10248 = vrcp.f32 %v6205_v12  ;;  %9782 = vmatprep.subr.mxu0 %v12617_v37  ;;  %v6330_v30 = vsel %vm6298_vm14, %v6257_v26, 0.0  ;;  %9779 = vmatprep.mubr.msk.f32.mxu1 %vm10459_vm0, %v12617_v37 }
 0x448   : > { %v10239_v56 = vpop.eup %10238  ;;  %9775 = vmatmul.mubr.msk.f32.vlgmr.msra.gmra.mrb[150].mxu0 %vm5923_vm5, %v6330_v30  ;;  %9787 = vmatprep.subr.mxu1 %v12617_v37  ;;  %v6331_v21 = vsel %vm6299_vm15, %v6259_v44, 0.0 }
 0x449   : > { %v10241_v28 = vpop.eup %10240  ;;  %9783 = vmatpush3.msra.mxu0 %v12699_v38  ;;  %v6208_v32 = vpop.xlane.xlu0 %6207  ;;  %9780 = vmatmul.mubr.msk.f32.vlgmr.msra.gmra.mrb[150].mxu1 %vm5923_vm5, %v6331_v21  ;;  %v6261_v19 = vmul.f32 %v10239_v56, %v12200_v43 }
 0x44a   : > { %10250 = vrcp.f32 %v6208_v32  ;;  %9788 = vmatpush3.msra.mxu1 %v12701_v13  ;;  %v6211_v58 = vpop.xlane.xlu1 %6210  ;;  %9784 = vmatprep.mubr.msk.f32.mxu0 %vm10459_vm0, %v12617_v37  ;;  %v6263_v62 = vmul.f32 %v10241_v28, %v12203_v29 }
 0x44b   : > { %10252 = vrcp.f32 %v6211_v58  ;;  %9792 = vmatprep.subr.mxu0 %v12617_v37  ;;  %v6332_v54 = vsel %vm6300_vm1, %v6261_v19, 0.0  ;;  %9789 = vmatprep.mubr.msk.f32.mxu1 %vm10459_vm0, %v12617_v37 }
 0x44c   : > { %v10243_v43 = vpop.eup %10242  ;;  %9785 = vmatmul.mubr.msk.f32.vlgmr.msra.gmra.mrb[152].mxu0 %vm5923_vm5, %v6332_v54  ;;  %9797 = vmatprep.subr.mxu1 %v12617_v37  ;;  %v6333_v59 = vsel %vm6301_vm2, %v6263_v62, 0.0 }
 0x44d   : > { %v10245_v55 = vpop.eup %10244  ;;  %9793 = vmatpush3.msra.mxu0 %v12703_v6  ;;  %9790 = vmatmul.mubr.msk.f32.vlgmr.msra.gmra.mrb[152].mxu1 %vm5923_vm5, %v6333_v59  ;;  %v6265_v29 = vmul.f32 %v10243_v43, %v12209_v57 }
 0x44e   : > { %9798 = vmatpush3.msra.mxu1 %v12705_v60  ;;  %9794 = vmatprep.mubr.msk.f32.mxu0 %vm10459_vm0, %v12617_v37  ;;  %v6267_v11 = vmul.f32 %v10245_v55, %v12211_v34 }
 0x44f   : > { %9802 = vmatprep.subr.mxu0 %v12617_v37  ;;  %v6334_v7 = vsel %vm6302_vm3, %v6265_v29, 0.0  ;;  %9799 = vmatprep.mubr.msk.f32.mxu1 %vm10459_vm0, %v12617_v37 }
 0x450   : > { %v10247_v25 = vpop.eup %10246  ;;  %9795 = vmatmul.mubr.msk.f32.vlgmr.msra.gmra.mrb[154].mxu0 %vm5923_vm5, %v6334_v7  ;;  %9807 = vmatprep.subr.mxu1 %v12617_v37  ;;  %v6335_v57 = vsel %vm6303_vm4, %v6267_v11, 0.0 }
 0x451   : > { %v10249_v40 = vpop.eup %10248  ;;  %9803 = vmatpush3.msra.mxu0 %v12707_v33  ;;  %9800 = vmatmul.mubr.msk.f32.vlgmr.msra.gmra.mrb[154].mxu1 %vm5923_vm5, %v6335_v57  ;;  %v6269_v34 = vmul.f32 %v10247_v25, %v12217_v36 }
 0x452   : > { %9808 = vmatpush3.msra.mxu1 %v12709_v51  ;;  %9804 = vmatprep.mubr.msk.f32.mxu0 %vm10459_vm0, %v12617_v37  ;;  %v6271_v23 = vmul.f32 %v10249_v40, %v12219_v14 }
 0x453   : > { %9812 = vmatprep.subr.mxu0 %v12617_v37  ;;  %v6336_v3 = vsel %vm6304_vm6, %v6269_v34, 0.0  ;;  %9809 = vmatprep.mubr.msk.f32.mxu1 %vm10459_vm0, %v12617_v37 }
 0x454   : > { %v10251_v50 = vpop.eup %10250  ;;  %9805 = vmatmul.mubr.msk.f32.vlgmr.msra.gmra.mrb[156].mxu0 %vm5923_vm5, %v6336_v3  ;;  %9817 = vmatprep.subr.mxu1 %v12617_v37  ;;  %v6337_v36 = vsel %vm6305_vm7, %v6271_v23, 0.0 }
 0x455   : > { %v10253_v8 = vpop.eup %10252  ;;  %9813 = vmatpush3.msra.mxu0 %v12711_v53  ;;  %9810 = vmatmul.mubr.msk.f32.vlgmr.msra.gmra.mrb[156].mxu1 %vm5923_vm5, %v6337_v36  ;;  %v6273_v14 = vmul.f32 %v10251_v50, %v12225_v31 }
 0x456   : > { %9818 = vmatpush3.msra.mxu1 %v12713_v52  ;;  %9814 = vmatprep.mubr.msk.f32.mxu0 %vm10459_vm0, %v12617_v37  ;;  %v6275_v24 = vmul.f32 %v10253_v8, %v12227_v15 }
 0x457   : > { %v6338_v9 = vsel %vm6306_vm8, %v6273_v14, 0.0  ;;  %9819 = vmatprep.mubr.msk.f32.mxu1 %vm10459_vm0, %v12617_v37 }
 0x458   : > { %9815 = vmatmul.mubr.msk.f32.vlgmr.msra.gmra.mrb[158].mxu0 %vm5923_vm5, %v6338_v9  ;;  %v6339_v63 = vsel %vm6307_vm9, %v6275_v24, 0.0 }
 0x459   : > { %9820 = vmatmul.mubr.msk.f32.vlgmr.msra.gmra.mrb[158].mxu1 %vm5923_vm5, %v6339_v63 }
 0x4ec   : > { %v6409_v31 = vpop.f32.mrb[128].mxu0 }
 0x4ed   : > { %8676 = vst [vmem:[%s12448_s21] sm:$0xff] %v6409_v31  ;;  %v9666_v15 = vpop.f32.mrb[129].mxu0 }
 0x4f0   : > { %v6482_v2 = vpop.f32.mrb[128].mxu1 }
 0x4f1   : > { %8677 = vst [vmem:[%s12448_s21 + $0x8] sm:$0xff] %v6482_v2  ;;  %v9671_v37 = vpop.f32.mrb[129].mxu1 }
 0x4f3   : > { %v6555_v47 = vpop.f32.mrb[130].mxu0 }
 0x4f4   : > { %8678 = vst [vmem:[%s12448_s21 + $0x10] sm:$0xff] %v6555_v47  ;;  %v9676_v4 = vpop.f32.mrb[131].mxu0  ;;  %v6628_v22 = vpop.f32.mrb[130].mxu1 }
 0x4f5   : > { %8679 = vst [vmem:[%s12448_s21 + $0x18] sm:$0xff] %v6628_v22  ;;  %v9681_v46 = vpop.f32.mrb[131].mxu1 }
 0x4f7   : > { %v6701_v18 = vpop.f32.mrb[132].mxu0 }
 0x4f8   : > { %8680 = vst [vmem:[%s12448_s21 + $0x20] sm:$0xff] %v6701_v18  ;;  %v9686_v0 = vpop.f32.mrb[133].mxu0  ;;  %v6774_v61 = vpop.f32.mrb[132].mxu1 }
 0x4f9   : > { %8681 = vst [vmem:[%s12448_s21 + $0x28] sm:$0xff] %v6774_v61  ;;  %v9691_v41 = vpop.f32.mrb[133].mxu1 }
 0x4fb   : > { %v6847_v49 = vpop.f32.mrb[134].mxu0 }
 0x4fc   : > { %8682 = vst [vmem:[%s12448_s21 + $0x30] sm:$0xff] %v6847_v49  ;;  %v9696_v17 = vpop.f32.mrb[135].mxu0  ;;  %v6920_v26 = vpop.f32.mrb[134].mxu1 }
 0x4fd   : > { %8683 = vst [vmem:[%s12448_s21 + $0x38] sm:$0xff] %v6920_v26  ;;  %v9701_v35 = vpop.f32.mrb[135].mxu1 }
 0x4ff   : > { %v6993_v5 = vpop.f32.mrb[136].mxu0 }
 0x500   : > { %8684 = vst [vmem:[%s12448_s21 + $0x40] sm:$0xff] %v6993_v5  ;;  %v9706_v12 = vpop.f32.mrb[137].mxu0  ;;  %v7066_v44 = vpop.f32.mrb[136].mxu1 }
 0x501   : > { %8685 = vst [vmem:[%s12448_s21 + $0x48] sm:$0xff] %v7066_v44  ;;  %v9711_v48 = vpop.f32.mrb[137].mxu1 }
 0x503   : > { %v7139_v30 = vpop.f32.mrb[138].mxu0 }
 0x504   : > { %8686 = vst [vmem:[%s12448_s21 + $0x50] sm:$0xff] %v7139_v30  ;;  %v9716_v56 = vpop.f32.mrb[139].mxu0  ;;  %v7212_v21 = vpop.f32.mrb[138].mxu1 }
 0x505   : > { %8687 = vst [vmem:[%s12448_s21 + $0x58] sm:$0xff] %v7212_v21  ;;  %v9721_v28 = vpop.f32.mrb[139].mxu1 }
 0x507   : > { %v7285_v38 = vpop.f32.mrb[140].mxu0 }
 0x508   : > { %8688 = vst [vmem:[%s12448_s21 + $0x60] sm:$0xff] %v7285_v38  ;;  %v9726_v32 = vpop.f32.mrb[141].mxu0  ;;  %v7358_v19 = vpop.f32.mrb[140].mxu1 }
 0x509   : > { %8689 = vst [vmem:[%s12448_s21 + $0x68] sm:$0xff] %v7358_v19  ;;  %v9731_v42 = vpop.f32.mrb[141].mxu1 }
 0x50b   : > { %v7431_v13 = vpop.f32.mrb[142].mxu0 }
 0x50c   : > { %8690 = vst [vmem:[%s12448_s21 + $0x70] sm:$0xff] %v7431_v13  ;;  %v9736_v58 = vpop.f32.mrb[143].mxu0  ;;  %v7504_v62 = vpop.f32.mrb[142].mxu1 }
 0x50d   : > { %8691 = vst [vmem:[%s12448_s21 + $0x78] sm:$0xff] %v7504_v62  ;;  %v9741_v20 = vpop.f32.mrb[143].mxu1 }
 0x50f   : > { %v7577_v54 = vpop.f32.mrb[144].mxu0 }
 0x510   : > { %8692 = vst [vmem:[%s12448_s21 + $0x80] sm:$0xff] %v7577_v54  ;;  %v9746_v43 = vpop.f32.mrb[145].mxu0  ;;  %v7650_v59 = vpop.f32.mrb[144].mxu1 }
 0x511   : > { %8693 = vst [vmem:[%s12448_s21 + $0x88] sm:$0xff] %v7650_v59  ;;  %v9751_v55 = vpop.f32.mrb[145].mxu1 }
 0x513   : > { %v7723_v6 = vpop.f32.mrb[146].mxu0 }
 0x514   : > { %8694 = vst [vmem:[%s12448_s21 + $0x90] sm:$0xff] %v7723_v6  ;;  %v9756_v29 = vpop.f32.mrb[147].mxu0  ;;  %v7796_v39 = vpop.f32.mrb[146].mxu1 }
 0x515   : > { %8695 = vst [vmem:[%s12448_s21 + $0x98] sm:$0xff] %v7796_v39  ;;  %v9761_v60 = vpop.f32.mrb[147].mxu1 }
 0x517   : > { %v7869_v11 = vpop.f32.mrb[148].mxu0 }
 0x518   : > { %8696 = vst [vmem:[%s12448_s21 + $0xa0] sm:$0xff] %v7869_v11  ;;  %v9766_v45 = vpop.f32.mrb[149].mxu0  ;;  %v7942_v7 = vpop.f32.mrb[148].mxu1 }
 0x519   : > { %8697 = vst [vmem:[%s12448_s21 + $0xa8] sm:$0xff] %v7942_v7  ;;  %v9771_v25 = vpop.f32.mrb[149].mxu1 }
 0x51b   : > { %v8015_v57 = vpop.f32.mrb[150].mxu0 }
 0x51c   : > { %8698 = vst [vmem:[%s12448_s21 + $0xb0] sm:$0xff] %v8015_v57  ;;  %v9776_v40 = vpop.f32.mrb[151].mxu0  ;;  %v8088_v33 = vpop.f32.mrb[150].mxu1 }
 0x51d   : > { %8699 = vst [vmem:[%s12448_s21 + $0xb8] sm:$0xff] %v8088_v33  ;;  %v9781_v34 = vpop.f32.mrb[151].mxu1 }
 0x51f   : > { %v8161_v1 = vpop.f32.mrb[152].mxu0 }
 0x520   : > { %8700 = vst [vmem:[%s12448_s21 + $0xc0] sm:$0xff] %v8161_v1  ;;  %v9786_v51 = vpop.f32.mrb[153].mxu0  ;;  %v8234_v23 = vpop.f32.mrb[152].mxu1 }
 0x521   : > { %8701 = vst [vmem:[%s12448_s21 + $0xc8] sm:$0xff] %v8234_v23  ;;  %v9791_v27 = vpop.f32.mrb[153].mxu1 }
 0x523   : > { %v8307_v3 = vpop.f32.mrb[154].mxu0 }
 0x524   : > { %8702 = vst [vmem:[%s12448_s21 + $0xd0] sm:$0xff] %v8307_v3  ;;  %v9796_v50 = vpop.f32.mrb[155].mxu0  ;;  %v8380_v36 = vpop.f32.mrb[154].mxu1 }
 0x525   : > { %8703 = vst [vmem:[%s12448_s21 + $0xd8] sm:$0xff] %v8380_v36  ;;  %v9801_v8 = vpop.f32.mrb[155].mxu1 }
 0x527   : > { %v8453_v53 = vpop.f32.mrb[156].mxu0 }
 0x528   : > { %8704 = vst [vmem:[%s12448_s21 + $0xe0] sm:$0xff] %v8453_v53  ;;  %v9806_v14 = vpop.f32.mrb[157].mxu0  ;;  %v8526_v16 = vpop.f32.mrb[156].mxu1 }
 0x529   : > { %8705 = vst [vmem:[%s12448_s21 + $0xe8] sm:$0xff] %v8526_v16  ;;  %v9811_v52 = vpop.f32.mrb[157].mxu1 }
 0x52b   : > { %v8599_v24 = vpop.f32.mrb[158].mxu0 }
 0x52c   : > { %8706 = vst [vmem:[%s12448_s21 + $0xf0] sm:$0xff] %v8599_v24  ;;  %v9816_v10 = vpop.f32.mrb[159].mxu0  ;;  %v8672_v9 = vpop.f32.mrb[158].mxu1 }
 0x52d   : > { %8707 = vst [vmem:[%s12448_s21 + $0xf8] sm:$0xff] %v8672_v9  ;;  %v9821_v63 = vpop.f32.mrb[159].mxu1 }
 0x52e   : > { %10383 = shalt.err (!%p10380_p5)
}
 0x52f   : > { %s10384_s0 = scalar_lea.hbm %s12485_s8, 4096  ;;  %s10388_s20 = scalar_lea.hbm %s12537_s4, 8192 }
 0x530   : > { %p10385_p9 = scmp.ne.s32.totalorder %s12485_s8, %s10384_s0  ;;  %p10389_p11 = scmp.lt.u32.totalorder %s12485_s8, %s12537_s4 }
 0x531   : > { %p10390_p1 = scmp.lt.u32.totalorder %s10388_s20, %s10384_s0  ;;  %p10392_p2 = scmp.lt.u32.totalorder %s10384_s0, %s12485_s8 }
 0x532   : > { %p10386_p0 = pnand %p10385_p9, %p12715_p13 }
 0x533   : > { %p10391_p12 = por %p10390_p1, %p10389_p11 }
 0x534   : > { %p10387_p8 = pneg %p10386_p0 }
 0x535   : > { %p10393_p6 = por %p10392_p2, %p10391_p12 }
 0x537   : > { %p10394_p10 = pnand %p10393_p6, %p10387_p8 }
 0x539   : > { %10397 = shalt.err (!%p10394_p10)
}
 0x53a   : > { %s10461_s27 = smov 128   ;;  %s10462_s21 = smov 8  }
 0x53b   : > { %9930 = dma.vmem_to_hbm [thread:$0]  (%p12715_p13), %s12487_s5, 4096, %s12485_s8, %s8709_s19, %s10461_s27, %s10461_s27, %s10462_s21  }
 0x53c PF: > { %s8737_s13 = sand.u32 1, %s10436_s15   ;;  %p12716_p4 = scmp.ne.s32.totalorder %s12568_s22, 0 }
 0x53d   : > { %p12717_p7 = scmp.ge.s32.totalorder %s10448_s18, 2  ;;  %s8738_s10 = scalar_lea.sflag [#allocation4], %s8737_s13 }
 0x53f   : > { %p9947_p3 = pnand %p12717_p7, %p12716_p4 }
 0x541   : > { %10431 = dma.done.wait (!%p9947_p3), %s8738_s10, 4096  }
 0x542   : > { %10433 = vsyncadd (!%p9947_p3), %s8738_s10, 4294963200  ;;  %p21_p5 = scmp.ge.s32.totalorder %s10601_s11, 4   ;;  %s12718_s15 = smov %s10440_s16 }
 0x543   : > { %s12719_s16 = smov %s10444_s17  ;;  %s12720_s17 = smov %s10610_s14 }
 0x544   : > { %s12721_s18 = smov %s10601_s11  ;;  %23 = sbr.rel (!%p21_p5) target bundleno = 10 (0xa), region = 102 }
 0x54b   :  { %8743 = vsyncpa [#allocation3], 1 }
 0x54c   :  { %8745 = vsyncpa [#allocation3 + $0x1], 1 }
 0x54d   :  { %8746 = vsyncpa [#allocation6], 1 }
 0x54e   :  { %8748 = vsyncpa [#allocation6 + $0x1], 1 }
 0x54f   :  { %8749 = vsyncpa [#allocation9], 1 }
 0x550   :  { %8750 = vsyncpa [#allocation4], 1 }
 0x551   :  { %8752 = vsyncpa [#allocation4 + $0x1], 1 }

</bundles_post_ra>
